<compile_context>
chip_gen: v5e
topology: v5e:2x2
jax: 0.10.0
libtpu: 0.0.40
codegen_flags: <defaults>
</compile_context>

<pallas_src>
import functools

import jax
import jax.numpy as jnp
from jax.experimental import pallas as pl
from jax.experimental.pallas import tpu as pltpu


def _gelu_tanh(x):
    # TODO(synk): torch nn.GELU() default is the exact erf form; erf lowering in
    # Mosaic is not guaranteed, so the standard tanh approximation is used
    # (max abs deviation ~3e-4).
    c = 0.7978845608028654  # sqrt(2/pi)
    return 0.5 * x * (1.0 + jnp.tanh(c * (x + 0.044715 * x * x * x)))


def _block_kernel(
    x_ref,       # (N, C)       input tokens for this batch element
    wqkv_ref,    # (C, 3C)      fused qkv weight, pre-transposed, scale folded into q cols
    wfc_ref,     # (N, N)       fc weight reshaped to the (N,N) score layout
    wproj_ref,   # (C, C)       proj weight, pre-transposed
    wm1_ref,     # (C, Hd)      mlp fc1 weight, pre-transposed
    wm2_ref,     # (Hd, C)      mlp fc2 weight, pre-transposed
    small_ref,   # (8, Lpad)    packed tiny params (see wrapper for row layout)
    out_ref,     # (N, C)       block output
    attn_ref,    # (N, H*N)     post-softmax attention, lane-dense (head h at cols h*N)
    *, num_heads, eps,
):
    x = x_ref[...]
    N, C = x.shape
    D = C // num_heads
    Hd = wm1_ref.shape[1]

    # ---- unpack the single small-parameter block (1 DMA instead of 8) ----
    g1 = small_ref[0:1, 0:C]
    be1 = small_ref[1:2, 0:C]
    bp = small_ref[2:3, 0:C]
    g2 = small_ref[3:4, 0:C]
    be2 = small_ref[4:5, 0:C]
    bm2 = small_ref[5:6, 0:C]
    bm1 = small_ref[6:7, 0:Hd]
    fc_b = small_ref[7, 0]

    # ---------------- LayerNorm 1 ----------------
    mu = jnp.mean(x, axis=-1, keepdims=True)
    xc = x - mu
    var = jnp.mean(xc * xc, axis=-1, keepdims=True)
    xn = xc * jax.lax.rsqrt(var + eps) * g1 + be1

    # ---- fused QKV projection (qkv_bias=False); scale pre-folded into q ----
    qkv = jnp.dot(xn, wqkv_ref[...], preferred_element_type=jnp.float32)  # (N, 3C)

    w_fc = wfc_ref[...]                                                   # (N, N)

    # ---- per-head attention with learned head-drop ----
    o_list = []
    for h in range(num_heads):                      # static unroll (H small)
        qh = qkv[:, h * D:(h + 1) * D]
        kh = qkv[:, C + h * D:C + (h + 1) * D]
        vh = qkv[:, 2 * C + h * D:2 * C + (h + 1) * D]

        # s = (q*scale) @ k^T  (contract last-last; no explicit transpose)
        s = jax.lax.dot_general(qh, kh, (((1,), (1,)), ((), ())),
                                preferred_element_type=jnp.float32)       # (N, N)

        # keep head iff mean(s) > fc(s)  (reference form, f32)
        importance = jnp.mean(s)
        score = jnp.sum(s * w_fc) + fc_b
        keep = (importance > score).astype(jnp.float32)
        sm = s * keep            # dropped head -> zeros -> uniform softmax row

        # numerically stable softmax (f32)
        m = jnp.max(sm, axis=-1, keepdims=True)
        e = jnp.exp(sm - m)
        p = e / jnp.sum(e, axis=-1, keepdims=True)

        # lane-dense attention output slab: head h occupies columns h*N:(h+1)*N
        attn_ref[:, h * N:(h + 1) * N] = p

        o_list.append(jnp.dot(p, vh, preferred_element_type=jnp.float32))  # (N, D)

    # ---- single output projection: concat heads (N,C), one (N,C)@(C,C) matmul ----
    o_cat = jnp.concatenate(o_list, axis=-1)                               # (N, C)
    proj = jnp.dot(o_cat, wproj_ref[...], preferred_element_type=jnp.float32) + bp

    # ------- residual 1 (attn_drop / proj_drop / drop_path = identity) -------
    x1 = x + proj

    # ---------------- LayerNorm 2 ----------------
    mu2 = jnp.mean(x1, axis=-1, keepdims=True)
    xc2 = x1 - mu2
    var2 = jnp.mean(xc2 * xc2, axis=-1, keepdims=True)
    x1n = xc2 * jax.lax.rsqrt(var2 + eps) * g2 + be2

    # ---------------- MLP (fc1 -> GELU -> fc2) + residual 2 ----------------
    h1 = jnp.dot(x1n, wm1_ref[...], preferred_element_type=jnp.float32) + bm1
    h1 = _gelu_tanh(h1)
    h2 = jnp.dot(h1, wm2_ref[...], preferred_element_type=jnp.float32) + bm2

    out_ref[...] = x1 + h2


@functools.partial(jax.jit, static_argnames=("num_heads", "eps"))
def block_forward(x, params, num_heads, eps=1e-5):
    B, N, C = x.shape
    D = C // num_heads
    Hd = params["w_mlp1"].shape[1]
    scale = float(D) ** (-0.5)          # qk_scale=None -> head_dim ** -0.5

    # --- tiny one-time weight rearrangements (parameters only, no activation traffic) ---
    # fold the softmax scale into the q columns of the fused qkv weight
    scale_vec = jnp.concatenate([jnp.full((C,), scale, jnp.float32),
                                 jnp.ones((2 * C,), jnp.float32)])
    w_qkv = params["w_qkv"] * scale_vec[None, :]                       # (C, 3C)
    w_fc = params["w_fc"].reshape(N, N)

    # pack all tiny per-feature parameters into one lane-aligned block
    lane_pad = ((max(C, Hd) + 127) // 128) * 128

    def row(v):
        v = v.reshape(1, -1).astype(jnp.float32)
        return jnp.pad(v, ((0, 0), (0, lane_pad - v.shape[1])))

    small = jnp.concatenate([
        row(params["norm1_g"]), row(params["norm1_b"]),                # rows 0,1
        row(params["b_proj"]),                                         # row 2
        row(params["norm2_g"]), row(params["norm2_b"]),                # rows 3,4
        row(params["b_mlp2"]),                                         # row 5
        row(params["b_mlp1"]),                                         # row 6
        row(params["b_fc"]),                                           # row 7
    ], axis=0)                                                         # (8, lane_pad)

    kern = functools.partial(_block_kernel, num_heads=num_heads, eps=eps)

    def full(shape):
        return pl.BlockSpec(shape, lambda b: (0,) * len(shape))

    x_spec = pl.BlockSpec((None, N, C), lambda b: (b, 0, 0))
    attn_spec = pl.BlockSpec((None, N, num_heads * N), lambda b: (b, 0, 0))

    x_out, attn_slab = pl.pallas_call(
        kern,
        grid=(B,),
        in_specs=[
            x_spec,
            full((C, 3 * C)),          # fused qkv weight
            full((N, N)),              # fc weight
            full((C, C)),              # proj weight
            full((C, Hd)),             # mlp fc1 weight
            full((Hd, C)),             # mlp fc2 weight
            full((8, lane_pad)),       # packed tiny params
        ],
        out_specs=[x_spec, attn_spec],
        out_shape=(
            jax.ShapeDtypeStruct((B, N, C), jnp.float32),
            jax.ShapeDtypeStruct((B, N, num_heads * N), jnp.float32),
        ),
        compiler_params=pltpu.CompilerParams(dimension_semantics=("parallel",)),
    )(x, w_qkv, w_fc, params["w_proj"], params["w_mlp1"], params["w_mlp2"], small)

    # lane-dense (B, N, H*N) slab -> reference (B, H, N, N) layout
    attn = attn_slab.reshape(B, N, num_heads, N).transpose(0, 2, 1, 3)
    return x_out, attn


if __name__ == "__main__":
    B, N, C, H = 2, 64, 32, 4          # N = num_patches (fc expects N*N inputs)
    D = C // H
    Hd = int(C * 4.0)                  # mlp_ratio = 4.0

    key = jax.random.PRNGKey(0)
    ks = jax.random.split(key, 12)

    x = jax.random.normal(ks[0], (B, N, C), dtype=jnp.float32)

    params = {
        # torch nn.Linear(dim, 3*dim, bias=False): weight (3C, C); stored pre-transposed (C, 3C)
        "w_qkv": jax.random.normal(ks[1], (C, 3 * C), dtype=jnp.float32) * 0.02,
        # nn.Linear(dim, dim): stored pre-transposed (C, C)
        "w_proj": jax.random.normal(ks[2], (C, C), dtype=jnp.float32) * 0.02,
        "b_proj": jax.random.normal(ks[3], (C,), dtype=jnp.float32) * 0.02,
        # nn.Linear(num_patches*num_patches, 1): weight (1, N*N), bias (1,)
        "w_fc": jax.random.normal(ks[4], (1, N * N), dtype=jnp.float32) * 0.02,
        "b_fc": jax.random.normal(ks[5], (1,), dtype=jnp.float32) * 0.02,
        # LayerNorm affine params (perturbed from identity to exercise the path)
        "norm1_g": 1.0 + 0.02 * jax.random.normal(ks[6], (C,), dtype=jnp.float32),
        "norm1_b": 0.02 * jax.random.normal(ks[7], (C,), dtype=jnp.float32),
        "norm2_g": 1.0 + 0.02 * jax.random.normal(ks[8], (C,), dtype=jnp.float32),
        "norm2_b": 0.02 * jax.random.normal(ks[9], (C,), dtype=jnp.float32),
        # Mlp: fc1 stored pre-transposed (C, Hd), fc2 (Hd, C)
        "w_mlp1": jax.random.normal(ks[10], (C, Hd), dtype=jnp.float32) * 0.02,
        "b_mlp1": jnp.zeros((Hd,), dtype=jnp.float32),
        "w_mlp2": jax.random.normal(ks[11], (Hd, C), dtype=jnp.float32) * 0.02,
        "b_mlp2": jnp.zeros((C,), dtype=jnp.float32),
    }

    x_out, attn = block_forward(x, params, H)
    jax.block_until_ready((x_out, attn))

    assert x_out.shape == (B, N, C)
    assert attn.shape == (B, H, N, N)
    assert bool(jnp.all(jnp.isfinite(x_out))) and bool(jnp.all(jnp.isfinite(attn)))
    print("KERNEL_OK")
</pallas_src>

<mosaic_0001>
module attributes {stable_mosaic.version = 11 : i64} {
  func.func @_block_kernel(%arg0: i32, %arg1: memref<1x64x32xf32, #tpu.memory_space<vmem>>, %arg2: memref<32x96xf32, #tpu.memory_space<vmem>>, %arg3: memref<64x64xf32, #tpu.memory_space<vmem>>, %arg4: memref<32x32xf32, #tpu.memory_space<vmem>>, %arg5: memref<32x128xf32, #tpu.memory_space<vmem>>, %arg6: memref<128x32xf32, #tpu.memory_space<vmem>>, %arg7: memref<8x128xf32, #tpu.memory_space<vmem>>, %arg8: memref<1x64x32xf32, #tpu.memory_space<vmem>>, %arg9: memref<1x64x256xf32, #tpu.memory_space<vmem>>) attributes {dimension_semantics = [#tpu.dimension_semantics<parallel>], iteration_bounds = array<i64: 2>, scalar_prefetch = 0 : i64, scratch_operands = 0 : i64, tpu.core_type = #tpu.core_type<tc>, window_params = [{transform_indices = @transform_0, window_bounds = array<i64: 1, 64, 32>}, {pipeline_mode = #tpu.pipeline_mode<synchronous>, transform_indices = @transform_1, window_bounds = array<i64: 32, 96>}, {pipeline_mode = #tpu.pipeline_mode<synchronous>, transform_indices = @transform_2, window_bounds = array<i64: 64, 64>}, {pipeline_mode = #tpu.pipeline_mode<synchronous>, transform_indices = @transform_3, window_bounds = array<i64: 32, 32>}, {pipeline_mode = #tpu.pipeline_mode<synchronous>, transform_indices = @transform_4, window_bounds = array<i64: 32, 128>}, {pipeline_mode = #tpu.pipeline_mode<synchronous>, transform_indices = @transform_5, window_bounds = array<i64: 128, 32>}, {pipeline_mode = #tpu.pipeline_mode<synchronous>, transform_indices = @transform_6, window_bounds = array<i64: 8, 128>}, {transform_indices = @transform_7, window_bounds = array<i64: 1, 64, 32>}, {transform_indices = @transform_8, window_bounds = array<i64: 1, 64, 256>}]} {
    %c0 = arith.constant 0 : index
    %c0_0 = arith.constant 0 : index
    %c0_1 = arith.constant 0 : index
    %0 = vector.load %arg1[%c0, %c0_0, %c0_1] : memref<1x64x32xf32, #tpu.memory_space<vmem>>, vector<1x64x32xf32>
    %1 = vector.shape_cast %0 : vector<1x64x32xf32> to vector<64x32xf32>
    %c0_2 = arith.constant 0 : index
    %c0_3 = arith.constant 0 : index
    %2 = vector.load %arg7[%c0_2, %c0_3] : memref<8x128xf32, #tpu.memory_space<vmem>>, vector<1x32xf32>
    %c1 = arith.constant 1 : index
    %c0_4 = arith.constant 0 : index
    %3 = vector.load %arg7[%c1, %c0_4] : memref<8x128xf32, #tpu.memory_space<vmem>>, vector<1x32xf32>
    %c2 = arith.constant 2 : index
    %c0_5 = arith.constant 0 : index
    %4 = vector.load %arg7[%c2, %c0_5] : memref<8x128xf32, #tpu.memory_space<vmem>>, vector<1x32xf32>
    %c3 = arith.constant 3 : index
    %c0_6 = arith.constant 0 : index
    %5 = vector.load %arg7[%c3, %c0_6] : memref<8x128xf32, #tpu.memory_space<vmem>>, vector<1x32xf32>
    %c4 = arith.constant 4 : index
    %c0_7 = arith.constant 0 : index
    %6 = vector.load %arg7[%c4, %c0_7] : memref<8x128xf32, #tpu.memory_space<vmem>>, vector<1x32xf32>
    %c5 = arith.constant 5 : index
    %c0_8 = arith.constant 0 : index
    %7 = vector.load %arg7[%c5, %c0_8] : memref<8x128xf32, #tpu.memory_space<vmem>>, vector<1x32xf32>
    %c6 = arith.constant 6 : index
    %c0_9 = arith.constant 0 : index
    %8 = vector.load %arg7[%c6, %c0_9] : memref<8x128xf32, #tpu.memory_space<vmem>>, vector<1x128xf32>
    %c7 = arith.constant 7 : index
    %c0_10 = arith.constant 0 : index
    %9 = vector.load %arg7[%c7, %c0_10] : memref<8x128xf32, #tpu.memory_space<vmem>>, vector<1x1xf32>
    %10 = vector.extract %9[0, 0] : f32 from vector<1x1xf32>
    %cst = arith.constant dense<0.000000e+00> : vector<64xf32>
    %11 = vector.multi_reduction <add>, %1, %cst [1] : vector<64x32xf32> to vector<64xf32>
    %12 = vector.shape_cast %11 : vector<64xf32> to vector<64x1xf32>
    %cst_11 = arith.constant 3.200000e+01 : f32
    %13 = vector.broadcast %cst_11 : f32 to vector<64x1xf32>
    %14 = arith.divf %12, %13 : vector<64x1xf32>
    %15 = vector.broadcast %14 : vector<64x1xf32> to vector<64x32xf32>
    %16 = arith.subf %1, %15 : vector<64x32xf32>
    %17 = arith.mulf %16, %16 : vector<64x32xf32>
    %cst_12 = arith.constant dense<0.000000e+00> : vector<64xf32>
    %18 = vector.multi_reduction <add>, %17, %cst_12 [1] : vector<64x32xf32> to vector<64xf32>
    %19 = vector.shape_cast %18 : vector<64xf32> to vector<64x1xf32>
    %cst_13 = arith.constant 3.200000e+01 : f32
    %20 = vector.broadcast %cst_13 : f32 to vector<64x1xf32>
    %21 = arith.divf %19, %20 : vector<64x1xf32>
    %cst_14 = arith.constant 9.99999974E-6 : f32
    %22 = vector.broadcast %cst_14 : f32 to vector<64x1xf32>
    %23 = arith.addf %21, %22 : vector<64x1xf32>
    %24 = math.rsqrt %23 : vector<64x1xf32>
    %25 = vector.broadcast %24 : vector<64x1xf32> to vector<64x32xf32>
    %26 = arith.mulf %16, %25 : vector<64x32xf32>
    %27 = vector.broadcast %2 : vector<1x32xf32> to vector<64x32xf32>
    %28 = arith.mulf %26, %27 : vector<64x32xf32>
    %29 = vector.broadcast %3 : vector<1x32xf32> to vector<64x32xf32>
    %30 = arith.addf %28, %29 : vector<64x32xf32>
    %c0_15 = arith.constant 0 : index
    %c0_16 = arith.constant 0 : index
    %31 = vector.load %arg2[%c0_15, %c0_16] : memref<32x96xf32, #tpu.memory_space<vmem>>, vector<32x96xf32>
    %cst_17 = arith.constant dense<0.000000e+00> : vector<64x96xf32>
    %32 = tpu.matmul %30, %31, %cst_17 {dimension_numbers = #tpu.dot_dimension_numbers<[1], [0], [0], [1], [0, 0, 1, 1], [], []>} : vector<64x32xf32>, vector<32x96xf32>, vector<64x96xf32> -> vector<64x96xf32>
    %c0_18 = arith.constant 0 : index
    %c0_19 = arith.constant 0 : index
    %33 = vector.load %arg3[%c0_18, %c0_19] : memref<64x64xf32, #tpu.memory_space<vmem>>, vector<64x64xf32>
    %34 = vector.extract_strided_slice %32 {offsets = [0, 0], sizes = [64, 8], strides = [1, 1]} : vector<64x96xf32> to vector<64x8xf32>
    %35 = vector.extract_strided_slice %32 {offsets = [0, 32], sizes = [64, 8], strides = [1, 1]} : vector<64x96xf32> to vector<64x8xf32>
    %36 = vector.extract_strided_slice %32 {offsets = [0, 64], sizes = [64, 8], strides = [1, 1]} : vector<64x96xf32> to vector<64x8xf32>
    %cst_20 = arith.constant dense<0.000000e+00> : vector<64x64xf32>
    %37 = tpu.matmul %34, %35, %cst_20 {dimension_numbers = #tpu.dot_dimension_numbers<[1], [1], [0], [0], [0, 0, 1, 0], [], []>} : vector<64x8xf32>, vector<64x8xf32>, vector<64x64xf32> -> vector<64x64xf32>
    %38 = vector.shape_cast %37 : vector<64x64xf32> to vector<1x64x64xf32>
    %cst_21 = arith.constant dense<0.000000e+00> : vector<1xf32>
    %39 = vector.multi_reduction <add>, %38, %cst_21 [1, 2] : vector<1x64x64xf32> to vector<1xf32>
    %40 = vector.shape_cast %39 : vector<1xf32> to vector<1x1x1xf32>
    %41 = vector.extract %40[0, 0, 0] : f32 from vector<1x1x1xf32>
    %cst_22 = arith.constant 4.096000e+03 : f32
    %42 = arith.divf %41, %cst_22 : f32
    %43 = arith.mulf %37, %33 : vector<64x64xf32>
    %44 = vector.shape_cast %43 : vector<64x64xf32> to vector<1x64x64xf32>
    %cst_23 = arith.constant dense<0.000000e+00> : vector<1xf32>
    %45 = vector.multi_reduction <add>, %44, %cst_23 [1, 2] : vector<1x64x64xf32> to vector<1xf32>
    %46 = vector.shape_cast %45 : vector<1xf32> to vector<1x1x1xf32>
    %47 = vector.extract %46[0, 0, 0] : f32 from vector<1x1x1xf32>
    %48 = arith.addf %47, %10 : f32
    %49 = arith.cmpf ogt, %42, %48 : f32
    %50 = arith.extui %49 : i1 to i32
    %51 = arith.sitofp %50 : i32 to f32
    %52 = vector.broadcast %51 : f32 to vector<64x64xf32>
    %53 = arith.mulf %37, %52 : vector<64x64xf32>
    %cst_24 = arith.constant dense<0xFF800000> : vector<64xf32>
    %54 = vector.multi_reduction <maximumf>, %53, %cst_24 [1] : vector<64x64xf32> to vector<64xf32>
    %55 = vector.shape_cast %54 : vector<64xf32> to vector<64x1xf32>
    %56 = vector.broadcast %55 : vector<64x1xf32> to vector<64x64xf32>
    %57 = arith.subf %53, %56 : vector<64x64xf32>
    %58 = math.exp %57 : vector<64x64xf32>
    %cst_25 = arith.constant dense<0.000000e+00> : vector<64xf32>
    %59 = vector.multi_reduction <add>, %58, %cst_25 [1] : vector<64x64xf32> to vector<64xf32>
    %60 = vector.shape_cast %59 : vector<64xf32> to vector<64x1xf32>
    %61 = vector.broadcast %60 : vector<64x1xf32> to vector<64x64xf32>
    %62 = arith.divf %58, %61 : vector<64x64xf32>
    %c0_26 = arith.constant 0 : index
    %c0_27 = arith.constant 0 : index
    %c0_28 = arith.constant 0 : index
    %63 = vector.load %arg9[%c0_26, %c0_27, %c0_28] : memref<1x64x256xf32, #tpu.memory_space<vmem>>, vector<1x64x64xf32>
    %64 = vector.shape_cast %63 : vector<1x64x64xf32> to vector<64x64xf32>
    %65 = vector.shape_cast %62 : vector<64x64xf32> to vector<1x64x64xf32>
    tpu.vector_store %arg9[%c0_26, %c0_27, %c0_28], %65 {strides = array<i32>} : memref<1x64x256xf32, #tpu.memory_space<vmem>>, vector<1x64x64xf32>,
    %cst_29 = arith.constant dense<0.000000e+00> : vector<64x8xf32>
    %66 = tpu.matmul %62, %36, %cst_29 {dimension_numbers = #tpu.dot_dimension_numbers<[1], [0], [0], [1], [0, 0, 1, 1], [], []>} : vector<64x64xf32>, vector<64x8xf32>, vector<64x8xf32> -> vector<64x8xf32>
    %67 = vector.extract_strided_slice %32 {offsets = [0, 8], sizes = [64, 8], strides = [1, 1]} : vector<64x96xf32> to vector<64x8xf32>
    %68 = vector.extract_strided_slice %32 {offsets = [0, 40], sizes = [64, 8], strides = [1, 1]} : vector<64x96xf32> to vector<64x8xf32>
    %69 = vector.extract_strided_slice %32 {offsets = [0, 72], sizes = [64, 8], strides = [1, 1]} : vector<64x96xf32> to vector<64x8xf32>
    %cst_30 = arith.constant dense<0.000000e+00> : vector<64x64xf32>
    %70 = tpu.matmul %67, %68, %cst_30 {dimension_numbers = #tpu.dot_dimension_numbers<[1], [1], [0], [0], [0, 0, 1, 0], [], []>} : vector<64x8xf32>, vector<64x8xf32>, vector<64x64xf32> -> vector<64x64xf32>
    %71 = vector.shape_cast %70 : vector<64x64xf32> to vector<1x64x64xf32>
    %cst_31 = arith.constant dense<0.000000e+00> : vector<1xf32>
    %72 = vector.multi_reduction <add>, %71, %cst_31 [1, 2] : vector<1x64x64xf32> to vector<1xf32>
    %73 = vector.shape_cast %72 : vector<1xf32> to vector<1x1x1xf32>
    %74 = vector.extract %73[0, 0, 0] : f32 from vector<1x1x1xf32>
    %cst_32 = arith.constant 4.096000e+03 : f32
    %75 = arith.divf %74, %cst_32 : f32
    %76 = arith.mulf %70, %33 : vector<64x64xf32>
    %77 = vector.shape_cast %76 : vector<64x64xf32> to vector<1x64x64xf32>
    %cst_33 = arith.constant dense<0.000000e+00> : vector<1xf32>
    %78 = vector.multi_reduction <add>, %77, %cst_33 [1, 2] : vector<1x64x64xf32> to vector<1xf32>
    %79 = vector.shape_cast %78 : vector<1xf32> to vector<1x1x1xf32>
    %80 = vector.extract %79[0, 0, 0] : f32 from vector<1x1x1xf32>
    %81 = arith.addf %80, %10 : f32
    %82 = arith.cmpf ogt, %75, %81 : f32
    %83 = arith.extui %82 : i1 to i32
    %84 = arith.sitofp %83 : i32 to f32
    %85 = vector.broadcast %84 : f32 to vector<64x64xf32>
    %86 = arith.mulf %70, %85 : vector<64x64xf32>
    %cst_34 = arith.constant dense<0xFF800000> : vector<64xf32>
    %87 = vector.multi_reduction <maximumf>, %86, %cst_34 [1] : vector<64x64xf32> to vector<64xf32>
    %88 = vector.shape_cast %87 : vector<64xf32> to vector<64x1xf32>
    %89 = vector.broadcast %88 : vector<64x1xf32> to vector<64x64xf32>
    %90 = arith.subf %86, %89 : vector<64x64xf32>
    %91 = math.exp %90 : vector<64x64xf32>
    %cst_35 = arith.constant dense<0.000000e+00> : vector<64xf32>
    %92 = vector.multi_reduction <add>, %91, %cst_35 [1] : vector<64x64xf32> to vector<64xf32>
    %93 = vector.shape_cast %92 : vector<64xf32> to vector<64x1xf32>
    %94 = vector.broadcast %93 : vector<64x1xf32> to vector<64x64xf32>
    %95 = arith.divf %91, %94 : vector<64x64xf32>
    %c0_36 = arith.constant 0 : index
    %c0_37 = arith.constant 0 : index
    %c64 = arith.constant 64 : index
    %96 = vector.load %arg9[%c0_36, %c0_37, %c64] : memref<1x64x256xf32, #tpu.memory_space<vmem>>, vector<1x64x64xf32>
    %97 = vector.shape_cast %96 : vector<1x64x64xf32> to vector<64x64xf32>
    %98 = vector.shape_cast %95 : vector<64x64xf32> to vector<1x64x64xf32>
    tpu.vector_store %arg9[%c0_36, %c0_37, %c64], %98 {strides = array<i32>} : memref<1x64x256xf32, #tpu.memory_space<vmem>>, vector<1x64x64xf32>,
    %cst_38 = arith.constant dense<0.000000e+00> : vector<64x8xf32>
    %99 = tpu.matmul %95, %69, %cst_38 {dimension_numbers = #tpu.dot_dimension_numbers<[1], [0], [0], [1], [0, 0, 1, 1], [], []>} : vector<64x64xf32>, vector<64x8xf32>, vector<64x8xf32> -> vector<64x8xf32>
    %100 = vector.extract_strided_slice %32 {offsets = [0, 16], sizes = [64, 8], strides = [1, 1]} : vector<64x96xf32> to vector<64x8xf32>
    %101 = vector.extract_strided_slice %32 {offsets = [0, 48], sizes = [64, 8], strides = [1, 1]} : vector<64x96xf32> to vector<64x8xf32>
    %102 = vector.extract_strided_slice %32 {offsets = [0, 80], sizes = [64, 8], strides = [1, 1]} : vector<64x96xf32> to vector<64x8xf32>
    %cst_39 = arith.constant dense<0.000000e+00> : vector<64x64xf32>
    %103 = tpu.matmul %100, %101, %cst_39 {dimension_numbers = #tpu.dot_dimension_numbers<[1], [1], [0], [0], [0, 0, 1, 0], [], []>} : vector<64x8xf32>, vector<64x8xf32>, vector<64x64xf32> -> vector<64x64xf32>
    %104 = vector.shape_cast %103 : vector<64x64xf32> to vector<1x64x64xf32>
    %cst_40 = arith.constant dense<0.000000e+00> : vector<1xf32>
    %105 = vector.multi_reduction <add>, %104, %cst_40 [1, 2] : vector<1x64x64xf32> to vector<1xf32>
    %106 = vector.shape_cast %105 : vector<1xf32> to vector<1x1x1xf32>
    %107 = vector.extract %106[0, 0, 0] : f32 from vector<1x1x1xf32>
    %cst_41 = arith.constant 4.096000e+03 : f32
    %108 = arith.divf %107, %cst_41 : f32
    %109 = arith.mulf %103, %33 : vector<64x64xf32>
    %110 = vector.shape_cast %109 : vector<64x64xf32> to vector<1x64x64xf32>
    %cst_42 = arith.constant dense<0.000000e+00> : vector<1xf32>
    %111 = vector.multi_reduction <add>, %110, %cst_42 [1, 2] : vector<1x64x64xf32> to vector<1xf32>
    %112 = vector.shape_cast %111 : vector<1xf32> to vector<1x1x1xf32>
    %113 = vector.extract %112[0, 0, 0] : f32 from vector<1x1x1xf32>
    %114 = arith.addf %113, %10 : f32
    %115 = arith.cmpf ogt, %108, %114 : f32
    %116 = arith.extui %115 : i1 to i32
    %117 = arith.sitofp %116 : i32 to f32
    %118 = vector.broadcast %117 : f32 to vector<64x64xf32>
    %119 = arith.mulf %103, %118 : vector<64x64xf32>
    %cst_43 = arith.constant dense<0xFF800000> : vector<64xf32>
    %120 = vector.multi_reduction <maximumf>, %119, %cst_43 [1] : vector<64x64xf32> to vector<64xf32>
    %121 = vector.shape_cast %120 : vector<64xf32> to vector<64x1xf32>
    %122 = vector.broadcast %121 : vector<64x1xf32> to vector<64x64xf32>
    %123 = arith.subf %119, %122 : vector<64x64xf32>
    %124 = math.exp %123 : vector<64x64xf32>
    %cst_44 = arith.constant dense<0.000000e+00> : vector<64xf32>
    %125 = vector.multi_reduction <add>, %124, %cst_44 [1] : vector<64x64xf32> to vector<64xf32>
    %126 = vector.shape_cast %125 : vector<64xf32> to vector<64x1xf32>
    %127 = vector.broadcast %126 : vector<64x1xf32> to vector<64x64xf32>
    %128 = arith.divf %124, %127 : vector<64x64xf32>
    %c0_45 = arith.constant 0 : index
    %c0_46 = arith.constant 0 : index
    %c128 = arith.constant 128 : index
    %129 = vector.load %arg9[%c0_45, %c0_46, %c128] : memref<1x64x256xf32, #tpu.memory_space<vmem>>, vector<1x64x64xf32>
    %130 = vector.shape_cast %129 : vector<1x64x64xf32> to vector<64x64xf32>
    %131 = vector.shape_cast %128 : vector<64x64xf32> to vector<1x64x64xf32>
    tpu.vector_store %arg9[%c0_45, %c0_46, %c128], %131 {strides = array<i32>} : memref<1x64x256xf32, #tpu.memory_space<vmem>>, vector<1x64x64xf32>,
    %cst_47 = arith.constant dense<0.000000e+00> : vector<64x8xf32>
    %132 = tpu.matmul %128, %102, %cst_47 {dimension_numbers = #tpu.dot_dimension_numbers<[1], [0], [0], [1], [0, 0, 1, 1], [], []>} : vector<64x64xf32>, vector<64x8xf32>, vector<64x8xf32> -> vector<64x8xf32>
    %133 = vector.extract_strided_slice %32 {offsets = [0, 24], sizes = [64, 8], strides = [1, 1]} : vector<64x96xf32> to vector<64x8xf32>
    %134 = vector.extract_strided_slice %32 {offsets = [0, 56], sizes = [64, 8], strides = [1, 1]} : vector<64x96xf32> to vector<64x8xf32>
    %135 = vector.extract_strided_slice %32 {offsets = [0, 88], sizes = [64, 8], strides = [1, 1]} : vector<64x96xf32> to vector<64x8xf32>
    %cst_48 = arith.constant dense<0.000000e+00> : vector<64x64xf32>
    %136 = tpu.matmul %133, %134, %cst_48 {dimension_numbers = #tpu.dot_dimension_numbers<[1], [1], [0], [0], [0, 0, 1, 0], [], []>} : vector<64x8xf32>, vector<64x8xf32>, vector<64x64xf32> -> vector<64x64xf32>
    %137 = vector.shape_cast %136 : vector<64x64xf32> to vector<1x64x64xf32>
    %cst_49 = arith.constant dense<0.000000e+00> : vector<1xf32>
    %138 = vector.multi_reduction <add>, %137, %cst_49 [1, 2] : vector<1x64x64xf32> to vector<1xf32>
    %139 = vector.shape_cast %138 : vector<1xf32> to vector<1x1x1xf32>
    %140 = vector.extract %139[0, 0, 0] : f32 from vector<1x1x1xf32>
    %cst_50 = arith.constant 4.096000e+03 : f32
    %141 = arith.divf %140, %cst_50 : f32
    %142 = arith.mulf %136, %33 : vector<64x64xf32>
    %143 = vector.shape_cast %142 : vector<64x64xf32> to vector<1x64x64xf32>
    %cst_51 = arith.constant dense<0.000000e+00> : vector<1xf32>
    %144 = vector.multi_reduction <add>, %143, %cst_51 [1, 2] : vector<1x64x64xf32> to vector<1xf32>
    %145 = vector.shape_cast %144 : vector<1xf32> to vector<1x1x1xf32>
    %146 = vector.extract %145[0, 0, 0] : f32 from vector<1x1x1xf32>
    %147 = arith.addf %146, %10 : f32
    %148 = arith.cmpf ogt, %141, %147 : f32
    %149 = arith.extui %148 : i1 to i32
    %150 = arith.sitofp %149 : i32 to f32
    %151 = vector.broadcast %150 : f32 to vector<64x64xf32>
    %152 = arith.mulf %136, %151 : vector<64x64xf32>
    %cst_52 = arith.constant dense<0xFF800000> : vector<64xf32>
    %153 = vector.multi_reduction <maximumf>, %152, %cst_52 [1] : vector<64x64xf32> to vector<64xf32>
    %154 = vector.shape_cast %153 : vector<64xf32> to vector<64x1xf32>
    %155 = vector.broadcast %154 : vector<64x1xf32> to vector<64x64xf32>
    %156 = arith.subf %152, %155 : vector<64x64xf32>
    %157 = math.exp %156 : vector<64x64xf32>
    %cst_53 = arith.constant dense<0.000000e+00> : vector<64xf32>
    %158 = vector.multi_reduction <add>, %157, %cst_53 [1] : vector<64x64xf32> to vector<64xf32>
    %159 = vector.shape_cast %158 : vector<64xf32> to vector<64x1xf32>
    %160 = vector.broadcast %159 : vector<64x1xf32> to vector<64x64xf32>
    %161 = arith.divf %157, %160 : vector<64x64xf32>
    %c0_54 = arith.constant 0 : index
    %c0_55 = arith.constant 0 : index
    %c192 = arith.constant 192 : index
    %162 = vector.load %arg9[%c0_54, %c0_55, %c192] : memref<1x64x256xf32, #tpu.memory_space<vmem>>, vector<1x64x64xf32>
    %163 = vector.shape_cast %162 : vector<1x64x64xf32> to vector<64x64xf32>
    %164 = vector.shape_cast %161 : vector<64x64xf32> to vector<1x64x64xf32>
    tpu.vector_store %arg9[%c0_54, %c0_55, %c192], %164 {strides = array<i32>} : memref<1x64x256xf32, #tpu.memory_space<vmem>>, vector<1x64x64xf32>,
    %cst_56 = arith.constant dense<0.000000e+00> : vector<64x8xf32>
    %165 = tpu.matmul %161, %135, %cst_56 {dimension_numbers = #tpu.dot_dimension_numbers<[1], [0], [0], [1], [0, 0, 1, 1], [], []>} : vector<64x64xf32>, vector<64x8xf32>, vector<64x8xf32> -> vector<64x8xf32>
    %166 = tpu.concatenate %66, %99, %132, %165 in 1 : vector<64x8xf32>, vector<64x8xf32>, vector<64x8xf32>, vector<64x8xf32> -> vector<64x32xf32>
    %c0_57 = arith.constant 0 : index
    %c0_58 = arith.constant 0 : index
    %167 = vector.load %arg4[%c0_57, %c0_58] : memref<32x32xf32, #tpu.memory_space<vmem>>, vector<32x32xf32>
    %cst_59 = arith.constant dense<0.000000e+00> : vector<64x32xf32>
    %168 = tpu.matmul %166, %167, %cst_59 {dimension_numbers = #tpu.dot_dimension_numbers<[1], [0], [0], [1], [0, 0, 1, 1], [], []>} : vector<64x32xf32>, vector<32x32xf32>, vector<64x32xf32> -> vector<64x32xf32>
    %169 = vector.broadcast %4 : vector<1x32xf32> to vector<64x32xf32>
    %170 = arith.addf %168, %169 : vector<64x32xf32>
    %171 = arith.addf %1, %170 : vector<64x32xf32>
    %cst_60 = arith.constant dense<0.000000e+00> : vector<64xf32>
    %172 = vector.multi_reduction <add>, %171, %cst_60 [1] : vector<64x32xf32> to vector<64xf32>
    %173 = vector.shape_cast %172 : vector<64xf32> to vector<64x1xf32>
    %cst_61 = arith.constant 3.200000e+01 : f32
    %174 = vector.broadcast %cst_61 : f32 to vector<64x1xf32>
    %175 = arith.divf %173, %174 : vector<64x1xf32>
    %176 = vector.broadcast %175 : vector<64x1xf32> to vector<64x32xf32>
    %177 = arith.subf %171, %176 : vector<64x32xf32>
    %178 = arith.mulf %177, %177 : vector<64x32xf32>
    %cst_62 = arith.constant dense<0.000000e+00> : vector<64xf32>
    %179 = vector.multi_reduction <add>, %178, %cst_62 [1] : vector<64x32xf32> to vector<64xf32>
    %180 = vector.shape_cast %179 : vector<64xf32> to vector<64x1xf32>
    %cst_63 = arith.constant 3.200000e+01 : f32
    %181 = vector.broadcast %cst_63 : f32 to vector<64x1xf32>
    %182 = arith.divf %180, %181 : vector<64x1xf32>
    %cst_64 = arith.constant 9.99999974E-6 : f32
    %183 = vector.broadcast %cst_64 : f32 to vector<64x1xf32>
    %184 = arith.addf %182, %183 : vector<64x1xf32>
    %185 = math.rsqrt %184 : vector<64x1xf32>
    %186 = vector.broadcast %185 : vector<64x1xf32> to vector<64x32xf32>
    %187 = arith.mulf %177, %186 : vector<64x32xf32>
    %188 = vector.broadcast %5 : vector<1x32xf32> to vector<64x32xf32>
    %189 = arith.mulf %187, %188 : vector<64x32xf32>
    %190 = vector.broadcast %6 : vector<1x32xf32> to vector<64x32xf32>
    %191 = arith.addf %189, %190 : vector<64x32xf32>
    %c0_65 = arith.constant 0 : index
    %c0_66 = arith.constant 0 : index
    %192 = vector.load %arg5[%c0_65, %c0_66] : memref<32x128xf32, #tpu.memory_space<vmem>>, vector<32x128xf32>
    %cst_67 = arith.constant dense<0.000000e+00> : vector<64x128xf32>
    %193 = tpu.matmul %191, %192, %cst_67 {dimension_numbers = #tpu.dot_dimension_numbers<[1], [0], [0], [1], [0, 0, 1, 1], [], []>} : vector<64x32xf32>, vector<32x128xf32>, vector<64x128xf32> -> vector<64x128xf32>
    %194 = vector.broadcast %8 : vector<1x128xf32> to vector<64x128xf32>
    %195 = arith.addf %193, %194 : vector<64x128xf32>
    %cst_68 = arith.constant 5.000000e-01 : f32
    %196 = vector.broadcast %cst_68 : f32 to vector<64x128xf32>
    %197 = arith.mulf %196, %195 : vector<64x128xf32>
    %cst_69 = arith.constant 4.471500e-02 : f32
    %198 = vector.broadcast %cst_69 : f32 to vector<64x128xf32>
    %199 = arith.mulf %198, %195 : vector<64x128xf32>
    %200 = arith.mulf %199, %195 : vector<64x128xf32>
    %201 = arith.mulf %200, %195 : vector<64x128xf32>
    %202 = arith.addf %195, %201 : vector<64x128xf32>
    %cst_70 = arith.constant 0.797884583 : f32
    %203 = vector.broadcast %cst_70 : f32 to vector<64x128xf32>
    %204 = arith.mulf %203, %202 : vector<64x128xf32>
    %205 = math.tanh %204 : vector<64x128xf32>
    %cst_71 = arith.constant 1.000000e+00 : f32
    %206 = vector.broadcast %cst_71 : f32 to vector<64x128xf32>
    %207 = arith.addf %206, %205 : vector<64x128xf32>
    %208 = arith.mulf %197, %207 : vector<64x128xf32>
    %c0_72 = arith.constant 0 : index
    %c0_73 = arith.constant 0 : index
    %209 = vector.load %arg6[%c0_72, %c0_73] : memref<128x32xf32, #tpu.memory_space<vmem>>, vector<128x32xf32>
    %cst_74 = arith.constant dense<0.000000e+00> : vector<64x32xf32>
    %210 = tpu.matmul %208, %209, %cst_74 {dimension_numbers = #tpu.dot_dimension_numbers<[1], [0], [0], [1], [0, 0, 1, 1], [], []>} : vector<64x128xf32>, vector<128x32xf32>, vector<64x32xf32> -> vector<64x32xf32>
    %211 = vector.broadcast %7 : vector<1x32xf32> to vector<64x32xf32>
    %212 = arith.addf %210, %211 : vector<64x32xf32>
    %213 = arith.addf %171, %212 : vector<64x32xf32>
    %c0_75 = arith.constant 0 : index
    %c0_76 = arith.constant 0 : index
    %c0_77 = arith.constant 0 : index
    %214 = vector.load %arg8[%c0_75, %c0_76, %c0_77] : memref<1x64x32xf32, #tpu.memory_space<vmem>>, vector<1x64x32xf32>
    %215 = vector.shape_cast %214 : vector<1x64x32xf32> to vector<64x32xf32>
    %216 = vector.shape_cast %213 : vector<64x32xf32> to vector<1x64x32xf32>
    tpu.vector_store %arg8[%c0_75, %c0_76, %c0_77], %216 {strides = array<i32>} : memref<1x64x32xf32, #tpu.memory_space<vmem>>, vector<1x64x32xf32>,
    return
  }
  func.func @transform_0(%arg0: i32) -> (i32, i32, i32) {
    %c0_i32 = arith.constant 0 : i32
    %c0_i32_0 = arith.constant 0 : i32
    %c0_i32_1 = arith.constant 0 : i32
    return %arg0, %c0_i32, %c0_i32_0 : i32, i32, i32
  }
  func.func @transform_1(%arg0: i32) -> (i32, i32) {
    %c0_i32 = arith.constant 0 : i32
    %c0_i32_0 = arith.constant 0 : i32
    %c0_i32_1 = arith.constant 0 : i32
    return %c0_i32, %c0_i32_0 : i32, i32
  }
  func.func @transform_2(%arg0: i32) -> (i32, i32) {
    %c0_i32 = arith.constant 0 : i32
    %c0_i32_0 = arith.constant 0 : i32
    %c0_i32_1 = arith.constant 0 : i32
    return %c0_i32, %c0_i32_0 : i32, i32
  }
  func.func @transform_3(%arg0: i32) -> (i32, i32) {
    %c0_i32 = arith.constant 0 : i32
    %c0_i32_0 = arith.constant 0 : i32
    %c0_i32_1 = arith.constant 0 : i32
    return %c0_i32, %c0_i32_0 : i32, i32
  }
  func.func @transform_4(%arg0: i32) -> (i32, i32) {
    %c0_i32 = arith.constant 0 : i32
    %c0_i32_0 = arith.constant 0 : i32
    %c0_i32_1 = arith.constant 0 : i32
    return %c0_i32, %c0_i32_0 : i32, i32
  }
  func.func @transform_5(%arg0: i32) -> (i32, i32) {
    %c0_i32 = arith.constant 0 : i32
    %c0_i32_0 = arith.constant 0 : i32
    %c0_i32_1 = arith.constant 0 : i32
    return %c0_i32, %c0_i32_0 : i32, i32
  }
  func.func @transform_6(%arg0: i32) -> (i32, i32) {
    %c0_i32 = arith.constant 0 : i32
    %c0_i32_0 = arith.constant 0 : i32
    %c0_i32_1 = arith.constant 0 : i32
    return %c0_i32, %c0_i32_0 : i32, i32
  }
  func.func @transform_7(%arg0: i32) -> (i32, i32, i32) {
    %c0_i32 = arith.constant 0 : i32
    %c0_i32_0 = arith.constant 0 : i32
    %c0_i32_1 = arith.constant 0 : i32
    return %arg0, %c0_i32, %c0_i32_0 : i32, i32, i32
  }
  func.func @transform_8(%arg0: i32) -> (i32, i32, i32) {
    %c0_i32 = arith.constant 0 : i32
    %c0_i32_0 = arith.constant 0 : i32
    %c0_i32_1 = arith.constant 0 : i32
    return %arg0, %c0_i32, %c0_i32_0 : i32, i32, i32
  }
}

</mosaic_0001>

<bundles_post_ra>
// kernel: block_forward.1
= control target key start
LH: loop header
LB: loop body
LE: loop exit
PB: predicated region body
PF: predicated region fallthrough
CT: control target
= control target key end

     0   :  { %s3780_s27 = smov 0   ;;  %s5560_s0 = inlined_call_operand.vmem [shape: f32[2,64,32], index: 0, kind: input, shape index: {}]   ;;  %s5561_s1 = inlined_call_operand.vmem [shape: f32[32,96], index: 1, kind: input, shape index: {}]   ;;  %s5562_s2 = inlined_call_operand.vmem [shape: f32[64,64], index: 2, kind: input, shape index: {}]   ;;  %s5563_s3 = inlined_call_operand.vmem [shape: f32[32,32], index: 3, kind: input, shape index: {}]   ;;  %s5564_s4 = inlined_call_operand.vmem [shape: f32[32,128], index: 4, kind: input, shape index: {}]   ;;  %s5565_s5 = inlined_call_operand.vmem [shape: f32[128,32], index: 5, kind: input, shape index: {}]   ;;  %s5566_s6 = inlined_call_operand.vmem [shape: f32[8,128], index: 6, kind: input, shape index: {}]   ;;  %s5567_s7 = inlined_call_operand.vmem [shape: f32[2,64,32], index: 7, kind: output, shape index: {0}]   ;;  %s5568_s8 = inlined_call_operand.vmem [shape: f32[2,64,256], index: 8, kind: output, shape index: {1}]  }
   0x1 LB: > { %s3244_s28 = sadd.s32 4294967295, %s3717_s27   ;;  %p3248_p0 = scmp.ge.s32.totalorder %s3717_s27, 1  ;;  %s3717_s27 = sphi %s3780_s27, %s19_s27  }
   0x2   : > { %p265_p1 = scmp.lt.s32.totalorder %s3717_s27, 3 }
   0x4   : > { %p266_p2 = pnand %p3248_p0, %p265_p1 }
   0x6   : > { %269 = sbr.rel (%p266_p2) target bundleno = 3357 (0xd1d), region = 48 }
   0xb   : > { %p304_p3 = scmp.lt.s32.totalorder %s3244_s28, 1  ;;  %vm336_vm0 = vcmask 261120   ;;  %v3719_v14 = vmov 32.0   ;;  %v541_v58 = vld [vmem:[%s5561_s1 + $0x18] sm:$0xff]  ;;  %v540_v59 = vld [vmem:[%s5561_s1 + $0x10] sm:$0xff]  ;;  %v539_v60 = vld [vmem:[%s5561_s1 + $0x8] sm:$0xff] }
   0xc   : > { %3515 = vrcp.f32 %v3719_v14  ;;  %578 = vmatpush.msra.mxu0 %v541_v58  ;;  %v538_v61 = vld [vmem:[%s5561_s1] sm:$0xff]  ;;  %s3720_s23 = smov 96   ;;  %s3721_s24 = smov 88  }
   0xd   : > { %s5586_s28 = smov (!%p304_p3, %s3244_s28), 1  ;;  %s3722_s25 = smov 64  }
   0xe   : > { %s3377_s29 = sshll.u32 %s5586_s28, 6  ;;  %579 = vmatpush.msra.mxu0 %v540_v59  ;;  %s3723_s26 = smov 120  }
   0xf   : > { %s3796_s10 = scalar_lea.vmem %s5560_s0, %s3377_s29  ;;  %s3724_s30 = smov 80  }
  0x10   : > { %v323_v0 = vld [vmem:[%s3796_s10 + $0x20] sm:$0xff]  ;;  %v321_v1 = vld [vmem:[%s3796_s10 + $0x10] sm:$0xff]  ;;  %v324_v6 = vld [vmem:[%s3796_s10 + $0x28] sm:$0xff]  ;;  %580 = vmatpush.msra.mxu0 %v539_v60  ;;  %s3725_s11 = smov 72   ;;  %s3727_s21 = smov 112  }
  0x11   : > { %v319_v2 = vld [vmem:[%s3796_s10] sm:$0xff]  ;;  %v349_v3 = vsel %vm336_vm0, %v323_v0, 0.0  ;;  %v343_v4 = vsel %vm336_vm0, %v321_v1, 0.0  ;;  %v322_v7 = vld [vmem:[%s3796_s10 + $0x18] sm:$0xff]  ;;  %v320_v8 = vld [vmem:[%s3796_s10 + $0x8] sm:$0xff]  ;;  %v352_v9 = vsel %vm336_vm0, %v324_v6, 0.0 }
  0x12   : > { %v337_v5 = vsel %vm336_vm0, %v319_v2, 0.0  ;;  %350 = vadd.xlane.f32.xlu2 %v349_v3  ;;  %344 = vadd.xlane.f32.xlu1 %v343_v4  ;;  %v346_v10 = vsel %vm336_vm0, %v322_v7, 0.0  ;;  %v340_v11 = vsel %vm336_vm0, %v320_v8, 0.0  ;;  %v325_v12 = vld [vmem:[%s3796_s10 + $0x30] sm:$0xff]  ;;  %v3516_v15 = vpop.eup %3515  ;;  %v326_v40 = vld [vmem:[%s3796_s10 + $0x38] sm:$0xff]  ;;  %s3728_s22 = smov 104  }
  0x13   : > { %338 = vadd.xlane.f32.xlu0 %v337_v5  ;;  %v355_v13 = vsel %vm336_vm0, %v325_v12, 0.0  ;;  %v362_v16 = vmul.f32 32.0, %v3516_v15  ;;  %vm366_vm1 = vweird.f32 %v3516_v15  ;;  %v358_v45 = vsel %vm336_vm0, %v326_v40, 0.0  ;;  %581 = vmatpush.msra.mxu0 %v538_v61 }
  0x15   : > { %v363_v17 = vsub.f32 1.0, %v362_v16 }
  0x17   : > { %v364_v18 = vmul.f32 %v3516_v15, %v363_v17 }
  0x19   : > { %v365_v19 = vadd.f32 %v3516_v15, %v364_v18 }
  0x1a   : > { %353 = vadd.xlane.f32.xlu2 %v352_v9  ;;  %347 = vadd.xlane.f32.xlu1 %v346_v10 }
  0x1b   : > { %341 = vadd.xlane.f32.xlu0 %v340_v11  ;;  %v3812_v20 = vsel %vm366_vm1, %v3516_v15, %v365_v19 }
  0x1c   : > { %5571 = vst [vmem:[#allocation2_spill] sm:$0xff] %v3812_v20 }
  0x22   : > { %356 = vadd.xlane.f32.xlu1 %v355_v13 }
  0x85   : > { %v351_v21 = vpop.xlane.xlu2 %350  ;;  %v345_v22 = vpop.xlane.xlu1 %344 }
  0x86   : > { %v370_v23 = vmul.f32 %v3812_v20, %v345_v22  ;;  %v339_v24 = vpop.xlane.xlu0 %338  ;;  %v372_v36 = vmul.f32 %v3812_v20, %v351_v21 }
  0x87   : > { %v368_v25 = vmul.f32 %v3812_v20, %v339_v24 }
  0x88   : > { %v3816_v26 = vsub.f32 %v321_v1, %v370_v23  ;;  %v3837_v43 = vsub.f32 %v323_v0, %v372_v36 }
  0x89   : > { %v3818_v27 = vsub.f32 %v319_v2, %v368_v25 }
  0x8a   : > { %v386_v28 = vmul.f32 %v3816_v26, %v3816_v26  ;;  %v388_v51 = vmul.f32 %v3837_v43, %v3837_v43 }
  0x8b   : > { %v384_v29 = vmul.f32 %v3818_v27, %v3818_v27 }
  0x8c   : > { %v398_v30 = vsel %vm336_vm0, %v386_v28, 0.0  ;;  %v404_v54 = vsel %vm336_vm0, %v388_v51, 0.0 }
  0x8d   : > { %v354_v31 = vpop.xlane.xlu2 %353  ;;  %399 = vadd.xlane.f32.xlu1 %v398_v30  ;;  %v392_v32 = vsel %vm336_vm0, %v384_v29, 0.0  ;;  %v348_v33 = vpop.xlane.xlu1 %347 }
  0x8e   : > { %v373_v34 = vmul.f32 %v3812_v20, %v354_v31  ;;  %393 = vadd.xlane.f32.xlu0 %v392_v32  ;;  %v342_v35 = vpop.xlane.xlu0 %341  ;;  %v371_v38 = vmul.f32 %v3812_v20, %v348_v33 }
  0x8f   : > { %v369_v37 = vmul.f32 %v3812_v20, %v342_v35  ;;  %v3895_v35 = vld [vmem:[%s5566_s6] ss:$0 sm:$0xff] }
  0x90   : > { %v3830_v39 = vsub.f32 %v324_v6, %v373_v34  ;;  %v3839_v44 = vsub.f32 %v322_v7, %v371_v38 }
  0x91   : > { %v3833_v41 = vsub.f32 %v320_v8, %v369_v37 }
  0x92   : > { %v389_v42 = vmul.f32 %v3830_v39, %v3830_v39  ;;  %v387_v52 = vmul.f32 %v3839_v44, %v3839_v44 }
  0x93   : > { %v385_v46 = vmul.f32 %v3833_v41, %v3833_v41 }
  0x94   : > { %v407_v47 = vsel %vm336_vm0, %v389_v42, 0.0  ;;  %v401_v55 = vsel %vm336_vm0, %v387_v52, 0.0  ;;  %v3904_v42 = vld [vmem:[%s5566_s6 + $0x1] ss:$0 sm:$0xff] }
  0x95   : > { %408 = vadd.xlane.f32.xlu1 %v407_v47  ;;  %v395_v48 = vsel %vm336_vm0, %v385_v46, 0.0  ;;  %v357_v49 = vpop.xlane.xlu1 %356 }
  0x96   : > { %359 = vadd.xlane.f32.xlu0 %v358_v45  ;;  %396 = vadd.xlane.f32.xlu2 %v395_v48  ;;  %v374_v50 = vmul.f32 %v3812_v20, %v357_v49 }
  0x98   : > { %v3851_v53 = vsub.f32 %v325_v12, %v374_v50 }
  0x9a   : > { %v390_v56 = vmul.f32 %v3851_v53, %v3851_v53 }
  0x9c   : > { %v410_v57 = vsel %vm336_vm0, %v390_v56, 0.0 }
  0x9e   : > { %405 = vadd.xlane.f32.xlu0 %v404_v54  ;;  %402 = vadd.xlane.f32.xlu2 %v401_v55 }
  0xa6   : > { %411 = vadd.xlane.f32.xlu2 %v410_v57 }
 0x100   : > { %v400_v62 = vpop.xlane.xlu1 %399 }
 0x101   : > { %v418_v63 = vmul.f32 %v400_v62, %v3812_v20  ;;  %v394_v0 = vpop.xlane.xlu0 %393 }
 0x102   : > { %v416_v1 = vmul.f32 %v394_v0, %v3812_v20 }
 0x103   : > { %v3872_v2 = vadd.f32 1e-05, %v418_v63 }
 0x104   : > { %v424_v3 = vadd.f32 1e-05, %v416_v1 }
 0x105   : > { %3517 = vrsqrt.f32 %v3872_v2  ;;  %vm458_vm7 = vweird.f32 %v3872_v2 }
 0x106   : > { %3519 = vrsqrt.f32 %v424_v3  ;;  %vm438_vm3 = vweird.f32 %v424_v3 }
 0x108   : > { %v409_v16 = vpop.xlane.xlu1 %408 }
 0x109   : > { %v397_v4 = vpop.xlane.xlu2 %396  ;;  %v360_v5 = vpop.xlane.xlu0 %359  ;;  %v421_v29 = vmul.f32 %v409_v16, %v3812_v20 }
 0x10a   : > { %v417_v6 = vmul.f32 %v397_v4, %v3812_v20  ;;  %v375_v7 = vmul.f32 %v3812_v20, %v360_v5 }
 0x10b   : > { %v3877_v8 = vpop.eup %3517  ;;  %v3898_v38 = vadd.f32 1e-05, %v421_v29 }
 0x10c   : > { %v3520_v9 = vpop.eup %3519  ;;  %v425_v10 = vadd.f32 1e-05, %v417_v6  ;;  %v3879_v11 = vsub.f32 %v326_v40, %v375_v7  ;;  %v453_v12 = vmul.f32 %v3877_v8, %v3872_v2  ;;  %vm459_vm8 = vweird.f32 %v3877_v8 }
 0x10d   : > { %v433_v13 = vmul.f32 %v3520_v9, %v424_v3  ;;  %vm439_vm2 = vweird.f32 %v3520_v9  ;;  %vm3913_vm10 = vmor %vm458_vm7, %vm459_vm8 }
 0x10e   : > { %3521 = vrsqrt.f32 %v425_v10  ;;  %v391_v14 = vmul.f32 %v3879_v11, %v3879_v11  ;;  %v454_v18 = vmul.f32 %v3877_v8, %v453_v12  ;;  %vm440_vm4 = vmor %vm438_vm3, %vm439_vm2  ;;  %vm448_vm5 = vweird.f32 %v425_v10 }
 0x10f   : > { %v434_v15 = vmul.f32 %v3520_v9, %v433_v13  ;;  %vm488_vm2 = vweird.f32 %v3898_v38 }
 0x110   : > { %v413_v17 = vsel %vm336_vm0, %v391_v14, 0.0  ;;  %v455_v31 = vmul.f32 0.5, %v454_v18 }
 0x111   : > { %v435_v19 = vmul.f32 0.5, %v434_v15  ;;  %v403_v21 = vpop.xlane.xlu2 %402  ;;  %414 = vadd.xlane.f32.xlu0 %v413_v17  ;;  %v406_v22 = vpop.xlane.xlu0 %405 }
 0x112   : > { %v419_v23 = vmul.f32 %v403_v21, %v3812_v20  ;;  %v420_v24 = vmul.f32 %v406_v22, %v3812_v20  ;;  %v456_v45 = vsub.f32 1.5, %v455_v31 }
 0x113   : > { %v436_v25 = vsub.f32 1.5, %v435_v19 }
 0x114   : > { %v3522_v28 = vpop.eup %3521  ;;  %v427_v30 = vadd.f32 1e-05, %v419_v23  ;;  %v3890_v34 = vadd.f32 1e-05, %v420_v24  ;;  %v457_v54 = vmul.f32 %v3877_v8, %v456_v45 }
 0x115   : > { %v437_v32 = vmul.f32 %v3520_v9, %v436_v25  ;;  %v443_v33 = vmul.f32 %v3522_v28, %v425_v10  ;;  %vm449_vm6 = vweird.f32 %v3522_v28 }
 0x116   : > { %3523 = vrsqrt.f32 %v427_v30  ;;  %vm450_vm9 = vmor %vm448_vm5, %vm449_vm6  ;;  %v461_v1 = vsel %vm3913_vm10, %v3877_v8, %v457_v54  ;;  %vm468_vm11 = vweird.f32 %v427_v30  ;;  %vm478_vm14 = vweird.f32 %v3890_v34 }
 0x117   : > { %v444_v36 = vmul.f32 %v3522_v28, %v443_v33  ;;  %3525 = vrsqrt.f32 %v3890_v34  ;;  %v441_v37 = vsel %vm440_vm4, %v3520_v9, %v437_v32  ;;  %v514_v6 = vmul.f32 %v461_v1, %v3816_v26 }
 0x118   : > { %v512_v40 = vmul.f32 %v441_v37, %v3818_v27  ;;  %3527 = vrsqrt.f32 %v3898_v38 }
 0x119   : > { %v445_v46 = vmul.f32 0.5, %v444_v36  ;;  %v412_v47 = vpop.xlane.xlu2 %411  ;;  %v523_v8 = vmul.f32 %v3895_v35, %v514_v6 }
 0x11a   : > { %v521_v48 = vmul.f32 %v3895_v35, %v512_v40  ;;  %v422_v27 = vmul.f32 %v412_v47, %v3812_v20 }
 0x11b   : > { %v446_v49 = vsub.f32 1.5, %v445_v46  ;;  %v532_v15 = vadd.f32 %v3904_v42, %v523_v8 }
 0x11c   : > { %v3524_v50 = vpop.eup %3523  ;;  %v530_v51 = vadd.f32 %v3904_v42, %v521_v48  ;;  %v430_v61 = vadd.f32 1e-05, %v422_v27 }
 0x11d   : > { %v3526_v52 = vpop.eup %3525  ;;  %v447_v55 = vmul.f32 %v3522_v28, %v446_v49  ;;  %v463_v56 = vmul.f32 %v3524_v50, %v427_v30  ;;  %vm469_vm12 = vweird.f32 %v3524_v50 }
 0x11e   : > { %v473_v58 = vmul.f32 %v3526_v52, %v3890_v34  ;;  %3255 = vmatmul.msk.f32.vlgmr.msra.gmra.mxu0 %vm336_vm0, %v530_v51  ;;  %v3528_v2 = vpop.eup %3527  ;;  %3529 = vrsqrt.f32 %v430_v61  ;;  %vm470_vm13 = vmor %vm468_vm11, %vm469_vm12  ;;  %vm479_vm15 = vweird.f32 %v3526_v52  ;;  %vm498_vm5 = vweird.f32 %v430_v61 }
 0x11f   : > { %v464_v59 = vmul.f32 %v3524_v50, %v463_v56  ;;  %v451_v60 = vsel %vm450_vm9, %v3522_v28, %v447_v55  ;;  %v483_v7 = vmul.f32 %v3528_v2, %v3898_v38  ;;  %vm480_vm1 = vmor %vm478_vm14, %vm479_vm15  ;;  %vm489_vm3 = vweird.f32 %v3528_v2 }
 0x120   : > { %v513_v62 = vmul.f32 %v451_v60, %v3833_v41  ;;  %v474_v0 = vmul.f32 %v3526_v52, %v473_v58  ;;  %vm490_vm4 = vmor %vm488_vm2, %vm489_vm3  ;;  %vm639_vm11 = vcmask 64512   ;;  %vm713_vm12 = vcmask 523264  }
 0x121   : > { %v465_v63 = vmul.f32 0.5, %v464_v59  ;;  %v484_v10 = vmul.f32 %v3528_v2, %v483_v7 }
 0x122   : > { %v522_v3 = vmul.f32 %v3895_v35, %v513_v62  ;;  %v475_v9 = vmul.f32 0.5, %v474_v0 }
 0x123   : > { %v466_v4 = vsub.f32 1.5, %v465_v63  ;;  %v485_v16 = vmul.f32 0.5, %v484_v10 }
 0x124   : > { %v531_v5 = vadd.f32 %v3904_v42, %v522_v3  ;;  %v476_v12 = vsub.f32 1.5, %v475_v9  ;;  %v3530_v14 = vpop.eup %3529 }
 0x125   : > { %v467_v41 = vmul.f32 %v3524_v50, %v466_v4  ;;  %v493_v18 = vmul.f32 %v3530_v14, %v430_v61  ;;  %v486_v21 = vsub.f32 1.5, %v485_v16  ;;  %vm499_vm6 = vweird.f32 %v3530_v14 }
 0x126   : > { %3256 = vmatmul.msk.f32.gmra.mxu0 %vm336_vm0, %v531_v5  ;;  %v477_v17 = vmul.f32 %v3526_v52, %v476_v12  ;;  %vm500_vm7 = vmor %vm498_vm5, %vm499_vm6 }
 0x127   : > { %v471_v13 = vsel %vm470_vm13, %v3524_v50, %v467_v41  ;;  %v494_v22 = vmul.f32 %v3530_v14, %v493_v18  ;;  %v487_v28 = vmul.f32 %v3528_v2, %v486_v21 }
 0x128   : > { %v515_v26 = vmul.f32 %v471_v13, %v3839_v44  ;;  %v481_v23 = vsel %vm480_vm1, %v3526_v52, %v477_v17 }
 0x129   : > { %v516_v25 = vmul.f32 %v481_v23, %v3837_v43  ;;  %v495_v44 = vmul.f32 0.5, %v494_v22  ;;  %v491_v31 = vsel %vm490_vm4, %v3528_v2, %v487_v28 }
 0x12a   : > { %v524_v19 = vmul.f32 %v3895_v35, %v515_v26  ;;  %v517_v33 = vmul.f32 %v491_v31, %v3830_v39 }
 0x12b   : > { %v525_v29 = vmul.f32 %v3895_v35, %v516_v25  ;;  %v496_v30 = vsub.f32 1.5, %v495_v44 }
 0x12c   : > { %v533_v24 = vadd.f32 %v3904_v42, %v524_v19  ;;  %v526_v43 = vmul.f32 %v3895_v35, %v517_v33 }
 0x12d   : > { %v534_v32 = vadd.f32 %v3904_v42, %v525_v29  ;;  %v497_v34 = vmul.f32 %v3530_v14, %v496_v30 }
 0x12e   : > { %3257 = vmatmul.msk.f32.gmra.mxu0 %vm336_vm0, %v532_v15  ;;  %v535_v37 = vadd.f32 %v3904_v42, %v526_v43 }
 0x12f   : > { %v501_v36 = vsel %vm500_vm7, %v3530_v14, %v497_v34 }
 0x130   : > { %v518_v38 = vmul.f32 %v501_v36, %v3851_v53 }
 0x132   : > { %v527_v40 = vmul.f32 %v3895_v35, %v518_v38 }
 0x134   : > { %v536_v45 = vadd.f32 %v3904_v42, %v527_v40  ;;  %v4067_v40 = vld [vmem:[%s5562_s2 + $0x8] sm:$0xff] }
 0x136   : > { %3258 = vmatmul.msk.f32.gmra.mxu0 %vm336_vm0, %v533_v24 }
 0x13e   : > { %3259 = vmatmul.msk.f32.gmra.mxu0 %vm336_vm0, %v534_v32 }
 0x146   : > { %3260 = vmatmul.msk.f32.gmra.mxu0 %vm336_vm0, %v535_v37 }
 0x14e   : > { %3261 = vmatmul.msk.f32.gmra.mxu0 %vm336_vm0, %v536_v45  ;;  %v4072_v45 = vld [vmem:[%s5562_s2] sm:$0xff] }
 0x184   : > { %v415_v39 = vpop.xlane.xlu0 %414 }
 0x185   : > { %v423_v46 = vmul.f32 %v415_v39, %v3812_v20  ;;  %v4077_v39 = vld [vmem:[%s5562_s2 + $0x10] sm:$0xff] }
 0x187   : > { %v431_v47 = vadd.f32 1e-05, %v423_v46 }
 0x189   : > { %3531 = vrsqrt.f32 %v431_v47  ;;  %vm508_vm9 = vweird.f32 %v431_v47 }
 0x18f   : > { %v3532_v48 = vpop.eup %3531 }
 0x190   : > { %v503_v49 = vmul.f32 %v3532_v48, %v431_v47  ;;  %vm509_vm8 = vweird.f32 %v3532_v48 }
 0x191   : > { %vm510_vm10 = vmor %vm508_vm9, %vm509_vm8 }
 0x192   : > { %v504_v50 = vmul.f32 %v3532_v48, %v503_v49 }
 0x194   : > { %v505_v27 = vmul.f32 0.5, %v504_v50 }
 0x196   : > { %v506_v51 = vsub.f32 1.5, %v505_v27 }
 0x198   : > { %v507_v53 = vmul.f32 %v3532_v48, %v506_v51  ;;  %v4097_v51 = vld [vmem:[%s5562_s2 + $0x20] sm:$0xff] }
 0x19a   : > { %v511_v52 = vsel %vm510_vm10, %v3532_v48, %v507_v53  ;;  %v4086_v48 = vld [vmem:[%s5562_s2 + $0x18] sm:$0xff] }
 0x19b   : > { %v3950_v54 = vpop.f32.mrf.mxu0  ;;  %v519_v55 = vmul.f32 %v511_v52, %v3879_v11 }
 0x19d   : > { %v528_v56 = vmul.f32 %v3895_v35, %v519_v55 }
 0x19f   : > { %v537_v57 = vadd.f32 %v3904_v42, %v528_v56 }
 0x1a1   : > { %3262 = vmatmul.msk.f32.gmra.mxu0 %vm336_vm0, %v537_v57 }
 0x1a3   : > { %v3956_v58 = vpop.f32.mrf.mxu0 }
 0x1a4   : > { %v4009_v2 = vpack.i.bf16 %v3950_v54, %v3956_v58 }
 0x1ab   : > { %v3958_v59 = vpop.f32.mrf.mxu0 }
 0x1b3   : > { %v3960_v60 = vpop.f32.mrf.mxu0 }
 0x1b4   : > { %v3982_v42 = vpack.i.bf16 %v3958_v59, %v3960_v60 }
 0x1bb   : > { %v3962_v61 = vpop.f32.mrf.mxu0 }
 0x1c3   : > { %v3964_v62 = vpop.f32.mrf.mxu0 }
 0x1c4   : > { %633 = vrot.lane.b32.xlu0 %v3964_v62, %s3720_s23  ;;  %v3975_v35 = vpack.i.bf16 %v3962_v61, %v3964_v62 }
 0x1cb   : > { %v3967_v11 = vpop.f32.mrf.mxu0 }
 0x1cc   : > { %627 = vrot.lane.b32.xlu0 %v3958_v59, %s3720_s23  ;;  %635 = vrot.lane.b32.xlu2 %v3967_v11, %s3720_s23 }
 0x1d4   : > { %1109 = vrot.lane.b32.xlu0 %v3967_v11, %s3721_s24  ;;  %631 = vrot.lane.b32.xlu2 %v3962_v61, %s3720_s23 }
 0x1dc   : > { %3429 = vrot.lane.b32.xlu0 %v3975_v35, %s3722_s25  ;;  %625 = vrot.lane.b32.xlu2 %v3956_v58, %s3720_s23 }
 0x1e4   : > { %3434 = vrot.lane.b32.xlu0 %v3982_v42, %s3722_s25  ;;  %1107 = vrot.lane.b32.xlu2 %v3964_v62, %s3721_s24 }
 0x1ec   : > { %1099 = vrot.lane.b32.xlu0 %v3956_v58, %s3721_s24  ;;  %1103 = vrot.lane.b32.xlu2 %v3960_v60, %s3721_s24 }
 0x1f4   : > { %1097 = vrot.lane.b32.xlu0 %v3950_v54, %s3721_s24  ;;  %1081 = vrot.lane.b32.xlu2 %v3950_v54, %s3723_s26 }
 0x21e   : > { %v3992_v63 = vpop.f32.mrf.mxu0 }
 0x21f   : > { %637 = vrot.lane.b32.xlu1 %v3992_v63, %s3720_s23  ;;  %v3997_v0 = vpack.i.bf16 %v3967_v11, %v3992_v63 }
 0x221   : > { %3444 = vrot.lane.b32.xlu2 %v3997_v0, %s3722_s25 }
 0x226   : > { %v636_v1 = vpop.permute.xlu2 %635 }
 0x227   : > { %629 = vrot.lane.b32.xlu1 %v3960_v60, %s3720_s23 }
 0x229   : > { %1085 = vrot.lane.b32.xlu2 %v3958_v59, %s3723_s26 }
 0x22e   : > { %v632_v3 = vpop.permute.xlu2 %631 }
 0x22f   : > { %623 = vrot.lane.b32.xlu1 %v3950_v54, %s3720_s23 }
 0x236   : > { %v626_v4 = vpop.permute.xlu2 %625  ;;  %v634_v5 = vpop.permute.xlu0 %633 }
 0x237   : > { %1105 = vrot.lane.b32.xlu1 %v3962_v61, %s3721_s24 }
 0x23e   : > { %v1108_v6 = vpop.permute.xlu2 %1107  ;;  %v628_v7 = vpop.permute.xlu0 %627 }
 0x23f   : > { %1101 = vrot.lane.b32.xlu1 %v3958_v59, %s3721_s24 }
 0x246   : > { %v1104_v41 = vpop.permute.xlu2 %1103  ;;  %v1110_v9 = vpop.permute.xlu0 %1109 }
 0x247   : > { %3439 = vrot.lane.b32.xlu1 %v4009_v2, %s3722_s25 }
 0x24e   : > { %v1082_v8 = vpop.permute.xlu2 %1081  ;;  %v3430_v10 = vpop.permute.xlu0 %3429 }
 0x24f   : > { %1111 = vrot.lane.b32.xlu1 %v3992_v63, %s3721_s24  ;;  %v3431_v15 = vunpack.i.l.bf16 %v3430_v10  ;;  %v3432_v16 = vunpack.i.h.bf16 %v3430_v10 }
 0x256   : > { %v3435_v26 = vpop.permute.xlu0 %3434 }
 0x257   : > { %1087 = vrot.lane.b32.xlu1 %v3960_v60, %s3723_s26  ;;  %v3436_v17 = vunpack.i.l.bf16 %v3435_v26  ;;  %v3437_v18 = vunpack.i.h.bf16 %v3435_v26 }
 0x25e   : > { %v1100_v32 = vpop.permute.xlu0 %1099 }
 0x25f   : > { %1608 = vrot.lane.b32.xlu1 %v3992_v63, %s3724_s30 }
 0x266   : > { %v1098_v33 = vpop.permute.xlu0 %1097 }
 0x27b   : > { %v3445_v12 = vpop.permute.xlu2 %3444 }
 0x27c   : > { %v3446_v13 = vunpack.i.l.bf16 %v3445_v12  ;;  %v3447_v14 = vunpack.i.h.bf16 %v3445_v12 }
 0x27e   : > { %1048 = vmatpush.msra.mxu2 %v3446_v13 }
 0x280   : > { %1049 = vmatpush.msra.mxu2 %v3447_v14 }
 0x282   : > { %1050 = vmatpush.msra.mxu2 %v3431_v15 }
 0x284   : > { %1051 = vmatpush.msra.mxu2 %v3432_v16 }
 0x286   : > { %1052 = vmatpush.msra.mxu2 %v3436_v17 }
 0x288   : > { %1053 = vmatpush.msra.mxu2 %v3437_v18 }
 0x291   : > { %v638_v19 = vpop.permute.xlu1 %637 }
 0x292   : > { %3263 = vmatpush.xpose.msk.msra.mxu1 %vm639_vm11, %v638_v19 }
 0x296   : > { %3264 = vmatpush.xpose.msk.msra.mxu1 %vm639_vm11, %v636_v1  ;;  %v4109_v1 = vld [vmem:[%s5562_s2 + $0x28] sm:$0xff] }
 0x299   : > { %v630_v21 = vpop.permute.xlu1 %629 }
 0x29a   : > { %3265 = vmatpush.xpose.msk.msra.mxu1 %vm639_vm11, %v634_v5 }
 0x29e   : > { %3266 = vmatpush.xpose.msk.msra.mxu1 %vm639_vm11, %v632_v3 }
 0x2a1   : > { %v624_v22 = vpop.permute.xlu1 %623 }
 0x2a2   : > { %3267 = vmatpush.xpose.msk.msra.mxu1 %vm639_vm11, %v630_v21 }
 0x2a6   : > { %3268 = vmatpush.xpose.msk.msra.mxu1 %vm639_vm11, %v628_v7 }
 0x2a9   : > { %v1106_v23 = vpop.permute.xlu1 %1105 }
 0x2aa   : > { %3269 = vmatpush.xpose.msk.msra.mxu1 %vm639_vm11, %v626_v4 }
 0x2ae   : > { %3270 = vmatpush.xpose.msk.msra.mxu1 %vm639_vm11, %v624_v22 }
 0x2b1   : > { %v1102_v24 = vpop.permute.xlu1 %1101  ;;  %3271 = vmatmul.msk.f32.vlgmr.msra.gmra.mxu1 %vm639_vm11, %v3950_v54 }
 0x2b9   : > { %v3440_v25 = vpop.permute.xlu1 %3439  ;;  %3272 = vmatmul.msk.f32.gmra.mxu1 %vm639_vm11, %v3956_v58 }
 0x2ba   : > { %v3441_v28 = vunpack.i.l.bf16 %v3440_v25  ;;  %v3442_v44 = vunpack.i.h.bf16 %v3440_v25  ;;  %v4140_v25 = vld [vmem:[%s5562_s2 + $0x38] sm:$0xff] }
 0x2bc   : > { %1054 = vmatpush.msra.mxu2 %v3441_v28 }
 0x2be   : > { %1055 = vmatpush.msra.mxu2 %v3442_v44 }
 0x2c1   : > { %v1112_v29 = vpop.permute.xlu1 %1111  ;;  %3273 = vmatmul.msk.f32.gmra.mxu1 %vm639_vm11, %v3958_v59 }
 0x2c2   : > { %3287 = vmatpush.xpose.msk.msra.mxu3 %vm639_vm11, %v1112_v29 }
 0x2c6   : > { %3288 = vmatpush.xpose.msk.msra.mxu3 %vm639_vm11, %v1110_v9  ;;  %v4120_v9 = vld [vmem:[%s5562_s2 + $0x30] sm:$0xff] }
 0x2c9   : > { %v4034_v30 = vpop.permute.xlu1 %1087  ;;  %3274 = vmatmul.msk.f32.gmra.mxu1 %vm639_vm11, %v3960_v60 }
 0x2ca   : > { %3289 = vmatpush.xpose.msk.msra.mxu3 %vm639_vm11, %v1108_v6 }
 0x2ce   : > { %3290 = vmatpush.xpose.msk.msra.mxu3 %vm639_vm11, %v1106_v23 }
 0x2d1   : > { %v1609_v31 = vpop.permute.xlu1 %1608  ;;  %3275 = vmatmul.msk.f32.gmra.mxu1 %vm639_vm11, %v3962_v61 }
 0x2d2   : > { %3291 = vmatpush.xpose.msk.msra.mxu3 %vm639_vm11, %v1104_v41  ;;  %3311 = vmatpush.xpose.msk.msrb.mxu2 %vm639_vm11, %v1609_v31 }
 0x2d6   : > { %3292 = vmatpush.xpose.msk.msra.mxu3 %vm639_vm11, %v1102_v24 }
 0x2d9   : > { %3276 = vmatmul.msk.f32.gmra.mxu1 %vm639_vm11, %v3964_v62 }
 0x2da   : > { %3293 = vmatpush.xpose.msk.msra.mxu3 %vm639_vm11, %v1100_v32 }
 0x2de   : > { %3294 = vmatpush.xpose.msk.msra.mxu3 %vm639_vm11, %v1098_v33 }
 0x2e1   : > { %3277 = vmatmul.msk.f32.gmra.mxu1 %vm639_vm11, %v3967_v11  ;;  %3295 = vmatmul.msk.f32.vlgmr.msra.gmra.mxu3 %vm639_vm11, %v1082_v8 }
 0x2e9   : > { %3278 = vmatmul.msk.f32.gmra.mxu1 %vm639_vm11, %v3992_v63 }
 0x32e   : > { %v4054_v34 = vpop.f32.mrf.mxu1 }
 0x32f   : > { %v747_v49 = vmul.f32 %v4054_v34, %v4072_v45  ;;  %v714_v53 = vsel %vm713_vm12, %v4054_v34, 0.0 }
 0x331   : > { %v755_v3 = vsel %vm713_vm12, %v747_v49, 0.0 }
 0x336   : > { %v4056_v43 = vpop.f32.mrf.mxu1 }
 0x337   : > { %v748_v47 = vmul.f32 %v4056_v43, %v4067_v40  ;;  %v715_v50 = vsel %vm713_vm12, %v4056_v43, 0.0 }
 0x338   : > { %v716_v57 = vadd.f32 %v715_v50, %v714_v53  ;;  %v334_v53 = vld [vmem:[%s5566_s6 + $0x7] sm:$0x1] }
 0x339   : > { %v756_v52 = vsel %vm713_vm12, %v748_v47, 0.0  ;;  %3384 = vpush %v334_v53 }
 0x33a   : > { %v757_v7 = vadd.f32 %v756_v52, %v755_v3  ;;  %v3726_v52 = vmov 4096.0  }
 0x33b   : > { %3533 = vrcp.f32 %v3726_v52 }
 0x33e   : > { %v4058_v36 = vpop.f32.mrf.mxu1 }
 0x33f   : > { %v749_v27 = vmul.f32 %v4058_v36, %v4077_v39  ;;  %v717_v55 = vsel %vm713_vm12, %v4058_v36, 0.0 }
 0x340   : > { %v718_v41 = vadd.f32 %v717_v55, %v716_v57 }
 0x341   : > { %v758_v4 = vsel %vm713_vm12, %v749_v27, 0.0  ;;  %v3534_v55 = vpop.eup %3533 }
 0x342   : > { %v759_v14 = vadd.f32 %v758_v4, %v757_v7  ;;  %v739_v57 = vmul.f32 4096.0, %v3534_v55  ;;  %vm743_vm13 = vweird.f32 %v3534_v55 }
 0x344   : > { %v740_v3 = vsub.f32 1.0, %v739_v57 }
 0x346   : > { %v4060_v37 = vpop.f32.mrf.mxu1 }
 0x347   : > { %v750_v56 = vmul.f32 %v4060_v37, %v4086_v48  ;;  %v719_v5 = vsel %vm713_vm12, %v4060_v37, 0.0 }
 0x348   : > { %v720_v15 = vadd.f32 %v719_v5, %v718_v41 }
 0x349   : > { %v760_v10 = vsel %vm713_vm12, %v750_v56, 0.0  ;;  %v1086_v56 = vpop.permute.xlu2 %1085 }
 0x34a   : > { %v761_v18 = vadd.f32 %v760_v10, %v759_v14  ;;  %v741_v10 = vmul.f32 %v3534_v55, %v740_v3 }
 0x34e   : > { %v4062_v38 = vpop.f32.mrf.mxu1 }
 0x34f   : > { %v751_v6 = vmul.f32 %v4062_v38, %v4097_v51  ;;  %v721_v12 = vsel %vm713_vm12, %v4062_v38, 0.0 }
 0x350   : > { %v722_v19 = vadd.f32 %v721_v12, %v720_v15  ;;  %v742_v15 = vadd.f32 %v3534_v55, %v741_v10 }
 0x351   : > { %v762_v26 = vsel %vm713_vm12, %v751_v6, 0.0 }
 0x352   : > { %v763_v23 = vadd.f32 %v762_v26, %v761_v18 }
 0x356   : > { %v4079_v46 = vpop.f32.mrf.mxu1 }
 0x357   : > { %v752_v13 = vmul.f32 %v4079_v46, %v4109_v1  ;;  %v723_v16 = vsel %vm713_vm12, %v4079_v46, 0.0 }
 0x358   : > { %v724_v24 = vadd.f32 %v723_v16, %v722_v19 }
 0x359   : > { %v764_v21 = vsel %vm713_vm12, %v752_v13, 0.0 }
 0x35a   : > { %v765_v31 = vadd.f32 %v764_v21, %v763_v23  ;;  %v744_v21 = vsel %vm743_vm13, %v3534_v55, %v742_v15 }
 0x35e   : > { %v4122_v8 = vpop.f32.mrf.mxu1 }
 0x35f   : > { %v753_v17 = vmul.f32 %v4122_v8, %v4120_v9  ;;  %v725_v22 = vsel %vm713_vm12, %v4122_v8, 0.0 }
 0x360   : > { %v726_v29 = vadd.f32 %v725_v22, %v724_v24 }
 0x361   : > { %v766_v28 = vsel %vm713_vm12, %v753_v17, 0.0 }
 0x362   : > { %v767_v49 = vadd.f32 %v766_v28, %v765_v31 }
 0x366   : > { %v4143_v44 = vpop.f32.mrf.mxu1 }
 0x367   : > { %v754_v32 = vmul.f32 %v4143_v44, %v4140_v25  ;;  %v727_v33 = vsel %vm713_vm12, %v4143_v44, 0.0 }
 0x368   : > { %v728_v47 = vadd.f32 %v727_v33, %v726_v29 }
 0x369   : > { %v768_v50 = vsel %vm713_vm12, %v754_v32, 0.0 }
 0x36a   : > { %729 = vadd.xlane.f32.xlu0 %v728_v47  ;;  %v769_v27 = vadd.f32 %v768_v50, %v767_v49 }
 0x36c   : > { %770 = vadd.xlane.f32.xlu2 %v769_v27 }
 0x37e   : > { %1083 = vrot.lane.b32.xlu0 %v3956_v58, %s3723_s26 }
 0x384   : > { %2080 = vrot.lane.b32.xlu2 %v3992_v63, %s3725_s11 }
 0x386   : > { %1089 = vrot.lane.b32.xlu0 %v3962_v61, %s3723_s26 }
 0x38c   : > { %1091 = vrot.lane.b32.xlu2 %v3964_v62, %s3723_s26 }
 0x38e   : > { %1606 = vrot.lane.b32.xlu0 %v3967_v11, %s3724_s30 }
 0x394   : > { %2076 = vrot.lane.b32.xlu2 %v3964_v62, %s3725_s11 }
 0x396   : > { %2078 = vrot.lane.b32.xlu0 %v3967_v11, %s3725_s11 }
 0x39c   : > { %2074 = vrot.lane.b32.xlu2 %v3962_v61, %s3725_s11 }
 0x39e   : > { %1604 = vrot.lane.b32.xlu0 %v3964_v62, %s3724_s30 }
 0x3a4   : > { %1600 = vrot.lane.b32.xlu2 %v3960_v60, %s3724_s30 }
 0x3a6   : > { %1602 = vrot.lane.b32.xlu0 %v3962_v61, %s3724_s30 }
 0x3ac   : > { %2070 = vrot.lane.b32.xlu2 %v3958_v59, %s3725_s11 }
 0x3ae   : > { %1093 = vrot.lane.b32.xlu0 %v3967_v11, %s3723_s26 }
 0x3b6   : > { %1598 = vrot.lane.b32.xlu0 %v3958_v59, %s3724_s30 }
 0x3be   : > { %1095 = vrot.lane.b32.xlu0 %v3992_v63, %s3723_s26  ;;  %s4196_s26 = spop %3384 }
 0x3dd   : > { %v730_v4 = vpop.xlane.xlu0 %729 }
 0x3de   : > { %v731_v5 = vrot.slane %v730_v4, 4 }
 0x3df   : > { %v771_v6 = vpop.xlane.xlu2 %770 }
 0x3e0   : > { %v732_v7 = vadd.f32 %v731_v5, %v730_v4  ;;  %v772_v41 = vrot.slane %v771_v6, 4 }
 0x3e2   : > { %v773_v12 = vadd.f32 %v772_v41, %v771_v6  ;;  %v733_v13 = vrot.slane %v732_v7, 2 }
 0x3e4   : > { %v734_v14 = vadd.f32 %v733_v13, %v732_v7  ;;  %v774_v26 = vrot.slane %v773_v12, 2 }
 0x3e6   : > { %v735_v16 = vrot.slane %v734_v14, 1  ;;  %v775_v17 = vadd.f32 %v774_v26, %v773_v12 }
 0x3e7   : > { %v2081_v18 = vpop.permute.xlu2 %2080 }
 0x3e8   : > { %3335 = vmatpush.xpose.msk.msrb.mxu3 %vm639_vm11, %v2081_v18  ;;  %v736_v19 = vadd.f32 %v735_v16, %v734_v14  ;;  %v776_v22 = vrot.slane %v775_v17, 1 }
 0x3ea   : > { %3386 = vpush %v736_v19  ;;  %v777_v23 = vadd.f32 %v776_v22, %v775_v17 }
 0x3eb   : > { %3388 = vpush %v744_v21 }
 0x3ec   : > { %3390 = vpush %v777_v23 }
 0x3ef   : > { %v1092_v29 = vpop.permute.xlu2 %1091 }
 0x3f0   : > { %v1084_v24 = vpop.permute.xlu0 %1083 }
 0x3f1   : > { %3296 = vmatmul.msk.f32.gmra.mxu3 %vm639_vm11, %v1084_v24 }
 0x3f7   : > { %v2077_v32 = vpop.permute.xlu2 %2076 }
 0x3f8   : > { %v1090_v28 = vpop.permute.xlu0 %1089 }
 0x3f9   : > { %3297 = vmatmul.msk.f32.gmra.mxu3 %vm639_vm11, %v1086_v56 }
 0x3ff   : > { %v2075_v49 = vpop.permute.xlu2 %2074 }
 0x400   : > { %v1607_v31 = vpop.permute.xlu0 %1606 }
 0x401   : > { %3298 = vmatmul.msk.f32.gmra.mxu3 %vm639_vm11, %v4034_v30  ;;  %3312 = vmatpush.xpose.msk.msrb.mxu2 %vm639_vm11, %v1607_v31 }
 0x407   : > { %v1601_v30 = vpop.permute.xlu2 %1600 }
 0x408   : > { %v2079_v33 = vpop.permute.xlu0 %2078 }
 0x409   : > { %3299 = vmatmul.msk.f32.gmra.mxu3 %vm639_vm11, %v1090_v28 }
 0x40a   : > { %3336 = vmatpush.xpose.msk.msrb.mxu3 %vm639_vm11, %v2079_v33 }
 0x40e   : > { %3337 = vmatpush.xpose.msk.msrb.mxu3 %vm639_vm11, %v2077_v32 }
 0x40f   : > { %v2071_v14 = vpop.permute.xlu2 %2070 }
 0x410   : > { %v1605_v47 = vpop.permute.xlu0 %1604 }
 0x411   : > { %3300 = vmatmul.msk.f32.gmra.mxu3 %vm639_vm11, %v1092_v29  ;;  %3313 = vmatpush.xpose.msk.msrb.mxu2 %vm639_vm11, %v1605_v47 }
 0x412   : > { %3338 = vmatpush.xpose.msk.msrb.mxu3 %vm639_vm11, %v2075_v49 }
 0x418   : > { %v1603_v50 = vpop.permute.xlu0 %1602 }
 0x419   : > { %3314 = vmatpush.xpose.msk.msrb.mxu2 %vm639_vm11, %v1603_v50 }
 0x41b   : > { %s3387_s14 = spop %3386 }
 0x41c   : > { %s4198_s15 = spop %3388 }
 0x41d   : > { %s3391_s16 = spop %3390  ;;  %3315 = vmatpush.xpose.msk.msrb.mxu2 %vm639_vm11, %v1601_v30  ;;  %s746_s17 = smul.f32 %s4198_s15, %s3387_s14 }
 0x41e   : > { %s779_s18 = sadd.f32 %s3391_s16, %s4196_s26 }
 0x420   : > { %p780_p4 = scmp.gt.f32.partialorder %s746_s17, %s779_s18  ;;  %v1094_v27 = vpop.permute.xlu0 %1093 }
 0x421   : > { %3301 = vmatmul.msk.f32.gmra.mxu3 %vm639_vm11, %v1094_v27 }
 0x422   : > { %s781_s19 = scalar_select %p780_p4, 1, 0 }
 0x424   : > { %s782_s20 = scvt.s32.f32 %s781_s19 }
 0x426   : > { %v783_v53 = vstv %s782_s20  ;;  %s3729_s20 = smov 56  }
 0x427   : > { %v786_v52 = vmul.f32 %v783_v53, %v4058_v36  ;;  %v785_v55 = vmul.f32 %v783_v53, %v4056_v43  ;;  %v784_v56 = vmul.f32 %v783_v53, %v4054_v34  ;;  %v789_v6 = vmul.f32 %v783_v53, %v4079_v46 }
 0x428   : > { %v1599_v57 = vpop.permute.xlu0 %1598  ;;  %v788_v36 = vmul.f32 %v783_v53, %v4062_v38  ;;  %v790_v41 = vmul.f32 %v783_v53, %v4122_v8  ;;  %v787_v46 = vmul.f32 %v783_v53, %v4060_v37  ;;  %v4223_v12 = vmul.f32 %v783_v53, %v4143_v44 }
 0x429   : > { %3316 = vmatpush.xpose.msk.msrb.mxu2 %vm639_vm11, %v1599_v57  ;;  %v798_v3 = vsel %vm713_vm12, %v786_v52, -inf  ;;  %v795_v4 = vsel %vm713_vm12, %v785_v55, -inf  ;;  %v792_v5 = vsel %vm713_vm12, %v784_v56, -inf  ;;  %v807_v34 = vsel %vm713_vm12, %v789_v6, -inf }
 0x42a   : > { %799 = vmax.xlane.f32.xlu2 %v798_v3  ;;  %796 = vmax.xlane.f32.xlu0 %v795_v4  ;;  %v804_v43 = vsel %vm713_vm12, %v788_v36, -inf  ;;  %v810_v10 = vsel %vm713_vm12, %v790_v41, -inf  ;;  %v801_v38 = vsel %vm713_vm12, %v787_v46, -inf  ;;  %v813_v13 = vsel %vm713_vm12, %v4223_v12, -inf }
 0x42b   : > { %793 = vmax.xlane.f32.xlu1 %v792_v5 }
 0x430   : > { %v1096_v7 = vpop.permute.xlu0 %1095 }
 0x431   : > { %3302 = vmatmul.msk.f32.gmra.mxu3 %vm639_vm11, %v1096_v7 }
 0x432   : > { %808 = vmax.xlane.f32.xlu2 %v807_v34  ;;  %805 = vmax.xlane.f32.xlu0 %v804_v43 }
 0x43a   : > { %811 = vmax.xlane.f32.xlu2 %v810_v10 }
 0x444   : > { %2072 = vrot.lane.b32.xlu1 %v3960_v60, %s3725_s11 }
 0x46e   : > { %802 = vmax.xlane.f32.xlu1 %v801_v38 }
 0x476   : > { %814 = vmax.xlane.f32.xlu1 %v813_v13 }
 0x49d   : > { %v797_v8 = vpop.xlane.xlu0 %796  ;;  %v800_v16 = vpop.xlane.xlu2 %799 }
 0x49e   : > { %v794_v15 = vpop.xlane.xlu1 %793  ;;  %v817_v26 = vsub.f32 %v785_v55, %v797_v8  ;;  %v818_v21 = vsub.f32 %v786_v52, %v800_v16 }
 0x49f   : > { %v816_v17 = vsub.f32 %v784_v56, %v794_v15 }
 0x4a0   : > { %v826_v18 = vmul.f32 1.442695, %v817_v26  ;;  %v828_v22 = vmul.f32 1.442695, %v818_v21 }
 0x4a1   : > { %v824_v19 = vmul.f32 1.442695, %v816_v17 }
 0x4a3   : > { %3535 = vpow2.f32 %v824_v19 }
 0x4a4   : > { %3537 = vpow2.f32 %v826_v18 }
 0x4a5   : > { %v806_v37 = vpop.xlane.xlu0 %805  ;;  %3539 = vpow2.f32 %v828_v22  ;;  %v809_v30 = vpop.xlane.xlu2 %808 }
 0x4a6   : > { %v820_v23 = vsub.f32 %v788_v36, %v806_v37  ;;  %v821_v56 = vsub.f32 %v789_v6, %v809_v30 }
 0x4a8   : > { %v832_v44 = vmul.f32 1.442695, %v820_v23  ;;  %v834_v4 = vmul.f32 1.442695, %v821_v56 }
 0x4a9   : > { %v4227_v24 = vpop.eup %3535 }
 0x4aa   : > { %v4229_v28 = vpop.eup %3537  ;;  %v840_v29 = vsel %vm713_vm12, %v4227_v24, 0.0  ;;  %3541 = vpow2.f32 %v832_v44 }
 0x4ab   : > { %841 = vadd.xlane.f32.xlu0 %v840_v29  ;;  %v843_v31 = vsel %vm713_vm12, %v4229_v28, 0.0  ;;  %v4235_v32 = vpop.eup %3539 }
 0x4ac   : > { %844 = vadd.xlane.f32.xlu2 %v843_v31  ;;  %v846_v49 = vsel %vm713_vm12, %v4235_v32, 0.0 }
 0x4ad   : > { %v812_v27 = vpop.xlane.xlu2 %811 }
 0x4ae   : > { %v822_v53 = vsub.f32 %v790_v41, %v812_v27  ;;  %v4273_v41 = vpop.f32.mrf.mxu3 }
 0x4b0   : > { %v4237_v33 = vpop.eup %3541  ;;  %v836_v57 = vmul.f32 1.442695, %v822_v53 }
 0x4b1   : > { %v852_v47 = vsel %vm713_vm12, %v4237_v33, 0.0 }
 0x4b3   : > { %853 = vadd.xlane.f32.xlu0 %v852_v47 }
 0x4b4   : > { %847 = vadd.xlane.f32.xlu2 %v846_v49 }
 0x4b6   : > { %v2073_v50 = vpop.permute.xlu1 %2072 }
 0x4b7   : > { %3339 = vmatpush.xpose.msk.msrb.mxu3 %vm639_vm11, %v2073_v50 }
 0x4bb   : > { %3340 = vmatpush.xpose.msk.msrb.mxu3 %vm639_vm11, %v2071_v14 }
 0x4c7   : > { %2068 = vrot.lane.b32.xlu0 %v3956_v58, %s3725_s11 }
 0x4cc   : > { %1596 = vrot.lane.b32.xlu2 %v3956_v58, %s3724_s30 }
 0x4e1   : > { %v803_v52 = vpop.xlane.xlu1 %802 }
 0x4e2   : > { %v819_v55 = vsub.f32 %v787_v46, %v803_v52  ;;  %v4279_v46 = vpop.f32.mrf.mxu3 }
 0x4e4   : > { %v830_v3 = vmul.f32 1.442695, %v819_v55 }
 0x4e6   : > { %3543 = vpow2.f32 %v830_v3 }
 0x4e7   : > { %3545 = vpow2.f32 %v836_v57 }
 0x4e8   : > { %3547 = vpow2.f32 %v834_v4 }
 0x4e9   : > { %v815_v10 = vpop.xlane.xlu1 %814 }
 0x4ea   : > { %v823_v38 = vsub.f32 %v4223_v12, %v815_v10  ;;  %v4291_v18 = vpop.f32.mrf.mxu3 }
 0x4ec   : > { %v4249_v5 = vpop.eup %3543 }
 0x4ed   : > { %v4251_v36 = vpop.eup %3545  ;;  %v849_v7 = vsel %vm713_vm12, %v4249_v5, 0.0 }
 0x4ee   : > { %850 = vadd.xlane.f32.xlu1 %v849_v7  ;;  %v858_v34 = vsel %vm713_vm12, %v4251_v36, 0.0  ;;  %v4257_v43 = vpop.eup %3547 }
 0x4ef   : > { %v855_v6 = vsel %vm713_vm12, %v4257_v43, 0.0 }
 0x4f1   : > { %859 = vadd.xlane.f32.xlu0 %v858_v34 }
 0x4f5   : > { %856 = vadd.xlane.f32.xlu2 %v855_v6 }
 0x505   : > { %1578 = vrot.lane.b32.xlu0 %v3950_v54, %s3727_s21 }
 0x507   : > { %2066 = vrot.lane.b32.xlu1 %v3950_v54, %s3725_s11 }
 0x50d   : > { %1594 = vrot.lane.b32.xlu2 %v3950_v54, %s3724_s30  ;;  %2052 = vrot.lane.b32.xlu0 %v3956_v58, %s3728_s22  ;;  %s3379_s30 = sshll.u32 %s5586_s28, 7 }
 0x50e   : > { %s4306_s9 = scalar_lea.vmem %s5568_s8, %s3379_s30 }
 0x515   : > { %2050 = vrot.lane.b32.xlu2 %v3950_v54, %s3728_s22  ;;  %1584 = vrot.lane.b32.xlu0 %v3960_v60, %s3727_s21  ;;  %v838_v54 = vmul.f32 1.442695, %v823_v38 }
 0x51d   : > { %1582 = vrot.lane.b32.xlu2 %v3958_v59, %s3727_s21  ;;  %2058 = vrot.lane.b32.xlu0 %v3962_v61, %s3728_s22 }
 0x51e   : > { %v842_v13 = vpop.xlane.xlu0 %841 }
 0x51f   : > { %v845_v14 = vpop.xlane.xlu2 %844  ;;  %3549 = vrcp.f32 %v842_v13  ;;  %v875_v21 = vand.u32 2147483648, %v842_v13  ;;  %v873_v22 = vand.u32 2147483647, %v842_v13  ;;  %vm869_vm1 = vweird.f32 %v842_v13 }
 0x520   : > { %3551 = vrcp.f32 %v845_v14  ;;  %v890_v23 = vand.u32 2147483648, %v845_v14  ;;  %v888_v29 = vand.u32 2147483647, %v845_v14  ;;  %vm884_vm3 = vweird.f32 %v845_v14 }
 0x521   : > { %3553 = vpow2.f32 %v838_v54  ;;  %v876_v50 = vor.u32 1.1754944e-38, %v875_v21  ;;  %vm874_vm4 = vcmp.eq.f32.partialorder %v873_v22, 8.507059e+37  ;;  %v4315_v54 = vpop.f32.mrf.mxu3 }
 0x522   : > { %v891_v55 = vor.u32 1.1754944e-38, %v890_v23  ;;  %vm889_vm6 = vcmp.eq.f32.partialorder %v888_v29, 8.507059e+37 }
 0x525   : > { %v3550_v8 = vpop.eup %3549  ;;  %2056 = vrot.lane.b32.xlu2 %v3960_v60, %s3728_s22  ;;  %1590 = vrot.lane.b32.xlu0 %v3967_v11, %s3727_s21 }
 0x526   : > { %v3552_v15 = vpop.eup %3551  ;;  %v865_v26 = vmul.f32 %v3550_v8, %v842_v13  ;;  %v4286_v16 = vpop.xlane.xlu0 %853  ;;  %vm870_vm14 = vweird.f32 %v3550_v8 }
 0x527   : > { %v880_v17 = vmul.f32 %v3552_v15, %v845_v14  ;;  %v4288_v12 = vpop.xlane.xlu2 %847  ;;  %3555 = vrcp.f32 %v4286_v16  ;;  %vm885_vm15 = vweird.f32 %v3552_v15  ;;  %v4294_v31 = vpop.eup %3553  ;;  %vm871_vm2 = vmor %vm869_vm1, %vm870_vm14  ;;  %v935_v14 = vand.u32 2147483648, %v4286_v16 }
 0x528   : > { %v866_v19 = vsub.f32 1.0, %v865_v26  ;;  %3557 = vrcp.f32 %v4288_v12  ;;  %vm886_vm5 = vmor %vm884_vm3, %vm885_vm15  ;;  %v861_v34 = vsel %vm713_vm12, %v4294_v31, 0.0  ;;  %v933_v26 = vand.u32 2147483647, %v4286_v16 }
 0x529   : > { %v881_v60 = vsub.f32 1.0, %v880_v17  ;;  %vm929_vm9 = vweird.f32 %v4286_v16  ;;  %vm899_vm10 = vweird.f32 %v4288_v12 }
 0x52a   : > { %v867_v37 = vmul.f32 %v3550_v8, %v866_v19  ;;  %vm934_vm15 = vcmp.eq.f32.partialorder %v933_v26, 8.507059e+37 }
 0x52b   : > { %v882_v44 = vmul.f32 %v3552_v15, %v881_v60  ;;  %v936_v60 = vor.u32 1.1754944e-38, %v935_v14 }
 0x52c   : > { %v868_v47 = vadd.f32 %v3550_v8, %v867_v37 }
 0x52d   : > { %v3556_v49 = vpop.eup %3555  ;;  %1588 = vrot.lane.b32.xlu2 %v3964_v62, %s3727_s21  ;;  %2064 = vrot.lane.b32.xlu0 %v3992_v63, %s3728_s22  ;;  %v883_v30 = vadd.f32 %v3552_v15, %v882_v44 }
 0x52e   : > { %v3558_v27 = vpop.eup %3557  ;;  %v925_v53 = vmul.f32 %v3556_v49, %v4286_v16  ;;  %v872_v52 = vsel %vm871_vm2, %v3550_v8, %v868_v47  ;;  %v905_v8 = vand.u32 2147483648, %v4288_v12  ;;  %vm930_vm7 = vweird.f32 %v3556_v49 }
 0x52f   : > { %v895_v56 = vmul.f32 %v3558_v27, %v4288_v12  ;;  %v1597_v57 = vpop.permute.xlu2 %1596  ;;  %v877_v3 = vsel %vm874_vm4, %v876_v50, %v872_v52  ;;  %v887_v4 = vsel %vm886_vm5, %v3552_v15, %v883_v30  ;;  %vm900_vm8 = vweird.f32 %v3558_v27  ;;  %vm931_vm13 = vmor %vm929_vm9, %vm930_vm7 }
 0x530   : > { %v926_v7 = vsub.f32 1.0, %v925_v53  ;;  %3317 = vmatpush.xpose.msk.msrb.mxu2 %vm639_vm11, %v1597_v57  ;;  %v878_v6 = vmul.f32 %v4227_v24, %v877_v3  ;;  %v892_v10 = vsel %vm889_vm6, %v891_v55, %v887_v4  ;;  %vm901_vm14 = vmor %vm899_vm10, %vm900_vm8  ;;  %v906_v21 = vor.u32 1.1754944e-38, %v905_v8 }
 0x531   : > { %v896_v38 = vsub.f32 1.0, %v895_v56  ;;  %862 = vadd.xlane.f32.xlu1 %v861_v34  ;;  %v893_v13 = vmul.f32 %v4229_v28, %v892_v10  ;;  %v903_v28 = vand.u32 2147483647, %v4288_v12  ;;  %v4340_v12 = vpop.f32.mrf.mxu3  ;;  %v1189_v50 = vsel %vm713_vm12, %v4291_v18, 0.0 }
 0x532   : > { %3279 = vmatmul.msk.f32.vlgmr.msra.gmra.mxu2 %vm713_vm12, %v878_v6  ;;  %984 = vst.msk [vmem:[%s4306_s9] sm:$0xff] %vm713_vm12, %v878_v6  ;;  %v927_v15 = vmul.f32 %v3556_v49, %v926_v7 }
 0x533   : > { %985 = vst.msk [vmem:[%s4306_s9 + $0x10] sm:$0xff] %vm713_vm12, %v893_v13  ;;  %v897_v24 = vmul.f32 %v3558_v27, %v896_v38  ;;  %vm904_vm1 = vcmp.eq.f32.partialorder %v903_v28, 8.507059e+37 }
 0x534   : > { %v928_v17 = vadd.f32 %v3556_v49, %v927_v15 }
 0x535   : > { %2062 = vrot.lane.b32.xlu2 %v3967_v11, %s3728_s22  ;;  %v898_v19 = vadd.f32 %v3558_v27, %v897_v24 }
 0x536   : > { %v932_v37 = vsel %vm931_vm13, %v3556_v49, %v928_v17  ;;  %v1186_v49 = vsel %vm713_vm12, %v4273_v41, 0.0 }
 0x537   : > { %v902_v22 = vsel %vm901_vm14, %v3558_v27, %v898_v19  ;;  %v937_v23 = vsel %vm934_vm15, %v936_v60, %v932_v37  ;;  %v1191_v27 = vsel %vm713_vm12, %v4315_v54, 0.0 }
 0x538   : > { %v907_v44 = vsel %vm904_vm1, %v906_v21, %v902_v22  ;;  %v4330_v16 = vmul.f32 %v4237_v33, %v937_v23 }
 0x539   : > { %v2069_v29 = vpop.permute.xlu0 %2068  ;;  %v908_v11 = vmul.f32 %v4235_v32, %v907_v44  ;;  %v4343_v47 = vpop.f32.mrf.mxu3  ;;  %v1187_v32 = vsel %vm713_vm12, %v4279_v46, 0.0 }
 0x53a   : > { %3280 = vmatmul.msk.f32.gmra.mxu2 %vm713_vm12, %v893_v13  ;;  %3341 = vmatpush.xpose.msk.msrb.mxu3 %vm639_vm11, %v2069_v29  ;;  %988 = vst.msk [vmem:[%s4306_s9 + $0x40] sm:$0xff] %vm713_vm12, %v4330_v16  ;;  %v1188_v30 = vadd.f32 %v1187_v32, %v1186_v49  ;;  %v1195_v55 = vsel %vm713_vm12, %v4343_v47, 0.0 }
 0x53b   : > { %986 = vst.msk [vmem:[%s4306_s9 + $0x20] sm:$0xff] %vm713_vm12, %v908_v11 }
 0x53c   : > { %v1190_v53 = vadd.f32 %v1189_v50, %v1188_v30 }
 0x53e   : > { %v1192_v52 = vadd.f32 %v1191_v27, %v1190_v53 }
 0x541   : > { %v4349_v33 = vpop.f32.mrf.mxu3 }
 0x542   : > { %3281 = vmatmul.msk.f32.gmra.mxu2 %vm713_vm12, %v908_v11  ;;  %v1197_v3 = vsel %vm713_vm12, %v4349_v33, 0.0 }
 0x549   : > { %v4363_v57 = vpop.f32.mrf.mxu3 }
 0x54a   : > { %1580 = vrot.lane.b32.xlu1 %v3956_v58, %s3727_s21  ;;  %v1193_v58 = vsel %vm713_vm12, %v4340_v12, 0.0  ;;  %v1199_v7 = vsel %vm713_vm12, %v4363_v57, 0.0 }
 0x54b   : > { %v1194_v56 = vadd.f32 %v1193_v58, %v1192_v52 }
 0x54d   : > { %v1196_v4 = vadd.f32 %v1195_v55, %v1194_v56 }
 0x552   : > { %2054 = vrot.lane.b32.xlu1 %v3958_v59, %s3728_s22  ;;  %v1198_v59 = vadd.f32 %v1197_v3, %v1196_v4 }
 0x554   : > { %v1200_v34 = vadd.f32 %v1199_v7, %v1198_v59 }
 0x55a   : > { %1586 = vrot.lane.b32.xlu1 %v3962_v61, %s3727_s21 }
 0x55e   : > { %1201 = vadd.xlane.f32.xlu2 %v1200_v34 }
 0x561   : > { %v851_v6 = vpop.xlane.xlu1 %850 }
 0x562   : > { %3559 = vrcp.f32 %v851_v6  ;;  %2060 = vrot.lane.b32.xlu1 %v3964_v62, %s3728_s22  ;;  %v920_v61 = vand.u32 2147483648, %v851_v6  ;;  %v918_v28 = vand.u32 2147483647, %v851_v6  ;;  %vm914_vm3 = vweird.f32 %v851_v6  ;;  %s3731_s22 = smov 48  }
 0x564   : > { %v860_v10 = vpop.xlane.xlu0 %859  ;;  %v921_v37 = vor.u32 1.1754944e-38, %v920_v61  ;;  %vm919_vm6 = vcmp.eq.f32.partialorder %v918_v28, 8.507059e+37 }
 0x565   : > { %3561 = vrcp.f32 %v860_v10  ;;  %v965_v62 = vand.u32 2147483648, %v860_v10  ;;  %v963_v21 = vand.u32 2147483647, %v860_v10  ;;  %vm959_vm7 = vweird.f32 %v860_v10 }
 0x567   : > { %v966_v49 = vor.u32 1.1754944e-38, %v965_v62  ;;  %vm964_vm9 = vcmp.eq.f32.partialorder %v963_v21, 8.507059e+37 }
 0x568   : > { %v3560_v38 = vpop.eup %3559  ;;  %v857_v13 = vpop.xlane.xlu2 %856 }
 0x569   : > { %v910_v14 = vmul.f32 %v3560_v38, %v851_v6  ;;  %3563 = vrcp.f32 %v857_v13  ;;  %vm915_vm2 = vweird.f32 %v3560_v38  ;;  %v950_v50 = vand.u32 2147483648, %v857_v13 }
 0x56a   : > { %1592 = vrot.lane.b32.xlu1 %v3992_v63, %s3727_s21  ;;  %vm916_vm4 = vmor %vm914_vm3, %vm915_vm2  ;;  %v948_v53 = vand.u32 2147483647, %v857_v13  ;;  %vm944_vm13 = vweird.f32 %v857_v13  ;;  %s3730_s21 = smov 40  }
 0x56b   : > { %v3562_v8 = vpop.eup %3561  ;;  %v911_v15 = vsub.f32 1.0, %v910_v14  ;;  %v951_v3 = vor.u32 1.1754944e-38, %v950_v50 }
 0x56c   : > { %v955_v26 = vmul.f32 %v3562_v8, %v860_v10  ;;  %vm960_vm5 = vweird.f32 %v3562_v8  ;;  %vm949_vm15 = vcmp.eq.f32.partialorder %v948_v53, 8.507059e+37  ;;  %v1219_v10 = vmul.f32 %v4273_v41, %v4072_v45 }
 0x56d   : > { %v912_v24 = vmul.f32 %v3560_v38, %v911_v15  ;;  %vm961_vm8 = vmor %vm959_vm7, %vm960_vm5  ;;  %v1223_v15 = vmul.f32 %v4340_v12, %v4097_v51  ;;  %v1226_v51 = vmul.f32 %v4363_v57, %v4140_v25 }
 0x56e   : > { %v956_v17 = vsub.f32 1.0, %v955_v26  ;;  %v1225_v26 = vmul.f32 %v4349_v33, %v4120_v9 }
 0x56f   : > { %v3564_v19 = vpop.eup %3563  ;;  %v913_v60 = vadd.f32 %v3560_v38, %v912_v24 }
 0x570   : > { %v957_v22 = vmul.f32 %v3562_v8, %v956_v17  ;;  %v940_v23 = vmul.f32 %v3564_v19, %v857_v13  ;;  %v1595_v44 = vpop.permute.xlu2 %1594  ;;  %vm945_vm10 = vweird.f32 %v3564_v19 }
 0x571   : > { %3318 = vmatpush.xpose.msk.msrb.mxu2 %vm639_vm11, %v1595_v44  ;;  %v917_v63 = vsel %vm916_vm4, %v3560_v38, %v913_v60  ;;  %vm946_vm14 = vmor %vm944_vm13, %vm945_vm10  ;;  %v1221_v38 = vmul.f32 %v4291_v18, %v4077_v39  ;;  %v1224_v39 = vmul.f32 %v4343_v47, %v4109_v1  ;;  %v1240_v1 = vsel %vm713_vm12, %v1226_v51, 0.0 }
 0x572   : > { %v941_v29 = vsub.f32 1.0, %v940_v23  ;;  %v922_v11 = vsel %vm919_vm6, %v921_v37, %v917_v63  ;;  %v958_v32 = vadd.f32 %v3562_v8, %v957_v22 }
 0x573   : > { %v923_v30 = vmul.f32 %v4249_v5, %v922_v11  ;;  %v1236_v28 = vsel %vm713_vm12, %v1224_v39, 0.0 }
 0x574   : > { %v942_v27 = vmul.f32 %v3564_v19, %v941_v29  ;;  %v962_v58 = vsel %vm961_vm8, %v3562_v8, %v958_v32  ;;  %v1227_v8 = vsel %vm713_vm12, %v1219_v10, 0.0 }
 0x575   : > { %3282 = vmatmul.msk.f32.gmra.mxu2 %vm713_vm12, %v923_v30  ;;  %987 = vst.msk [vmem:[%s4306_s9 + $0x30] sm:$0xff] %vm713_vm12, %v923_v30  ;;  %v967_v52 = vsel %vm964_vm9, %v966_v49, %v962_v58 }
 0x576   : > { %v943_v55 = vadd.f32 %v3564_v19, %v942_v27  ;;  %v968_v56 = vmul.f32 %v4251_v36, %v967_v52  ;;  %v1220_v36 = vmul.f32 %v4279_v46, %v4067_v40 }
 0x577   : > { %v1579_v59 = vpop.permute.xlu0 %1578 }
 0x578   : > { %v947_v5 = vsel %vm946_vm14, %v3564_v19, %v943_v55  ;;  %990 = vst.msk [vmem:[%s4306_s9 + $0x60] sm:$0xff] %vm713_vm12, %v968_v56  ;;  %v2051_v6 = vpop.permute.xlu2 %2050  ;;  %v1228_v13 = vsel %vm713_vm12, %v1220_v36, 0.0  ;;  %v1238_v19 = vsel %vm713_vm12, %v1225_v26, 0.0 }
 0x579   : > { %v2067_v4 = vpop.permute.xlu1 %2066  ;;  %v952_v7 = vsel %vm949_vm15, %v951_v3, %v947_v5  ;;  %v1229_v40 = vadd.f32 %v1228_v13, %v1227_v8 }
 0x57a   : > { %3342 = vmatpush.xpose.msk.msrb.mxu3 %vm639_vm11, %v2067_v4  ;;  %v953_v34 = vmul.f32 %v4257_v43, %v952_v7  ;;  %v1222_v43 = vmul.f32 %v4315_v54, %v4086_v48  ;;  %v1234_v48 = vsel %vm713_vm12, %v1223_v15, 0.0 }
 0x57c   : > { %989 = vst.msk [vmem:[%s4306_s9 + $0x50] sm:$0xff] %vm713_vm12, %v953_v34  ;;  %v1232_v45 = vsel %vm713_vm12, %v1222_v43, 0.0 }
 0x57d   : > { %3283 = vmatmul.msk.f32.gmra.mxu2 %vm713_vm12, %v4330_v16  ;;  %3343 = vmatmul.msk.f32.vlgmr.msrb.gmra.mxu3 %vm639_vm11, %v2051_v6  ;;  %v1230_v16 = vsel %vm713_vm12, %v1221_v38, 0.0 }
 0x57e   : > { %v1231_v61 = vadd.f32 %v1230_v16, %v1229_v40 }
 0x57f   : > { %v2053_v14 = vpop.permute.xlu0 %2052 }
 0x580   : > { %v1233_v24 = vadd.f32 %v1232_v45, %v1231_v61  ;;  %v1583_v22 = vpop.permute.xlu2 %1582 }
 0x582   : > { %v1235_v17 = vadd.f32 %v1234_v48, %v1233_v24 }
 0x584   : > { %v1237_v62 = vadd.f32 %v1236_v28, %v1235_v17 }
 0x585   : > { %3284 = vmatmul.msk.f32.gmra.mxu2 %vm713_vm12, %v953_v34  ;;  %3344 = vmatmul.msk.f32.gmra.mxu3 %vm639_vm11, %v2053_v14 }
 0x586   : > { %v1239_v60 = vadd.f32 %v1238_v19, %v1237_v62 }
 0x588   : > { %v1241_v21 = vadd.f32 %v1240_v1, %v1239_v60  ;;  %v2057_v50 = vpop.permute.xlu2 %2056 }
 0x58d   : > { %3285 = vmatmul.msk.f32.gmra.mxu2 %vm713_vm12, %v968_v56  ;;  %v1585_v56 = vpop.permute.xlu0 %1584 }
 0x590   : > { %v1589_v58 = vpop.permute.xlu2 %1588 }
 0x594   : > { %1242 = vadd.xlane.f32.xlu1 %v1241_v21 }
 0x595   : > { %v2059_v4 = vpop.permute.xlu0 %2058 }
 0x598   : > { %v2063_v55 = vpop.permute.xlu2 %2062 }
 0x59d   : > { %v1591_v38 = vpop.permute.xlu0 %1590 }
 0x5a4   : > { %v863_v37 = vpop.xlane.xlu1 %862 }
 0x5a5   : > { %3565 = vrcp.f32 %v863_v37  ;;  %v980_v63 = vand.u32 2147483648, %v863_v37  ;;  %v978_v29 = vand.u32 2147483647, %v863_v37  ;;  %vm974_vm2 = vweird.f32 %v863_v37  ;;  %v2065_v13 = vpop.permute.xlu0 %2064 }
 0x5a7   : > { %v981_v32 = vor.u32 1.1754944e-38, %v980_v63  ;;  %vm979_vm4 = vcmp.eq.f32.partialorder %v978_v29, 8.507059e+37 }
 0x5ab   : > { %v3566_v9 = vpop.eup %3565 }
 0x5ac   : > { %v970_v23 = vmul.f32 %v3566_v9, %v863_v37  ;;  %vm975_vm1 = vweird.f32 %v3566_v9 }
 0x5ad   : > { %vm976_vm3 = vmor %vm974_vm2, %vm975_vm1 }
 0x5ae   : > { %v971_v44 = vsub.f32 1.0, %v970_v23 }
 0x5b0   : > { %v972_v25 = vmul.f32 %v3566_v9, %v971_v44  ;;  %v4480_v44 = vld [vmem:[%s5562_s2 + $0x8] sm:$0xff] }
 0x5b2   : > { %v973_v11 = vadd.f32 %v3566_v9, %v972_v25 }
 0x5b4   : > { %v977_v49 = vsel %vm976_vm3, %v3566_v9, %v973_v11 }
 0x5b5   : > { %v982_v30 = vsel %vm979_vm4, %v981_v32, %v977_v49  ;;  %v4435_v61 = vpop.f32.mrf.mxu2  ;;  %v4500_v32 = vld [vmem:[%s5562_s2 + $0x10] sm:$0xff] }
 0x5b6   : > { %v983_v27 = vmul.f32 %v4294_v31, %v982_v30 }
 0x5b8   : > { %3286 = vmatmul.msk.f32.gmra.mxu2 %vm713_vm12, %v983_v27  ;;  %991 = vst.msk [vmem:[%s4306_s9 + $0x70] sm:$0xff] %vm713_vm12, %v983_v27 }
 0x5bc   : > { %v1581_v53 = vpop.permute.xlu1 %1580 }
 0x5bd   : > { %v4439_v26 = vpop.f32.mrf.mxu2 }
 0x5c0   : > { %3319 = vmatmul.msk.f32.vlgmr.msrb.gmra.mxu2 %vm639_vm11, %v1579_v59 }
 0x5c4   : > { %v2055_v52 = vpop.permute.xlu1 %2054 }
 0x5c5   : > { %3345 = vmatmul.msk.f32.gmra.mxu3 %vm639_vm11, %v2055_v52  ;;  %v4443_v28 = vpop.f32.mrf.mxu2 }
 0x5c8   : > { %3320 = vmatmul.msk.f32.gmra.mxu2 %vm639_vm11, %v1581_v53  ;;  %v4512_v53 = vld [vmem:[%s5562_s2 + $0x18] sm:$0xff] }
 0x5cc   : > { %v1587_v3 = vpop.permute.xlu1 %1586 }
 0x5cd   : > { %3346 = vmatmul.msk.f32.gmra.mxu3 %vm639_vm11, %v2057_v50 }
 0x5d0   : > { %3321 = vmatmul.msk.f32.gmra.mxu2 %vm639_vm11, %v1583_v22 }
 0x5d1   : > { %v1202_v31 = vpop.xlane.xlu2 %1201 }
 0x5d2   : > { %v1203_v5 = vrot.slane %v1202_v31, 4 }
 0x5d4   : > { %v1204_v7 = vadd.f32 %v1203_v5, %v1202_v31  ;;  %v2061_v36 = vpop.permute.xlu1 %2060 }
 0x5d5   : > { %3347 = vmatmul.msk.f32.gmra.mxu3 %vm639_vm11, %v2059_v4 }
 0x5d6   : > { %v1205_v34 = vrot.slane %v1204_v7, 2 }
 0x5d8   : > { %3322 = vmatmul.msk.f32.gmra.mxu2 %vm639_vm11, %v1585_v56  ;;  %v1206_v59 = vadd.f32 %v1205_v34, %v1204_v7 }
 0x5da   : > { %v1207_v6 = vrot.slane %v1206_v59, 1 }
 0x5dc   : > { %v1208_v10 = vadd.f32 %v1207_v6, %v1206_v59  ;;  %v1593_v43 = vpop.permute.xlu1 %1592 }
 0x5dd   : > { %3348 = vmatmul.msk.f32.gmra.mxu3 %vm639_vm11, %v2061_v36  ;;  %v4535_v36 = vld [vmem:[%s5562_s2 + $0x28] sm:$0xff] }
 0x5de   : > { %3392 = vpush %v1208_v10 }
 0x5e0   : > { %3323 = vmatmul.msk.f32.gmra.mxu2 %vm639_vm11, %v1587_v3  ;;  %v4523_v3 = vld [vmem:[%s5562_s2 + $0x20] sm:$0xff] }
 0x5e5   : > { %3349 = vmatmul.msk.f32.gmra.mxu3 %vm639_vm11, %v2063_v55 }
 0x5e8   : > { %3324 = vmatmul.msk.f32.gmra.mxu2 %vm639_vm11, %v1589_v58 }
 0x5ed   : > { %3350 = vmatmul.msk.f32.gmra.mxu3 %vm639_vm11, %v2065_v13 }
 0x5f0   : > { %3325 = vmatmul.msk.f32.gmra.mxu2 %vm639_vm11, %v1591_v38 }
 0x5f8   : > { %3326 = vmatmul.msk.f32.gmra.mxu2 %vm639_vm11, %v1593_v43  ;;  %v4449_v17 = vpop.f32.mrf.mxu2 }
 0x600   : > { %v4437_v48 = vpop.f32.mrf.mxu3  ;;  %v4465_v37 = vpop.f32.mrf.mxu2 }
 0x601   : > { %v2155_v50 = vsel %vm713_vm12, %v4437_v48, 0.0 }
 0x607   : > { %v1243_v14 = vpop.xlane.xlu1 %1242 }
 0x608   : > { %v1244_v8 = vrot.slane %v1243_v14, 4  ;;  %v4441_v24 = vpop.f32.mrf.mxu3  ;;  %v4486_v25 = vpop.f32.mrf.mxu2 }
 0x609   : > { %5574 = vst [vmem:[#allocation3_spill] sm:$0xff] %v4486_v25  ;;  %v2156_v11 = vsel %vm713_vm12, %v4441_v24, 0.0 }
 0x60a   : > { %v1245_v16 = vadd.f32 %v1244_v8, %v1243_v14  ;;  %v2157_v52 = vadd.f32 %v2156_v11, %v2155_v50  ;;  %v4545_v8 = vld [vmem:[%s5562_s2 + $0x30] sm:$0xff]  ;;  %v4560_v50 = vld [vmem:[%s5562_s2 + $0x38] sm:$0xff] }
 0x60c   : > { %v1246_v15 = vrot.slane %v1245_v16, 2 }
 0x60e   : > { %v1247_v40 = vadd.f32 %v1246_v15, %v1245_v16 }
 0x60f   : > { %s3393_s11 = spop %3392 }
 0x610   : > { %v1248_v45 = vrot.slane %v1247_v40, 1  ;;  %s1218_s13 = smul.f32 %s3393_s11, %s4198_s15  ;;  %v4549_v15 = vpop.f32.mrf.mxu2 }
 0x611   : > { %5575 = vst [vmem:[#allocation4_spill] sm:$0xff] %v4549_v15 }
 0x612   : > { %v1249_v39 = vadd.f32 %v1248_v45, %v1247_v40 }
 0x614   : > { %3394 = vpush %v1249_v39 }
 0x645   : > { %s3395_s12 = spop %3394 }
 0x646   : > { %s1251_s14 = sadd.f32 %s3395_s12, %s4196_s26 }
 0x648   : > { %p1252_p5 = scmp.gt.f32.partialorder %s1218_s13, %s1251_s14  ;;  %v4447_v51 = vpop.f32.mrf.mxu3 }
 0x649   : > { %v2190_v49 = vmul.f32 %v4500_v32, %v4447_v51  ;;  %v2158_v27 = vsel %vm713_vm12, %v4447_v51, 0.0 }
 0x64a   : > { %s1253_s16 = scalar_select %p1252_p5, 1, 0  ;;  %v2159_v7 = vadd.f32 %v2158_v27, %v2157_v52 }
 0x64b   : > { %v2199_v56 = vsel %vm713_vm12, %v2190_v49, 0.0 }
 0x64c   : > { %s1254_s17 = scvt.s32.f32 %s1253_s16 }
 0x64e   : > { %v4451_v19 = vstv %s1254_s17 }
 0x64f   : > { %v4455_v62 = vmul.f32 %v4451_v19, %v4273_v41  ;;  %v4463_v21 = vmul.f32 %v4451_v19, %v4315_v54  ;;  %v4473_v41 = vmul.f32 %v4451_v19, %v4349_v33  ;;  %v2189_v54 = vmul.f32 %v4480_v44, %v4441_v24  ;;  %v4491_v33 = vld [vmem:[%s5562_s2] sm:$0xff] }
 0x650   : > { %v4457_v1 = vpop.f32.mrf.mxu3  ;;  %v2188_v29 = vmul.f32 %v4491_v33, %v4437_v48 }
 0x651   : > { %v1264_v60 = vsel %vm713_vm12, %v4455_v62, -inf  ;;  %v1273_v22 = vsel %vm713_vm12, %v4463_v21, -inf  ;;  %v1282_v63 = vsel %vm713_vm12, %v4473_v41, -inf  ;;  %v2197_v30 = vsel %vm713_vm12, %v2189_v54, 0.0 }
 0x652   : > { %1265 = vmax.xlane.f32.xlu2 %v1264_v60  ;;  %v2191_v58 = vmul.f32 %v4512_v53, %v4457_v1  ;;  %v2196_v55 = vsel %vm713_vm12, %v2188_v29, 0.0  ;;  %v2160_v31 = vsel %vm713_vm12, %v4457_v1, 0.0 }
 0x653   : > { %v2198_v4 = vadd.f32 %v2197_v30, %v2196_v55  ;;  %v2161_v13 = vadd.f32 %v2160_v31, %v2159_v7 }
 0x654   : > { %v2201_v59 = vsel %vm713_vm12, %v2191_v58, 0.0 }
 0x655   : > { %v2200_v38 = vadd.f32 %v2199_v56, %v2198_v4  ;;  %v4567_v56 = vpop.f32.mrf.mxu2  ;;  %v4573_v4 = vmul.f32 %v4451_v19, %v4291_v18  ;;  %v4588_v18 = vmul.f32 %v4451_v19, %v4343_v47 }
 0x656   : > { %5576 = vst [vmem:[#allocation5_spill] sm:$0xff] %v4567_v56 }
 0x657   : > { %v2202_v40 = vadd.f32 %v2201_v59, %v2200_v38  ;;  %v1270_v59 = vsel %vm713_vm12, %v4573_v4, -inf  ;;  %v1279_v38 = vsel %vm713_vm12, %v4588_v18, -inf }
 0x658   : > { %v4467_v9 = vpop.f32.mrf.mxu3 }
 0x659   : > { %v2192_v5 = vmul.f32 %v4523_v3, %v4467_v9  ;;  %v2162_v6 = vsel %vm713_vm12, %v4467_v9, 0.0 }
 0x65a   : > { %1274 = vmax.xlane.f32.xlu2 %v1273_v22  ;;  %v2163_v45 = vadd.f32 %v2162_v6, %v2161_v13 }
 0x65b   : > { %v2203_v43 = vsel %vm713_vm12, %v2192_v5, 0.0  ;;  %v1257_v5 = vmul.f32 %v4451_v19, %v4279_v46  ;;  %v4584_v46 = vmul.f32 %v4451_v19, %v4340_v12 }
 0x65c   : > { %v2204_v22 = vadd.f32 %v2203_v43, %v2202_v40  ;;  %v4598_v43 = vmul.f32 %v4451_v19, %v4363_v57 }
 0x65d   : > { %v1267_v7 = vsel %vm713_vm12, %v1257_v5, -inf  ;;  %v4580_v6 = vpop.f32.mrf.mxu2 }
 0x65e   : > { %v1285_v12 = vsel %vm713_vm12, %v4598_v43, -inf  ;;  %v1683_v19 = vsel %vm713_vm12, %v4580_v6, 0.0 }
 0x660   : > { %v4475_v23 = vpop.f32.mrf.mxu3 }
 0x661   : > { %v2193_v10 = vmul.f32 %v4535_v36, %v4475_v23  ;;  %v2164_v14 = vsel %vm713_vm12, %v4475_v23, 0.0 }
 0x662   : > { %1283 = vmax.xlane.f32.xlu2 %v1282_v63  ;;  %v2165_v54 = vadd.f32 %v2164_v14, %v2163_v45 }
 0x663   : > { %v2205_v39 = vsel %vm713_vm12, %v2193_v10, 0.0  ;;  %v1276_v10 = vsel %vm713_vm12, %v4584_v46, -inf }
 0x664   : > { %v2206_v49 = vadd.f32 %v2205_v39, %v2204_v22 }
 0x665   : > { %v4594_v13 = vpop.f32.mrf.mxu2 }
 0x666   : > { %v1684_v57 = vsel %vm713_vm12, %v4594_v13, 0.0 }
 0x668   : > { %v4527_v34 = vpop.f32.mrf.mxu3 }
 0x669   : > { %v2194_v16 = vmul.f32 %v4545_v8, %v4527_v34  ;;  %v2166_v60 = vsel %vm713_vm12, %v4527_v34, 0.0 }
 0x66a   : > { %v2167_v11 = vadd.f32 %v2166_v60, %v2165_v54  ;;  %v1685_v60 = vadd.f32 %v1684_v57, %v1683_v19 }
 0x66b   : > { %v2207_v63 = vsel %vm713_vm12, %v2194_v16, 0.0 }
 0x66c   : > { %v2208_v52 = vadd.f32 %v2207_v63, %v2206_v49 }
 0x66d   : > { %v4602_v47 = vpop.f32.mrf.mxu2 }
 0x66e   : > { %v1686_v39 = vsel %vm713_vm12, %v4602_v47, 0.0 }
 0x66f   : > { %v1687_v54 = vadd.f32 %v1686_v39, %v1685_v60 }
 0x670   : > { %v4555_v29 = vpop.f32.mrf.mxu3 }
 0x671   : > { %v2195_v30 = vmul.f32 %v4560_v50, %v4555_v29  ;;  %v2168_v27 = vsel %vm713_vm12, %v4555_v29, 0.0 }
 0x672   : > { %v2169_v58 = vadd.f32 %v2168_v27, %v2167_v11 }
 0x673   : > { %v2209_v55 = vsel %vm713_vm12, %v2195_v30, 0.0 }
 0x674   : > { %2170 = vadd.xlane.f32.xlu1 %v2169_v58  ;;  %v2210_v31 = vadd.f32 %v2209_v55, %v2208_v52 }
 0x675   : > { %v4604_v14 = vpop.f32.mrf.mxu2 }
 0x676   : > { %2211 = vadd.xlane.f32.xlu0 %v2210_v31  ;;  %v1688_v22 = vsel %vm713_vm12, %v4604_v14, 0.0 }
 0x677   : > { %v1689_v11 = vadd.f32 %v1688_v22, %v1687_v54 }
 0x67a   : > { %3449 = vrot.lane.b32.xlu2 %v3997_v0, %s3729_s20 }
 0x67c   : > { %1268 = vmax.xlane.f32.xlu1 %v1267_v7 }
 0x67d   : > { %v4608_v16 = vpop.f32.mrf.mxu2 }
 0x67e   : > { %1271 = vmax.xlane.f32.xlu0 %v1270_v59  ;;  %v1690_v63 = vsel %vm713_vm12, %v4608_v16, 0.0 }
 0x67f   : > { %v1691_v30 = vadd.f32 %v1690_v63, %v1689_v11 }
 0x684   : > { %1277 = vmax.xlane.f32.xlu1 %v1276_v10 }
 0x685   : > { %v4610_v40 = vpop.f32.mrf.mxu2 }
 0x686   : > { %1280 = vmax.xlane.f32.xlu0 %v1279_v38  ;;  %v1692_v49 = vsel %vm713_vm12, %v4610_v40, 0.0 }
 0x687   : > { %v1693_v55 = vadd.f32 %v1692_v49, %v1691_v30 }
 0x68d   : > { %v4612_v45 = vpop.f32.mrf.mxu2 }
 0x68e   : > { %1286 = vmax.xlane.f32.xlu0 %v1285_v12  ;;  %v1694_v58 = vsel %vm713_vm12, %v4612_v45, 0.0 }
 0x68f   : > { %v1695_v10 = vadd.f32 %v1694_v58, %v1693_v55 }
 0x695   : > { %v4626_v27 = vpop.f32.mrf.mxu2 }
 0x696   : > { %v1696_v7 = vsel %vm713_vm12, %v4626_v27, 0.0 }
 0x697   : > { %v1697_v38 = vadd.f32 %v1696_v7, %v1695_v10 }
 0x6a2   : > { %3454 = vrot.lane.b32.xlu0 %v3975_v35, %s3729_s20 }
 0x6c5   : > { %v1266_v52 = vpop.xlane.xlu2 %1265 }
 0x6c6   : > { %v1288_v31 = vsub.f32 %v4455_v62, %v1266_v52 }
 0x6c8   : > { %v1296_v59 = vmul.f32 1.442695, %v1288_v31 }
 0x6ca   : > { %3567 = vpow2.f32 %v1296_v59  ;;  %v1717_v59 = vmul.f32 %v4480_v44, %v4594_v13 }
 0x6cc   : > { %1698 = vadd.xlane.f32.xlu0 %v1697_v38  ;;  %v1725_v44 = vsel %vm713_vm12, %v1717_v59, 0.0 }
 0x6cd   : > { %v1275_v12 = vpop.xlane.xlu2 %1274 }
 0x6ce   : > { %v1291_v55 = vsub.f32 %v4463_v21, %v1275_v12 }
 0x6d0   : > { %v4633_v57 = vpop.eup %3567  ;;  %v1302_v7 = vmul.f32 1.442695, %v1291_v55 }
 0x6d1   : > { %v1312_v19 = vsel %vm713_vm12, %v4633_v57, 0.0 }
 0x6d2   : > { %1313 = vadd.xlane.f32.xlu1 %v1312_v19 }
 0x6d5   : > { %v1284_v39 = vpop.xlane.xlu2 %1283 }
 0x6dd   : > { %v3450_v60 = vpop.permute.xlu2 %3449 }
 0x6de   : > { %v3451_v22 = vunpack.i.l.bf16 %v3450_v60  ;;  %v3452_v62 = vunpack.i.h.bf16 %v3450_v60 }
 0x6e0   : > { %1545 = vmatpush.msrb.mxu0 %v3451_v22  ;;  %3459 = vrot.lane.b32.xlu0 %v3982_v42, %s3729_s20  ;;  %v1719_v22 = vmul.f32 %v4512_v53, %v4604_v14  ;;  %v1721_v53 = vmul.f32 %v4535_v36, %v4610_v40 }
 0x6e2   : > { %1546 = vmatpush.msrb.mxu0 %v3452_v62  ;;  %v1720_v62 = vmul.f32 %v4523_v3, %v4608_v16 }
 0x6e7   : > { %v4639_v54 = vpop.xlane.xlu1 %2170 }
 0x6e9   : > { %v4641_v63 = vpop.xlane.xlu0 %2211 }
 0x6ef   : > { %v1269_v11 = vpop.xlane.xlu1 %1268 }
 0x6f0   : > { %v1289_v49 = vsub.f32 %v1257_v5, %v1269_v11  ;;  %v1716_v5 = vmul.f32 %v4491_v33, %v4580_v6 }
 0x6f1   : > { %v1272_v30 = vpop.xlane.xlu0 %1271 }
 0x6f2   : > { %v1298_v58 = vmul.f32 1.442695, %v1289_v49  ;;  %v1290_v52 = vsub.f32 %v4573_v4, %v1272_v30  ;;  %v1718_v4 = vmul.f32 %v4500_v32, %v4602_v47  ;;  %v1724_v33 = vsel %vm713_vm12, %v1716_v5, 0.0 }
 0x6f3   : > { %v1726_v11 = vadd.f32 %v1725_v44, %v1724_v33  ;;  %v1294_v49 = vsub.f32 %v4473_v41, %v1284_v39  ;;  %v1729_v30 = vsel %vm713_vm12, %v1719_v22, 0.0  ;;  %v1733_v41 = vsel %vm713_vm12, %v1721_v53, 0.0 }
 0x6f4   : > { %3569 = vpow2.f32 %v1298_v58  ;;  %v1300_v31 = vmul.f32 1.442695, %v1290_v52  ;;  %v1727_v32 = vsel %vm713_vm12, %v1718_v4, 0.0  ;;  %v1723_v39 = vmul.f32 %v4560_v50, %v4626_v27 }
 0x6f5   : > { %v1728_v55 = vadd.f32 %v1727_v32, %v1726_v11  ;;  %v1308_v3 = vmul.f32 1.442695, %v1294_v49 }
 0x6f6   : > { %3571 = vpow2.f32 %v1300_v31  ;;  %v1731_v31 = vsel %vm713_vm12, %v1720_v62, 0.0  ;;  %v1737_v50 = vsel %vm713_vm12, %v1723_v39, 0.0 }
 0x6f7   : > { %3573 = vpow2.f32 %v1302_v7  ;;  %v1278_v58 = vpop.xlane.xlu1 %1277  ;;  %v1722_v7 = vmul.f32 %v4545_v8, %v4612_v45  ;;  %v1730_v59 = vadd.f32 %v1729_v30, %v1728_v55 }
 0x6f9   : > { %v1281_v10 = vpop.xlane.xlu0 %1280  ;;  %v1732_v4 = vadd.f32 %v1731_v31, %v1730_v59 }
 0x6fa   : > { %v4647_v38 = vpop.eup %3569  ;;  %v1293_v19 = vsub.f32 %v4588_v18, %v1281_v10  ;;  %v1292_v10 = vsub.f32 %v4584_v46, %v1278_v58 }
 0x6fb   : > { %v1315_v21 = vsel %vm713_vm12, %v4647_v38, 0.0  ;;  %v1734_v46 = vadd.f32 %v1733_v41, %v1732_v4 }
 0x6fc   : > { %v4656_v12 = vpop.eup %3571  ;;  %v1306_v60 = vmul.f32 1.442695, %v1293_v19  ;;  %1316 = vadd.xlane.f32.xlu1 %v1315_v21  ;;  %v1735_v21 = vsel %vm713_vm12, %v1722_v7, 0.0  ;;  %v1304_v8 = vmul.f32 1.442695, %v1292_v10 }
 0x6fd   : > { %v1318_v18 = vsel %vm713_vm12, %v4656_v12, 0.0  ;;  %v4671_v52 = vpop.eup %3573  ;;  %v1736_v22 = vadd.f32 %v1735_v21, %v1734_v46 }
 0x6fe   : > { %1319 = vadd.xlane.f32.xlu2 %v1318_v18  ;;  %3575 = vpow2.f32 %v1306_v60  ;;  %v1321_v36 = vsel %vm713_vm12, %v4671_v52, 0.0 }
 0x6ff   : > { %3577 = vpow2.f32 %v1308_v3  ;;  %v1738_v33 = vadd.f32 %v1737_v50, %v1736_v22 }
 0x700   : > { %3579 = vpow2.f32 %v1304_v8 }
 0x701   : > { %v1287_v19 = vpop.xlane.xlu0 %1286 }
 0x702   : > { %v1295_v60 = vsub.f32 %v4598_v43, %v1287_v19 }
 0x704   : > { %v4682_v5 = vpop.eup %3575  ;;  %v1310_v18 = vmul.f32 1.442695, %v1295_v60 }
 0x705   : > { %v1327_v44 = vsel %vm713_vm12, %v4682_v5, 0.0  ;;  %v4689_v32 = vpop.eup %3577 }
 0x706   : > { %1322 = vadd.xlane.f32.xlu2 %v1321_v36  ;;  %3581 = vpow2.f32 %v1310_v18  ;;  %v1330_v62 = vsel %vm713_vm12, %v4689_v32, 0.0  ;;  %v4693_v11 = vpop.eup %3579 }
 0x707   : > { %v1324_v49 = vsel %vm713_vm12, %v4693_v11, 0.0 }
 0x70a   : > { %1328 = vadd.xlane.f32.xlu0 %v1327_v44  ;;  %v2172_v44 = vrot.slane %v4639_v54, 4 }
 0x70c   : > { %v4699_v53 = vpop.eup %3581 }
 0x70d   : > { %v1333_v55 = vsel %vm713_vm12, %v4699_v53, 0.0 }
 0x70e   : > { %1739 = vadd.xlane.f32.xlu2 %v1738_v33  ;;  %v2213_v33 = vrot.slane %v4641_v63, 4 }
 0x712   : > { %1331 = vadd.xlane.f32.xlu0 %v1330_v62  ;;  %v2173_v62 = vadd.f32 %v2172_v44, %v4639_v54 }
 0x714   : > { %v3455_v43 = vpop.permute.xlu0 %3454 }
 0x715   : > { %3464 = vrot.lane.b32.xlu1 %v4009_v2, %s3729_s20  ;;  %v3456_v30 = vunpack.i.l.bf16 %v3455_v43  ;;  %v3457_v58 = vunpack.i.h.bf16 %v3455_v43 }
 0x716   : > { %1325 = vadd.xlane.f32.xlu2 %v1324_v49 }
 0x717   : > { %1547 = vmatpush.msrb.mxu0 %v3456_v30  ;;  %v2214_v30 = vadd.f32 %v2213_v33, %v4641_v63 }
 0x719   : > { %1548 = vmatpush.msrb.mxu0 %v3457_v58  ;;  %v2174_v58 = vrot.slane %v2173_v62, 2 }
 0x71a   : > { %1334 = vadd.xlane.f32.xlu0 %v1333_v55 }
 0x72e   : > { %3474 = vrot.lane.b32.xlu2 %v3997_v0, %s3730_s21  ;;  %3469 = vrot.lane.b32.xlu0 %v3997_v0, %s3731_s22 }
 0x736   : > { %3479 = vrot.lane.b32.xlu0 %v3975_v35, %s3731_s22 }
 0x73f   : > { %v1699_v31 = vpop.xlane.xlu0 %1698 }
 0x740   : > { %v1700_v7 = vrot.slane %v1699_v31, 4 }
 0x742   : > { %v1701_v59 = vadd.f32 %v1700_v7, %v1699_v31 }
 0x744   : > { %v1702_v3 = vrot.slane %v1701_v59, 2 }
 0x745   : > { %v1314_v21 = vpop.xlane.xlu1 %1313 }
 0x746   : > { %v1703_v10 = vadd.f32 %v1702_v3, %v1701_v59  ;;  %3583 = vrcp.f32 %v1314_v21  ;;  %v2215_v3 = vrot.slane %v2214_v30, 2  ;;  %vm1341_vm6 = vweird.f32 %v1314_v21 }
 0x748   : > { %v1704_v41 = vrot.slane %v1703_v10, 1  ;;  %v2216_v33 = vadd.f32 %v2215_v3, %v2214_v30 }
 0x74a   : > { %v1705_v39 = vadd.f32 %v1704_v41, %v1703_v10  ;;  %v1347_v10 = vand.u32 2147483648, %v1314_v21 }
 0x74c   : > { %3396 = vpush %v1705_v39  ;;  %v3584_v60 = vpop.eup %3583  ;;  %v1345_v39 = vand.u32 2147483647, %v1314_v21  ;;  %v1348_v44 = vor.u32 1.1754944e-38, %v1347_v10 }
 0x74d   : > { %v1337_v46 = vmul.f32 %v3584_v60, %v1314_v21  ;;  %vm1342_vm5 = vweird.f32 %v3584_v60 }
 0x74e   : > { %vm1343_vm7 = vmor %vm1341_vm6, %vm1342_vm5  ;;  %vm1346_vm8 = vcmp.eq.f32.partialorder %v1345_v39, 8.507059e+37 }
 0x74f   : > { %v1338_v50 = vsub.f32 1.0, %v1337_v46  ;;  %v2175_v46 = vadd.f32 %v2174_v58, %v2173_v62  ;;  %v2217_v58 = vrot.slane %v2216_v33, 1 }
 0x751   : > { %v1339_v43 = vmul.f32 %v3584_v60, %v1338_v50  ;;  %v2176_v25 = vrot.slane %v2175_v46, 1 }
 0x752   : > { %v3460_v19 = vpop.permute.xlu0 %3459 }
 0x753   : > { %v3461_v36 = vunpack.i.l.bf16 %v3460_v19  ;;  %v3462_v4 = vunpack.i.h.bf16 %v3460_v19  ;;  %v1340_v55 = vadd.f32 %v3584_v60, %v1339_v43 }
 0x755   : > { %1549 = vmatpush.msrb.mxu0 %v3461_v36 }
 0x757   : > { %1550 = vmatpush.msrb.mxu0 %v3462_v4  ;;  %v1344_v4 = vsel %vm1343_vm7, %v3584_v60, %v1340_v55 }
 0x758   : > { %v1349_v21 = vsel %vm1346_vm8, %v1348_v44, %v1344_v4 }
 0x759   : > { %v4742_v55 = vmul.f32 %v4633_v57, %v1349_v21 }
 0x76f   : > { %v4709_v8 = vpop.xlane.xlu1 %1316 }
 0x770   : > { %3585 = vrcp.f32 %v4709_v8  ;;  %v1362_v60 = vand.u32 2147483648, %v4709_v8  ;;  %vm1356_vm10 = vweird.f32 %v4709_v8  ;;  %v1360_v3 = vand.u32 2147483647, %v4709_v8 }
 0x771   : > { %v4711_v0 = vpop.xlane.xlu2 %1319 }
 0x772   : > { %3587 = vrcp.f32 %v4711_v0  ;;  %v1363_v57 = vor.u32 1.1754944e-38, %v1362_v60  ;;  %vm1361_vm14 = vcmp.eq.f32.partialorder %v1360_v3, 8.507059e+37  ;;  %vm1371_vm1 = vweird.f32 %v4711_v0 }
 0x776   : > { %v4717_v18 = vpop.eup %3585 }
 0x777   : > { %v1352_v49 = vmul.f32 %v4717_v18, %v4709_v8  ;;  %vm1357_vm9 = vweird.f32 %v4717_v18  ;;  %v2218_v8 = vadd.f32 %v2217_v58, %v2216_v33  ;;  %v1375_v33 = vand.u32 2147483647, %v4711_v0 }
 0x778   : > { %v4725_v59 = vpop.eup %3587  ;;  %vm1358_vm13 = vmor %vm1356_vm10, %vm1357_vm9 }
 0x779   : > { %v4715_v22 = vpop.xlane.xlu2 %1322  ;;  %v1353_v31 = vsub.f32 1.0, %v1352_v49  ;;  %v1367_v36 = vmul.f32 %v4725_v59, %v4711_v0  ;;  %vm1372_vm15 = vweird.f32 %v4725_v59  ;;  %vm1376_vm3 = vcmp.eq.f32.partialorder %v1375_v33, 8.507059e+37 }
 0x77a   : > { %3589 = vrcp.f32 %v4715_v22  ;;  %vm1373_vm2 = vmor %vm1371_vm1, %vm1372_vm15  ;;  %v1392_v3 = vand.u32 2147483648, %v4715_v22  ;;  %vm1386_vm5 = vweird.f32 %v4715_v22 }
 0x77b   : > { %v1354_v63 = vmul.f32 %v4717_v18, %v1353_v31  ;;  %v1368_v56 = vsub.f32 1.0, %v1367_v36 }
 0x77d   : > { %v4728_v54 = vpop.xlane.xlu0 %1328  ;;  %s3397_s30 = spop %3396 }
 0x77e   : > { %vm1416_vm15 = vweird.f32 %v4728_v54  ;;  %s1715_s23 = smul.f32 %s3397_s30, %s4198_s15 }
 0x780   : > { %v4737_v31 = vpop.eup %3589 }
 0x781   : > { %v1740_v7 = vpop.xlane.xlu2 %1739  ;;  %v1382_v39 = vmul.f32 %v4737_v31, %v4715_v22  ;;  %vm1387_vm4 = vweird.f32 %v4737_v31 }
 0x782   : > { %v1741_v41 = vrot.slane %v1740_v7, 4  ;;  %vm1388_vm6 = vmor %vm1386_vm5, %vm1387_vm4 }
 0x783   : > { %v1383_v4 = vsub.f32 1.0, %v1382_v39 }
 0x784   : > { %v1742_v19 = vadd.f32 %v1741_v41, %v1740_v7  ;;  %v1355_v7 = vadd.f32 %v4717_v18, %v1354_v63  ;;  %v1369_v41 = vmul.f32 %v4725_v59, %v1368_v56 }
 0x785   : > { %v4752_v36 = vpop.xlane.xlu0 %1331 }
 0x786   : > { %v1743_v50 = vrot.slane %v1742_v19, 2  ;;  %v1359_v63 = vsel %vm1358_vm13, %v4717_v18, %v1355_v7  ;;  %v1370_v44 = vadd.f32 %v4725_v59, %v1369_v41  ;;  %vm1431_vm4 = vweird.f32 %v4752_v36 }
 0x787   : > { %v3465_v43 = vpop.permute.xlu1 %3464 }
 0x788   : > { %v3466_v49 = vunpack.i.l.bf16 %v3465_v43  ;;  %v1744_v20 = vadd.f32 %v1743_v50, %v1742_v19  ;;  %v3467_v62 = vunpack.i.h.bf16 %v3465_v43  ;;  %v2177_v19 = vadd.f32 %v2176_v25, %v2175_v46 }
 0x789   : > { %v4733_v15 = vpop.xlane.xlu2 %1325  ;;  %v1377_v25 = vand.u32 2147483648, %v4711_v0  ;;  %v1374_v7 = vsel %vm1373_vm2, %v4725_v59, %v1370_v44  ;;  %v1390_v59 = vand.u32 2147483647, %v4715_v22 }
 0x78a   : > { %1551 = vmatpush.msrb.mxu0 %v3466_v49  ;;  %v1745_v30 = vrot.slane %v1744_v20, 1  ;;  %3591 = vrcp.f32 %v4733_v15  ;;  %v1384_v49 = vmul.f32 %v4737_v31, %v1383_v4  ;;  %vm1401_vm9 = vweird.f32 %v4733_v15 }
 0x78b   : > { %3593 = vrcp.f32 %v4728_v54  ;;  %v1378_v60 = vor.u32 1.1754944e-38, %v1377_v25  ;;  %vm1391_vm7 = vcmp.eq.f32.partialorder %v1390_v59, 8.507059e+37 }
 0x78c   : > { %1552 = vmatpush.msrb.mxu0 %v3467_v62  ;;  %v1746_v10 = vadd.f32 %v1745_v30, %v1744_v20  ;;  %v1364_v20 = vsel %vm1361_vm14, %v1363_v57, %v1359_v63  ;;  %v1385_v30 = vadd.f32 %v4737_v31, %v1384_v49  ;;  %3595 = vrcp.f32 %v4752_v36 }
 0x78d   : > { %3303 = vmatmul.msk.f32.vlgmr.msrb.gmra.mxu0 %vm713_vm12, %v4742_v55  ;;  %v4759_v18 = vmul.f32 %v4647_v38, %v1364_v20  ;;  %v4768_v38 = vpop.xlane.xlu0 %1334  ;;  %v1379_v0 = vsel %vm1376_vm3, %v1378_v60, %v1374_v7  ;;  %v1393_v63 = vor.u32 1.1754944e-38, %v1392_v3 }
 0x78e   : > { %3398 = vpush %v1746_v10  ;;  %v4775_v10 = vmul.f32 %v4656_v12, %v1379_v0  ;;  %3597 = vrcp.f32 %v4768_v38 }
 0x78f   : > { %3400 = vpush %v2177_v19  ;;  %v1389_v19 = vsel %vm1388_vm6, %v4737_v31, %v1385_v30  ;;  %v1405_v31 = vand.u32 2147483647, %v4733_v15 }
 0x790   : > { %3402 = vpush %v2218_v8  ;;  %v3592_v50 = vpop.eup %3591  ;;  %v1394_v8 = vsel %vm1391_vm7, %v1393_v63, %v1389_v19 }
 0x791   : > { %v3475_v56 = vpop.permute.xlu2 %3474  ;;  %v1397_v21 = vmul.f32 %v3592_v50, %v4733_v15  ;;  %v3594_v58 = vpop.eup %3593  ;;  %vm1402_vm8 = vweird.f32 %v3592_v50  ;;  %v4786_v44 = vmul.f32 %v4671_v52, %v1394_v8  ;;  %vm1406_vm13 = vcmp.eq.f32.partialorder %v1405_v31, 8.507059e+37 }
 0x792   : > { %v3476_v46 = vunpack.i.l.bf16 %v3475_v56  ;;  %v3477_v43 = vunpack.i.h.bf16 %v3475_v56  ;;  %v1412_v41 = vmul.f32 %v3594_v58, %v4728_v54  ;;  %v3596_v22 = vpop.eup %3595  ;;  %v1407_v56 = vand.u32 2147483648, %v4733_v15  ;;  %vm1403_vm10 = vmor %vm1401_vm9, %vm1402_vm8 }
 0x793   : > { %v1398_v62 = vsub.f32 1.0, %v1397_v21  ;;  %v1427_v33 = vmul.f32 %v3596_v22, %v4752_v36  ;;  %vm1417_vm14 = vweird.f32 %v3594_v58  ;;  %vm1432_vm3 = vweird.f32 %v3596_v22 }
 0x794   : > { %2513 = vmatpush.msra.mxu0 %v3476_v46  ;;  %v1413_v20 = vsub.f32 1.0, %v1412_v41  ;;  %v1408_v49 = vor.u32 1.1754944e-38, %v1407_v56  ;;  %v3598_v15 = vpop.eup %3597  ;;  %vm1418_vm1 = vmor %vm1416_vm15, %vm1417_vm14  ;;  %v1452_v31 = vand.u32 2147483648, %v4768_v38  ;;  %vm1446_vm8 = vweird.f32 %v4768_v38 }
 0x795   : > { %3304 = vmatmul.msk.f32.gmra.mxu0 %vm713_vm12, %v4759_v18  ;;  %v1399_v39 = vmul.f32 %v3592_v50, %v1398_v62  ;;  %v1428_v52 = vsub.f32 1.0, %v1427_v33  ;;  %v1422_v62 = vand.u32 2147483648, %v4728_v54  ;;  %v1442_v41 = vmul.f32 %v3598_v15, %v4768_v38  ;;  %vm1433_vm5 = vmor %vm1431_vm4, %vm1432_vm3 }
 0x796   : > { %2514 = vmatpush.msra.mxu0 %v3477_v43  ;;  %v1414_v46 = vmul.f32 %v3594_v58, %v1413_v20  ;;  %v1435_v20 = vand.u32 2147483647, %v4752_v36  ;;  %vm1447_vm7 = vweird.f32 %v3598_v15 }
 0x797   : > { %v1400_v4 = vadd.f32 %v3592_v50, %v1399_v39  ;;  %v1429_v59 = vmul.f32 %v3596_v22, %v1428_v52  ;;  %v1423_v19 = vor.u32 1.1754944e-38, %v1422_v62  ;;  %vm1448_vm9 = vmor %vm1446_vm8, %vm1447_vm7 }
 0x798   : > { %v1415_v0 = vadd.f32 %v3594_v58, %v1414_v46  ;;  %vm1436_vm6 = vcmp.eq.f32.partialorder %v1435_v20, 8.507059e+37  ;;  %v1453_v46 = vor.u32 1.1754944e-38, %v1452_v31 }
 0x799   : > { %v1404_v43 = vsel %vm1403_vm10, %v3592_v50, %v1400_v4  ;;  %v1420_v50 = vand.u32 2147483647, %v4728_v54  ;;  %v1430_v8 = vadd.f32 %v3596_v22, %v1429_v59 }
 0x79a   : > { %v1409_v7 = vsel %vm1406_vm13, %v1408_v49, %v1404_v43  ;;  %v1419_v39 = vsel %vm1418_vm1, %v3594_v58, %v1415_v0 }
 0x79b   : > { %v4796_v30 = vmul.f32 %v4693_v11, %v1409_v7  ;;  %vm1421_vm2 = vcmp.eq.f32.partialorder %v1420_v50, 8.507059e+37  ;;  %v1437_v11 = vand.u32 2147483648, %v4752_v36  ;;  %v1434_v58 = vsel %vm1433_vm5, %v3596_v22, %v1430_v8 }
 0x79c   : > { %v1424_v63 = vsel %vm1421_vm2, %v1423_v19, %v1419_v39  ;;  %v1450_v36 = vand.u32 2147483647, %v4768_v38 }
 0x79d   : > { %3305 = vmatmul.msk.f32.gmra.mxu0 %vm713_vm12, %v4775_v10  ;;  %v4805_v54 = vmul.f32 %v4682_v5, %v1424_v63  ;;  %v1438_v4 = vor.u32 1.1754944e-38, %v1437_v11 }
 0x79e   : > { %vm1451_vm10 = vcmp.eq.f32.partialorder %v1450_v36, 8.507059e+37 }
 0x79f   : > { %v1439_v56 = vsel %vm1436_vm6, %v1438_v4, %v1434_v58 }
 0x7a0   : > { %v3470_v57 = vpop.permute.xlu0 %3469  ;;  %v4813_v5 = vmul.f32 %v4689_v32, %v1439_v56 }
 0x7a1   : > { %v3471_v12 = vunpack.i.l.bf16 %v3470_v57  ;;  %v3472_v25 = vunpack.i.h.bf16 %v3470_v57  ;;  %v1443_v57 = vsub.f32 1.0, %v1442_v41 }
 0x7a3   : > { %2017 = vmatpush.msrb.mxu1 %v3471_v12  ;;  %v1444_v12 = vmul.f32 %v3598_v15, %v1443_v57 }
 0x7a5   : > { %3306 = vmatmul.msk.f32.gmra.mxu0 %vm713_vm12, %v4786_v44  ;;  %2018 = vmatpush.msrb.mxu1 %v3472_v25  ;;  %v1445_v25 = vadd.f32 %v3598_v15, %v1444_v12 }
 0x7a7   : > { %v1449_v22 = vsel %vm1448_vm9, %v3598_v15, %v1445_v25 }
 0x7a8   : > { %v3480_v21 = vpop.permute.xlu0 %3479  ;;  %v1454_v33 = vsel %vm1451_vm10, %v1453_v46, %v1449_v22 }
 0x7a9   : > { %v3481_v60 = vunpack.i.l.bf16 %v3480_v21  ;;  %v3482_v3 = vunpack.i.h.bf16 %v3480_v21  ;;  %v4823_v32 = vmul.f32 %v4699_v53, %v1454_v33 }
 0x7ab   : > { %2019 = vmatpush.msrb.mxu1 %v3481_v60 }
 0x7ad   : > { %3307 = vmatmul.msk.f32.gmra.mxu0 %vm713_vm12, %v4796_v30  ;;  %2020 = vmatpush.msrb.mxu1 %v3482_v3 }
 0x7b5   : > { %3308 = vmatmul.msk.f32.gmra.mxu0 %vm713_vm12, %v4805_v54 }
 0x7bd   : > { %3309 = vmatmul.msk.f32.gmra.mxu0 %vm713_vm12, %v4813_v5 }
 0x7bf   : > { %s3399_s24 = spop %3398 }
 0x7c0   : > { %s1748_s11 = sadd.f32 %s3399_s24, %s4196_s26  ;;  %s3401_s12 = spop %3400 }
 0x7c1   : > { %s2187_s13 = smul.f32 %s3401_s12, %s4198_s15  ;;  %s3403_s14 = spop %3402 }
 0x7c2   : > { %p1749_p6 = scmp.gt.f32.partialorder %s1715_s23, %s1748_s11  ;;  %s2220_s16 = sadd.f32 %s3403_s14, %s4196_s26 }
 0x7c3   : > { %s3732_s26 = smov 8   ;;  %s3733_s15 = smov 16  }
 0x7c4   : > { %s1750_s17 = scalar_select %p1749_p6, 1, 0 }
 0x7c5   : > { %p2221_p7 = scmp.gt.f32.partialorder %s2187_s13, %s2220_s16  ;;  %3310 = vmatmul.msk.f32.gmra.mxu0 %vm713_vm12, %v4823_v32  ;;  %s313_s12 = scalar_lea.vmem %s5567_s7, %s3377_s29 }
 0x7c6   : > { %s1751_s18 = scvt.s32.f32 %s1750_s17 }
 0x7c7   : > { %s2222_s19 = scalar_select %p2221_p7, 1, 0 }
 0x7c8   : > { %v1752_v38 = vstv %s1751_s18 }
 0x7c9   : > { %s2223_s20 = scvt.s32.f32 %s2222_s19  ;;  %v4828_v43 = vmul.f32 %v1752_v38, %v4602_v47  ;;  %v4831_v49 = vmul.f32 %v1752_v38, %v4594_v13  ;;  %v1753_v21 = vmul.f32 %v1752_v38, %v4580_v6  ;;  %v4850_v50 = vmul.f32 %v1752_v38, %v4604_v14 }
 0x7ca   : > { %v4871_v19 = vmul.f32 %v1752_v38, %v4610_v40  ;;  %v4881_v57 = vmul.f32 %v1752_v38, %v4612_v45 }
 0x7cb   : > { %v1767_v53 = vsel %vm713_vm12, %v4828_v43, -inf  ;;  %v1764_v7 = vsel %vm713_vm12, %v4831_v49, -inf  ;;  %v1761_v52 = vsel %vm713_vm12, %v1753_v21, -inf  ;;  %v2224_v60 = vstv %s2223_s20 }
 0x7cc   : > { %1768 = vmax.xlane.f32.xlu2 %v1767_v53  ;;  %1765 = vmax.xlane.f32.xlu0 %v1764_v7  ;;  %v4840_v47 = vmul.f32 %v2224_v60, %v4457_v1  ;;  %v2227_v13 = vmul.f32 %v2224_v60, %v4447_v51  ;;  %v2225_v0 = vmul.f32 %v2224_v60, %v4437_v48  ;;  %v1770_v51 = vsel %vm713_vm12, %v4850_v50, -inf }
 0x7cd   : > { %1762 = vmax.xlane.f32.xlu1 %v1761_v52  ;;  %v2229_v3 = vmul.f32 %v2224_v60, %v4467_v9  ;;  %v4853_v1 = vmul.f32 %v2224_v60, %v4441_v24  ;;  %v2230_v41 = vmul.f32 %v2224_v60, %v4475_v23  ;;  %v4862_v9 = vmul.f32 %v1752_v38, %v4608_v16 }
 0x7ce   : > { %v2242_v6 = vsel %vm713_vm12, %v4840_v47, -inf  ;;  %v2239_v15 = vsel %vm713_vm12, %v2227_v13, -inf  ;;  %v2233_v62 = vsel %vm713_vm12, %v2225_v0, -inf  ;;  %v4868_v39 = vmul.f32 %v2224_v60, %v4527_v34 }
 0x7cf   : > { %v2245_v48 = vsel %vm713_vm12, %v2229_v3, -inf  ;;  %v2236_v59 = vsel %vm713_vm12, %v4853_v1, -inf  ;;  %v2248_v14 = vsel %vm713_vm12, %v2230_v41, -inf  ;;  %v1773_v24 = vsel %vm713_vm12, %v4862_v9, -inf }
 0x7d0   : > { %v2251_v63 = vsel %vm713_vm12, %v4868_v39, -inf  ;;  %v1776_v23 = vsel %vm713_vm12, %v4871_v19, -inf  ;;  %v4878_v16 = vmul.f32 %v1752_v38, %v4626_v27  ;;  %v1779_v40 = vsel %vm713_vm12, %v4881_v57, -inf }
 0x7d1   : > { %v4888_v8 = vmul.f32 %v2224_v60, %v4555_v29 }
 0x7d2   : > { %v1782_v34 = vsel %vm713_vm12, %v4878_v16, -inf }
 0x7d3   : > { %v2254_v11 = vsel %vm713_vm12, %v4888_v8, -inf }
 0x7d4   : > { %2243 = vmax.xlane.f32.xlu2 %v2242_v6  ;;  %2240 = vmax.xlane.f32.xlu0 %v2239_v15 }
 0x7d5   : > { %2234 = vmax.xlane.f32.xlu1 %v2233_v62 }
 0x7dc   : > { %2246 = vmax.xlane.f32.xlu2 %v2245_v48  ;;  %1771 = vmax.xlane.f32.xlu0 %v1770_v51 }
 0x7dd   : > { %2237 = vmax.xlane.f32.xlu1 %v2236_v59 }
 0x7e4   : > { %2249 = vmax.xlane.f32.xlu2 %v2248_v14 }
 0x7e5   : > { %1774 = vmax.xlane.f32.xlu1 %v1773_v24 }
 0x7ec   : > { %2252 = vmax.xlane.f32.xlu2 %v2251_v63 }
 0x7ed   : > { %1777 = vmax.xlane.f32.xlu1 %v1776_v23 }
 0x7f4   : > { %1783 = vmax.xlane.f32.xlu2 %v1782_v34 }
 0x7f5   : > { %1780 = vmax.xlane.f32.xlu1 %v1779_v40 }
 0x7fd   : > { %2255 = vmax.xlane.f32.xlu1 %v2254_v11 }
 0x80c   : > { %3494 = vrot.lane.b32.xlu2 %v3982_v42, %s3730_s21 }
 0x814   : > { %3499 = vrot.lane.b32.xlu2 %v4009_v2, %s3731_s22 }
 0x816   : > { %3489 = vrot.lane.b32.xlu1 %v3982_v42, %s3731_s22 }
 0x83f   : > { %v4898_v45 = vpop.xlane.xlu2 %1768  ;;  %v1766_v27 = vpop.xlane.xlu0 %1765 }
 0x840   : > { %v1763_v20 = vpop.xlane.xlu1 %1762  ;;  %v1786_v46 = vsub.f32 %v4831_v49, %v1766_v27 }
 0x841   : > { %v1785_v12 = vsub.f32 %v1753_v21, %v1763_v20 }
 0x842   : > { %v1795_v38 = vmul.f32 1.442695, %v1786_v46 }
 0x843   : > { %v1793_v29 = vmul.f32 1.442695, %v1785_v12 }
 0x845   : > { %3599 = vpow2.f32 %v1793_v29 }
 0x847   : > { %v4900_v58 = vpop.xlane.xlu2 %2243  ;;  %v2241_v4 = vpop.xlane.xlu0 %2240 }
 0x848   : > { %v2235_v56 = vpop.xlane.xlu1 %2234  ;;  %v2259_v25 = vsub.f32 %v2227_v13, %v2241_v4 }
 0x849   : > { %v2257_v31 = vsub.f32 %v2225_v0, %v2235_v56  ;;  %v1787_v56 = vsub.f32 %v4828_v43, %v4898_v45 }
 0x84a   : > { %v2269_v36 = vmul.f32 1.442695, %v2259_v25 }
 0x84b   : > { %v4902_v22 = vpop.eup %3599  ;;  %v2265_v33 = vmul.f32 1.442695, %v2257_v31  ;;  %v1797_v25 = vmul.f32 1.442695, %v1787_v56 }
 0x84c   : > { %v1809_v42 = vsel %vm713_vm12, %v4902_v22, 0.0 }
 0x84d   : > { %3601 = vpow2.f32 %v2265_v33  ;;  %1810 = vadd.xlane.f32.xlu0 %v1809_v42 }
 0x84e   : > { %3603 = vpow2.f32 %v2269_v36  ;;  %v2260_v36 = vsub.f32 %v4840_v47, %v4900_v58 }
 0x84f   : > { %v2247_v21 = vpop.xlane.xlu2 %2246  ;;  %3605 = vpow2.f32 %v1795_v38 }
 0x850   : > { %v2261_v53 = vsub.f32 %v2229_v3, %v2247_v21  ;;  %v2238_v7 = vpop.xlane.xlu1 %2237  ;;  %v2271_v46 = vmul.f32 1.442695, %v2260_v36 }
 0x851   : > { %v2258_v13 = vsub.f32 %v4853_v1, %v2238_v7 }
 0x852   : > { %v2273_v52 = vmul.f32 1.442695, %v2261_v53 }
 0x853   : > { %v4907_v60 = vpop.eup %3601  ;;  %v2267_v15 = vmul.f32 1.442695, %v2258_v13  ;;  %v1772_v13 = vpop.xlane.xlu0 %1771 }
 0x854   : > { %v4910_v0 = vpop.eup %3603  ;;  %3607 = vpow2.f32 %v2273_v52  ;;  %v2281_v49 = vsel %vm713_vm12, %v4907_v60, 0.0 }
 0x855   : > { %2282 = vadd.xlane.f32.xlu1 %v2281_v49  ;;  %v2287_v6 = vsel %vm713_vm12, %v4910_v0, 0.0  ;;  %v4916_v48 = vpop.eup %3605  ;;  %3609 = vpow2.f32 %v2267_v15 }
 0x856   : > { %2288 = vadd.xlane.f32.xlu2 %v2287_v6  ;;  %v1812_v14 = vsel %vm713_vm12, %v4916_v48, 0.0  ;;  %v1788_v6 = vsub.f32 %v4850_v50, %v1772_v13 }
 0x857   : > { %v2250_v62 = vpop.xlane.xlu2 %2249 }
 0x858   : > { %v2262_v3 = vsub.f32 %v2230_v41, %v2250_v62  ;;  %v1775_v23 = vpop.xlane.xlu1 %1774 }
 0x859   : > { %v1789_v38 = vsub.f32 %v4862_v9, %v1775_v23 }
 0x85a   : > { %v4918_v51 = vpop.eup %3607  ;;  %v2275_v59 = vmul.f32 1.442695, %v2262_v3  ;;  %v1799_v3 = vmul.f32 1.442695, %v1788_v6 }
 0x85b   : > { %v2293_v1 = vsel %vm713_vm12, %v4918_v51, 0.0  ;;  %v4924_v63 = vpop.eup %3609  ;;  %v1801_v53 = vmul.f32 1.442695, %v1789_v38 }
 0x85c   : > { %3611 = vpow2.f32 %v2275_v59  ;;  %v2284_v40 = vsel %vm713_vm12, %v4924_v63, 0.0 }
 0x85d   : > { %1813 = vadd.xlane.f32.xlu1 %v1812_v14 }
 0x85e   : > { %2294 = vadd.xlane.f32.xlu2 %v2293_v1 }
 0x85f   : > { %v2253_v24 = vpop.xlane.xlu2 %2252 }
 0x860   : > { %v1778_v12 = vpop.xlane.xlu1 %1777  ;;  %v2263_v1 = vsub.f32 %v4868_v39, %v2253_v24 }
 0x861   : > { %3484 = vrot.lane.b32.xlu0 %v3975_v35, %s3730_s21  ;;  %v1790_v58 = vsub.f32 %v4871_v19, %v1778_v12 }
 0x862   : > { %v4928_v41 = vpop.eup %3611  ;;  %v2277_v50 = vmul.f32 1.442695, %v2263_v1 }
 0x863   : > { %v2296_v34 = vsel %vm713_vm12, %v4928_v41, 0.0  ;;  %v1803_v49 = vmul.f32 1.442695, %v1790_v58 }
 0x865   : > { %2285 = vadd.xlane.f32.xlu1 %v2284_v40 }
 0x866   : > { %2297 = vadd.xlane.f32.xlu2 %v2296_v34 }
 0x867   : > { %v1784_v11 = vpop.xlane.xlu2 %1783 }
 0x868   : > { %v1792_v27 = vsub.f32 %v4878_v16, %v1784_v11  ;;  %v1781_v4 = vpop.xlane.xlu1 %1780 }
 0x869   : > { %v1791_v62 = vsub.f32 %v4881_v57, %v1781_v4 }
 0x86a   : > { %v1807_v20 = vmul.f32 1.442695, %v1792_v27 }
 0x86b   : > { %v1805_v19 = vmul.f32 1.442695, %v1791_v62 }
 0x86c   : > { %3613 = vpow2.f32 %v1807_v20 }
 0x86d   : > { %3615 = vpow2.f32 %v1797_v25 }
 0x86e   : > { %3617 = vpow2.f32 %v2271_v46 }
 0x86f   : > { %v4943_v31 = vpop.permute.xlu2 %3494  ;;  %3619 = vpow2.f32 %v1801_v53 }
 0x870   : > { %v2256_v16 = vpop.xlane.xlu1 %2255  ;;  %3621 = vpow2.f32 %v1803_v49 }
 0x871   : > { %3623 = vpow2.f32 %v1799_v3  ;;  %v2264_v23 = vsub.f32 %v4888_v8, %v2256_v16 }
 0x872   : > { %v4935_v29 = vpop.eup %3613  ;;  %3625 = vpow2.f32 %v1805_v19  ;;  %v3496_v19 = vunpack.i.l.bf16 %v4943_v31 }
 0x873   : > { %v1830_v35 = vsel %vm713_vm12, %v4935_v29, 0.0  ;;  %v4947_v33 = vpop.eup %3615  ;;  %v2279_v40 = vmul.f32 1.442695, %v2264_v23  ;;  %3627 = vpow2.f32 %v2277_v50  ;;  %v3497_v23 = vunpack.i.h.bf16 %v4943_v31 }
 0x874   : > { %1831 = vadd.xlane.f32.xlu2 %v1830_v35  ;;  %v1815_v45 = vsel %vm713_vm12, %v4947_v33, 0.0  ;;  %v4952_v52 = vpop.eup %3617  ;;  %v1554_v35 = vpop.f32.mrf.mxu0 }
 0x875   : > { %v2290_v9 = vsel %vm713_vm12, %v4952_v52, 0.0  ;;  %v4958_v15 = vpop.eup %3619  ;;  %3629 = vpow2.f32 %v2279_v40 }
 0x876   : > { %v1821_v59 = vsel %vm713_vm12, %v4958_v15, 0.0  ;;  %v4964_v14 = vpop.eup %3621 }
 0x877   : > { %v3500_v43 = vpop.permute.xlu2 %3499  ;;  %v1824_v34 = vsel %vm713_vm12, %v4964_v14, 0.0  ;;  %v4969_v57 = vpop.eup %3623 }
 0x878   : > { %v3501_v7 = vunpack.i.l.bf16 %v3500_v43  ;;  %v3502_v47 = vunpack.i.h.bf16 %v3500_v43  ;;  %v4971_v11 = vpop.eup %3625  ;;  %v1818_v27 = vsel %vm713_vm12, %v4969_v57, 0.0 }
 0x879   : > { %v1827_v39 = vsel %vm713_vm12, %v4971_v11, 0.0  ;;  %v4977_v8 = vpop.eup %3627 }
 0x87a   : > { %v2299_v20 = vsel %vm713_vm12, %v4977_v8, 0.0 }
 0x87b   : > { %v4979_v24 = vpop.eup %3629 }
 0x87c   : > { %v2302_v12 = vsel %vm713_vm12, %v4979_v24, 0.0  ;;  %v1557_v56 = vpop.f32.mrf.mxu0 }
 0x87e   : > { %3504 = vrot.lane.b32.xlu1 %v4009_v2, %s3730_s21  ;;  %s3734_s21 = smov 24  }
 0x884   : > { %v1560_v43 = vpop.f32.mrf.mxu0 }
 0x888   : > { %v3490_v42 = vpop.permute.xlu1 %3489 }
 0x889   : > { %v3491_v21 = vunpack.i.l.bf16 %v3490_v42  ;;  %v3492_v2 = vunpack.i.h.bf16 %v3490_v42 }
 0x88b   : > { %1816 = vadd.xlane.f32.xlu0 %v1815_v45  ;;  %2021 = vmatpush.msrb.mxu1 %v3491_v21 }
 0x88d   : > { %2022 = vmatpush.msrb.mxu1 %v3492_v2 }
 0x88f   : > { %2023 = vmatpush.msrb.mxu1 %v3501_v7 }
 0x891   : > { %2024 = vmatpush.msrb.mxu1 %v3502_v47 }
 0x893   : > { %2291 = vadd.xlane.f32.xlu0 %v2290_v9 }
 0x89b   : > { %1822 = vadd.xlane.f32.xlu0 %v1821_v59  ;;  %v1563_v59 = vpop.f32.mrf.mxu0 }
 0x8a3   : > { %1825 = vadd.xlane.f32.xlu0 %v1824_v34 }
 0x8a8   : > { %1819 = vadd.xlane.f32.xlu1 %v1818_v27 }
 0x8ab   : > { %1828 = vadd.xlane.f32.xlu0 %v1827_v39 }
 0x8b0   : > { %2300 = vadd.xlane.f32.xlu1 %v2299_v20 }
 0x8b3   : > { %2303 = vadd.xlane.f32.xlu0 %v2302_v12 }
 0x8c0   : > { %v1811_v4 = vpop.xlane.xlu0 %1810 }
 0x8c1   : > { %3631 = vrcp.f32 %v1811_v4  ;;  %v1844_v21 = vand.u32 2147483648, %v1811_v4  ;;  %vm1838_vm14 = vweird.f32 %v1811_v4  ;;  %v1842_v2 = vand.u32 2147483647, %v1811_v4 }
 0x8c3   : > { %v1845_v47 = vor.u32 1.1754944e-38, %v1844_v21  ;;  %vm1843_vm1 = vcmp.eq.f32.partialorder %v1842_v2, 8.507059e+37 }
 0x8c7   : > { %v3632_v25 = vpop.eup %3631 }
 0x8c8   : > { %v1834_v16 = vmul.f32 %v3632_v25, %v1811_v4  ;;  %v4985_v36 = vpop.xlane.xlu1 %2282  ;;  %vm1839_vm13 = vweird.f32 %v3632_v25 }
 0x8c9   : > { %2554 = vrot.lane.b32.xlu1 %v1554_v35, %s3732_s26  ;;  %v4988_v42 = vpop.xlane.xlu2 %2288  ;;  %vm1840_vm15 = vmor %vm1838_vm14, %vm1839_vm13  ;;  %vm2310_vm7 = vweird.f32 %v4985_v36 }
 0x8ca   : > { %v1835_v46 = vsub.f32 1.0, %v1834_v16 }
 0x8cc   : > { %v1836_v38 = vmul.f32 %v3632_v25, %v1835_v46 }
 0x8ce   : > { %v1837_v45 = vadd.f32 %v3632_v25, %v1836_v38 }
 0x8d0   : > { %v1814_v53 = vpop.xlane.xlu1 %1813  ;;  %v1841_v7 = vsel %vm1840_vm15, %v3632_v25, %v1837_v45  ;;  %v1566_v25 = vpop.f32.mrf.mxu0 }
 0x8d1   : > { %3633 = vrcp.f32 %v1814_v53  ;;  %2556 = vrot.lane.b32.xlu1 %v1557_v56, %s3732_s26  ;;  %v1846_v9 = vsel %vm1843_vm1, %v1845_v47, %v1841_v7  ;;  %v4992_v49 = vpop.xlane.xlu2 %2294  ;;  %v1859_v40 = vand.u32 2147483648, %v1814_v53  ;;  %v1857_v39 = vand.u32 2147483647, %v1814_v53 }
 0x8d2   : > { %3635 = vrcp.f32 %v4985_v36  ;;  %v1847_v6 = vmul.f32 %v4902_v22, %v1846_v9  ;;  %vm1853_vm3 = vweird.f32 %v1814_v53 }
 0x8d3   : > { %v3485_v58 = vpop.permute.xlu0 %3484  ;;  %v1860_v35 = vor.u32 1.1754944e-38, %v1859_v40  ;;  %vm1858_vm5 = vcmp.eq.f32.partialorder %v1857_v39, 8.507059e+37 }
 0x8d4   : > { %v3486_v13 = vunpack.i.l.bf16 %v3485_v58  ;;  %v3487_v62 = vunpack.i.h.bf16 %v3485_v58  ;;  %3327 = vmatmul.msk.f32.vlgmr.msrb.gmra.mxu1 %vm713_vm12, %v1847_v6  ;;  %1953 = vst.msk [vmem:[%s4306_s9 + $0x8] sm:$0xff] %vm713_vm12, %v1847_v6  ;;  %v2314_v58 = vand.u32 2147483647, %v4985_v36 }
 0x8d6   : > { %2515 = vmatpush.msra.mxu0 %v3486_v13  ;;  %vm2315_vm9 = vcmp.eq.f32.partialorder %v2314_v58, 8.507059e+37 }
 0x8d7   : > { %v3634_v3 = vpop.eup %3633 }
 0x8d8   : > { %v1849_v1 = vmul.f32 %v3634_v3, %v1814_v53  ;;  %2516 = vmatpush.msra.mxu0 %v3487_v62  ;;  %v5001_v34 = vpop.xlane.xlu1 %2285  ;;  %v3636_v22 = vpop.eup %3635  ;;  %vm1854_vm2 = vweird.f32 %v3634_v3 }
 0x8d9   : > { %2558 = vrot.lane.b32.xlu1 %v1560_v43, %s3732_s26  ;;  %3637 = vrcp.f32 %v5001_v34  ;;  %v2306_v20 = vmul.f32 %v3636_v22, %v4985_v36  ;;  %v5005_v4 = vpop.xlane.xlu2 %2297  ;;  %vm1855_vm4 = vmor %vm1853_vm3, %vm1854_vm2  ;;  %vm2311_vm6 = vweird.f32 %v3636_v22  ;;  %v1569_v47 = vpop.f32.mrf.mxu0  ;;  %vm2325_vm14 = vweird.f32 %v5001_v34 }
 0x8da   : > { %v1850_v50 = vsub.f32 1.0, %v1849_v1  ;;  %2517 = vmatpush.msra.mxu0 %v3496_v19  ;;  %3639 = vrcp.f32 %v4988_v42  ;;  %vm2312_vm8 = vmor %vm2310_vm7, %vm2311_vm6  ;;  %vm2340_vm6 = vweird.f32 %v4988_v42 }
 0x8db   : > { %v2307_v16 = vsub.f32 1.0, %v2306_v20 }
 0x8dc   : > { %v1851_v27 = vmul.f32 %v3634_v3, %v1850_v50  ;;  %2518 = vmatpush.msra.mxu0 %v3497_v23 }
 0x8dd   : > { %v2308_v21 = vmul.f32 %v3636_v22, %v2307_v16 }
 0x8de   : > { %v1852_v12 = vadd.f32 %v3634_v3, %v1851_v27  ;;  %v2331_v27 = vand.u32 2147483648, %v5001_v34 }
 0x8df   : > { %v3638_v38 = vpop.eup %3637  ;;  %v2309_v53 = vadd.f32 %v3636_v22, %v2308_v21 }
 0x8e0   : > { %v1856_v31 = vsel %vm1855_vm4, %v3634_v3, %v1852_v12  ;;  %v2321_v43 = vmul.f32 %v3638_v38, %v5001_v34  ;;  %v5015_v2 = vpop.eup %3639  ;;  %vm2326_vm10 = vweird.f32 %v3638_v38 }
 0x8e1   : > { %2560 = vrot.lane.b32.xlu1 %v1563_v59, %s3732_s26  ;;  %v1861_v56 = vsel %vm1858_vm5, %v1860_v35, %v1856_v31  ;;  %v2336_v9 = vmul.f32 %v5015_v2, %v4988_v42  ;;  %v2313_v6 = vsel %vm2312_vm8, %v3636_v22, %v2309_v53  ;;  %v2329_v31 = vand.u32 2147483647, %v5001_v34  ;;  %vm2327_vm1 = vmor %vm2325_vm14, %vm2326_vm10 }
 0x8e2   : > { %v1862_v46 = vmul.f32 %v4916_v48, %v1861_v56  ;;  %v2322_v7 = vsub.f32 1.0, %v2321_v43  ;;  %v2316_v48 = vand.u32 2147483648, %v4985_v36  ;;  %v2332_v43 = vor.u32 1.1754944e-38, %v2331_v27 }
 0x8e3   : > { %v2337_v23 = vsub.f32 1.0, %v2336_v9  ;;  %vm2330_vm4 = vcmp.eq.f32.partialorder %v2329_v31, 8.507059e+37  ;;  %vm2341_vm5 = vweird.f32 %v5015_v2 }
 0x8e4   : > { %3328 = vmatmul.msk.f32.gmra.mxu1 %vm713_vm12, %v1862_v46  ;;  %1954 = vst.msk [vmem:[%s4306_s9 + $0x18] sm:$0xff] %vm713_vm12, %v1862_v46  ;;  %v2323_v62 = vmul.f32 %v3638_v38, %v2322_v7  ;;  %v2317_v3 = vor.u32 1.1754944e-38, %v2316_v48  ;;  %v2346_v48 = vand.u32 2147483648, %v4988_v42  ;;  %vm2342_vm7 = vmor %vm2340_vm6, %vm2341_vm5  ;;  %vm2370_vm5 = vweird.f32 %v4992_v49 }
 0x8e5   : > { %v2338_v16 = vmul.f32 %v5015_v2, %v2337_v23 }
 0x8e6   : > { %v2318_v1 = vsel %vm2315_vm9, %v2317_v3, %v2313_v6  ;;  %v2324_v39 = vadd.f32 %v3638_v38, %v2323_v62  ;;  %v2347_v9 = vor.u32 1.1754944e-38, %v2346_v48 }
 0x8e7   : > { %v1832_v45 = vpop.xlane.xlu2 %1831  ;;  %v5026_v35 = vmul.f32 %v4907_v60, %v2318_v1  ;;  %v2339_v7 = vadd.f32 %v5015_v2, %v2338_v16 }
 0x8e8   : > { %3641 = vrcp.f32 %v1832_v45  ;;  %v1949_v36 = vand.u32 2147483648, %v1832_v45  ;;  %v1947_v22 = vand.u32 2147483647, %v1832_v45  ;;  %vm1943_vm15 = vweird.f32 %v1832_v45 }
 0x8e9   : > { %2562 = vrot.lane.b32.xlu1 %v1566_v25, %s3732_s26  ;;  %v1572_v25 = vpop.f32.mrf.mxu0  ;;  %v2328_v21 = vsel %vm2327_vm1, %v3638_v38, %v2324_v39 }
 0x8ea   : > { %v1950_v46 = vor.u32 1.1754944e-38, %v1949_v36  ;;  %vm1948_vm3 = vcmp.eq.f32.partialorder %v1947_v22, 8.507059e+37  ;;  %v2333_v34 = vsel %vm2330_vm4, %v2332_v43, %v2328_v21 }
 0x8eb   : > { %v5044_v38 = vmul.f32 %v4924_v63, %v2333_v34 }
 0x8ee   : > { %v3642_v13 = vpop.eup %3641 }
 0x8ef   : > { %v1939_v59 = vmul.f32 %v3642_v13, %v1832_v45  ;;  %vm1944_vm13 = vweird.f32 %v3642_v13 }
 0x8f0   : > { %v3505_v19 = vpop.permute.xlu1 %3504  ;;  %vm1945_vm2 = vmor %vm1943_vm15, %vm1944_vm13 }
 0x8f1   : > { %v1940_v50 = vsub.f32 1.0, %v1939_v59  ;;  %v3506_v40 = vunpack.i.l.bf16 %v3505_v19  ;;  %2564 = vrot.lane.b32.xlu1 %v1569_v47, %s3732_s26  ;;  %v3507_v12 = vunpack.i.h.bf16 %v3505_v19  ;;  %v2344_v47 = vand.u32 2147483647, %v4988_v42 }
 0x8f3   : > { %v1941_v20 = vmul.f32 %v3642_v13, %v1940_v50  ;;  %2519 = vmatpush.msra.mxu0 %v3506_v40  ;;  %vm2345_vm8 = vcmp.eq.f32.partialorder %v2344_v47, 8.507059e+37 }
 0x8f5   : > { %2520 = vmatpush.msra.mxu0 %v3507_v12  ;;  %v1942_v56 = vadd.f32 %v3642_v13, %v1941_v20 }
 0x8f6   : > { %3351 = vmatmul.msk.f32.vlgmr.msra.gmra.mxu0 %vm713_vm12, %v5026_v35 }
 0x8f7   : > { %v1946_v53 = vsel %vm1945_vm2, %v3642_v13, %v1942_v56  ;;  %v1575_v13 = vpop.f32.mrf.mxu0 }
 0x8f8   : > { %v1951_v60 = vsel %vm1948_vm3, %v1950_v46, %v1946_v53 }
 0x8f9   : > { %2566 = vrot.lane.b32.xlu1 %v1572_v25, %s3732_s26  ;;  %v5034_v45 = vmul.f32 %v4935_v29, %v1951_v60  ;;  %v2343_v29 = vsel %vm2342_vm7, %v5015_v2, %v2339_v7 }
 0x8fa   : > { %v2348_v6 = vsel %vm2345_vm8, %v2347_v9, %v2343_v29  ;;  %v2376_v9 = vand.u32 2147483648, %v4992_v49 }
 0x8fb   : > { %1960 = vst.msk [vmem:[%s4306_s9 + $0x78] sm:$0xff] %vm713_vm12, %v5034_v45  ;;  %v5053_v63 = vmul.f32 %v4910_v0, %v2348_v6 }
 0x8fe   : > { %v1817_v58 = vpop.xlane.xlu0 %1816  ;;  %3352 = vmatmul.msk.f32.gmra.mxu0 %vm713_vm12, %v5044_v38 }
 0x8ff   : > { %3643 = vrcp.f32 %v1817_v58  ;;  %v1874_v19 = vand.u32 2147483648, %v1817_v58  ;;  %v1872_v0 = vand.u32 2147483647, %v1817_v58  ;;  %vm1868_vm10 = vweird.f32 %v1817_v58 }
 0x900   : > { %3645 = vrcp.f32 %v4992_v49 }
 0x901   : > { %2568 = vrot.lane.b32.xlu1 %v1575_v13, %s3732_s26  ;;  %3647 = vrcp.f32 %v5005_v4  ;;  %v1875_v36 = vor.u32 1.1754944e-38, %v1874_v19  ;;  %vm1873_vm14 = vcmp.eq.f32.partialorder %v1872_v0, 8.507059e+37  ;;  %v2377_v0 = vor.u32 1.1754944e-38, %v2376_v9 }
 0x905   : > { %v3644_v42 = vpop.eup %3643 }
 0x906   : > { %v1864_v62 = vmul.f32 %v3644_v42, %v1817_v58  ;;  %v2292_v3 = vpop.xlane.xlu0 %2291  ;;  %3353 = vmatmul.msk.f32.gmra.mxu0 %vm713_vm12, %v5053_v63  ;;  %v5058_v2 = vpop.eup %3645  ;;  %vm1869_vm9 = vweird.f32 %v3644_v42 }
 0x907   : > { %3649 = vrcp.f32 %v2292_v3  ;;  %v2366_v1 = vmul.f32 %v5058_v2, %v4992_v49  ;;  %v5062_v50 = vpop.eup %3647  ;;  %vm1870_vm13 = vmor %vm1868_vm10, %vm1869_vm9  ;;  %v2361_v46 = vand.u32 2147483648, %v2292_v3  ;;  %v2359_v53 = vand.u32 2147483647, %v2292_v3 }
 0x908   : > { %v1865_v59 = vsub.f32 1.0, %v1864_v62  ;;  %v2381_v56 = vmul.f32 %v5062_v50, %v5005_v4  ;;  %vm2355_vm1 = vweird.f32 %v2292_v3  ;;  %vm2371_vm3 = vweird.f32 %v5058_v2 }
 0x909   : > { %v2367_v39 = vsub.f32 1.0, %v2366_v1  ;;  %v2362_v48 = vor.u32 1.1754944e-38, %v2361_v46  ;;  %vm2360_vm4 = vcmp.eq.f32.partialorder %v2359_v53, 8.507059e+37  ;;  %vm5087_vm6 = vmor %vm2370_vm5, %vm2371_vm3  ;;  %vm2386_vm9 = vweird.f32 %v5062_v50 }
 0x90a   : > { %v1866_v23 = vmul.f32 %v3644_v42, %v1865_v59  ;;  %v2382_v60 = vsub.f32 1.0, %v2381_v56  ;;  %v2389_v56 = vand.u32 2147483647, %v5005_v4 }
 0x90b   : > { %v2368_v21 = vmul.f32 %v5058_v2, %v2367_v39 }
 0x90c   : > { %v1867_v40 = vadd.f32 %v3644_v42, %v1866_v23  ;;  %v2383_v6 = vmul.f32 %v5062_v50, %v2382_v60 }
 0x90d   : > { %v3650_v27 = vpop.eup %3649  ;;  %v2369_v29 = vadd.f32 %v5058_v2, %v2368_v21 }
 0x90e   : > { %v2351_v20 = vmul.f32 %v3650_v27, %v2292_v3  ;;  %v5064_v12 = vpop.xlane.xlu0 %1822  ;;  %v1871_v22 = vsel %vm1870_vm13, %v3644_v42, %v1867_v40  ;;  %vm2356_vm15 = vweird.f32 %v3650_v27  ;;  %v2374_v3 = vand.u32 2147483647, %v4992_v49 }
 0x90f   : > { %3651 = vrcp.f32 %v5064_v12  ;;  %v1876_v31 = vsel %vm1873_vm14, %v1875_v36, %v1871_v22  ;;  %vm2357_vm2 = vmor %vm2355_vm1, %vm2356_vm15  ;;  %v1904_v1 = vand.u32 2147483648, %v5064_v12  ;;  %v2373_v23 = vsel %vm5087_vm6, %v5058_v2, %v2369_v29 }
 0x910   : > { %v2352_v25 = vsub.f32 1.0, %v2351_v20  ;;  %v1877_v16 = vmul.f32 %v4947_v33, %v1876_v31  ;;  %vm2375_vm8 = vcmp.eq.f32.partialorder %v2374_v3, 8.507059e+37  ;;  %v2384_v49 = vadd.f32 %v5062_v50, %v2383_v6 }
 0x911   : > { %v2391_v36 = vand.u32 2147483648, %v5005_v4  ;;  %vm1898_vm10 = vweird.f32 %v5064_v12  ;;  %v2378_v39 = vsel %vm2375_vm8, %v2377_v0, %v2373_v23  ;;  %vm2385_vm13 = vweird.f32 %v5005_v4 }
 0x912   : > { %v2353_v43 = vmul.f32 %v3650_v27, %v2352_v25  ;;  %3329 = vmatmul.msk.f32.gmra.mxu1 %vm713_vm12, %v1877_v16  ;;  %1955 = vst.msk [vmem:[%s4306_s9 + $0x28] sm:$0xff] %vm713_vm12, %v1877_v16  ;;  %v1905_v20 = vor.u32 1.1754944e-38, %v1904_v1  ;;  %vm5112_vm15 = vmor %vm2385_vm13, %vm2386_vm9  ;;  %v5117_v46 = vmul.f32 %v4918_v51, %v2378_v39 }
 0x913   : > { %v2388_v21 = vsel %vm5112_vm15, %v5062_v50, %v2384_v49 }
 0x914   : > { %v2354_v34 = vadd.f32 %v3650_v27, %v2353_v43  ;;  %v2392_v43 = vor.u32 1.1754944e-38, %v2391_v36 }
 0x915   : > { %v3652_v7 = vpop.eup %3651 }
 0x916   : > { %v1894_v33 = vmul.f32 %v3652_v7, %v5064_v12  ;;  %v5076_v47 = vpop.xlane.xlu0 %1825  ;;  %v2358_v58 = vsel %vm2357_vm2, %v3650_v27, %v2354_v34  ;;  %vm1899_vm7 = vweird.f32 %v3652_v7  ;;  %vm2390_vm2 = vcmp.eq.f32.partialorder %v2389_v56, 8.507059e+37 }
 0x917   : > { %3653 = vrcp.f32 %v5076_v47  ;;  %v2363_v13 = vsel %vm2360_vm4, %v2362_v48, %v2358_v58  ;;  %vm1900_vm14 = vmor %vm1898_vm10, %vm1899_vm7  ;;  %v1919_v48 = vand.u32 2147483648, %v5076_v47  ;;  %vm1913_vm4 = vweird.f32 %v5076_v47 }
 0x918   : > { %v1895_v42 = vsub.f32 1.0, %v1894_v33  ;;  %v5084_v62 = vmul.f32 %v4952_v52, %v2363_v13  ;;  %v1902_v52 = vand.u32 2147483647, %v5064_v12  ;;  %v2393_v33 = vsel %vm2390_vm2, %v2392_v43, %v2388_v21 }
 0x919   : > { %v1920_v13 = vor.u32 1.1754944e-38, %v1919_v48  ;;  %v5142_v3 = vmul.f32 %v4928_v41, %v2393_v33 }
 0x91a   : > { %v1896_v19 = vmul.f32 %v3652_v7, %v1895_v42  ;;  %3354 = vmatmul.msk.f32.gmra.mxu0 %vm713_vm12, %v5084_v62  ;;  %vm1903_vm1 = vcmp.eq.f32.partialorder %v1902_v52, 8.507059e+37 }
 0x91b   : > { %v5097_v40 = vpop.xlane.xlu1 %1819 }
 0x91c   : > { %3655 = vrcp.f32 %v5097_v40  ;;  %v1897_v2 = vadd.f32 %v3652_v7, %v1896_v19  ;;  %v1889_v29 = vand.u32 2147483648, %v5097_v40  ;;  %v1887_v19 = vand.u32 2147483647, %v5097_v40 }
 0x91d   : > { %v3654_v27 = vpop.eup %3653  ;;  %vm1883_vm7 = vweird.f32 %v5097_v40 }
 0x91e   : > { %v1909_v22 = vmul.f32 %v3654_v27, %v5076_v47  ;;  %v5107_v31 = vpop.xlane.xlu0 %1828  ;;  %v1901_v12 = vsel %vm1900_vm14, %v3652_v7, %v1897_v2  ;;  %vm1914_vm3 = vweird.f32 %v3654_v27  ;;  %v1890_v23 = vor.u32 1.1754944e-38, %v1889_v29 }
 0x91f   : > { %3657 = vrcp.f32 %v5107_v31  ;;  %v1906_v4 = vsel %vm1903_vm1, %v1905_v20, %v1901_v12  ;;  %vm1915_vm6 = vmor %vm1913_vm4, %vm1914_vm3  ;;  %v1934_v0 = vand.u32 2147483648, %v5107_v31  ;;  %vm1888_vm13 = vcmp.eq.f32.partialorder %v1887_v19, 8.507059e+37 }
 0x920   : > { %v1910_v16 = vsub.f32 1.0, %v1909_v22  ;;  %v5123_v53 = vmul.f32 %v4958_v15, %v1906_v4  ;;  %v1917_v15 = vand.u32 2147483647, %v5076_v47  ;;  %vm1928_vm14 = vweird.f32 %v5107_v31 }
 0x921   : > { %v1935_v25 = vor.u32 1.1754944e-38, %v1934_v0  ;;  %v2670_v0 = vld [vmem:[%s5563_s3 + $0x10] sm:$0xff] }
 0x922   : > { %v3656_v60 = vpop.eup %3655  ;;  %v1911_v34 = vmul.f32 %v3654_v27, %v1910_v16  ;;  %3355 = vmatmul.msk.f32.gmra.mxu0 %vm713_vm12, %v5117_v46  ;;  %1957 = vst.msk [vmem:[%s4306_s9 + $0x48] sm:$0xff] %vm713_vm12, %v5123_v53  ;;  %vm1918_vm8 = vcmp.eq.f32.partialorder %v1917_v15, 8.507059e+37 }
 0x923   : > { %v1879_v51 = vmul.f32 %v3656_v60, %v5097_v40  ;;  %v5129_v7 = vpop.xlane.xlu1 %2300  ;;  %vm1884_vm5 = vweird.f32 %v3656_v60  ;;  %v1932_v40 = vand.u32 2147483647, %v5107_v31 }
 0x924   : > { %3659 = vrcp.f32 %v5129_v7  ;;  %v1912_v9 = vadd.f32 %v3654_v27, %v1911_v34  ;;  %vm1885_vm9 = vmor %vm1883_vm7, %vm1884_vm5  ;;  %vm2400_vm3 = vweird.f32 %v5129_v7 }
 0x925   : > { %v3658_v50 = vpop.eup %3657  ;;  %v1880_v58 = vsub.f32 1.0, %v1879_v51  ;;  %vm1933_vm1 = vcmp.eq.f32.partialorder %v1932_v40, 8.507059e+37 }
 0x926   : > { %v1924_v6 = vmul.f32 %v3658_v50, %v5107_v31  ;;  %v5139_v42 = vpop.xlane.xlu0 %2303  ;;  %v1916_v47 = vsel %vm1915_vm6, %v3654_v27, %v1912_v9  ;;  %vm1929_vm10 = vweird.f32 %v3658_v50  ;;  %v2404_v31 = vand.u32 2147483647, %v5129_v7 }
 0x927   : > { %v1881_v59 = vmul.f32 %v3656_v60, %v1880_v58  ;;  %3661 = vrcp.f32 %v5139_v42  ;;  %v1921_v41 = vsel %vm1918_vm8, %v1920_v13, %v1916_v47  ;;  %vm1930_vm15 = vmor %vm1928_vm14, %vm1929_vm10  ;;  %vm2415_vm7 = vweird.f32 %v5139_v42 }
 0x928   : > { %v1925_v1 = vsub.f32 1.0, %v1924_v6  ;;  %v1922_v39 = vmul.f32 %v4964_v14, %v1921_v41  ;;  %v2406_v14 = vand.u32 2147483648, %v5129_v7  ;;  %vm2405_vm5 = vcmp.eq.f32.partialorder %v2404_v31, 8.507059e+37 }
 0x929   : > { %v1882_v52 = vadd.f32 %v3656_v60, %v1881_v59  ;;  %vm2659_vm10 = vcmask 195584  }
 0x92a   : > { %v3660_v49 = vpop.eup %3659  ;;  %v1926_v36 = vmul.f32 %v3658_v50, %v1925_v1  ;;  %3356 = vmatmul.msk.f32.gmra.mxu0 %vm713_vm12, %v5142_v3  ;;  %1958 = vst.msk [vmem:[%s4306_s9 + $0x58] sm:$0xff] %vm713_vm12, %v1922_v39  ;;  %v2407_v51 = vor.u32 1.1754944e-38, %v2406_v14 }
 0x92b   : > { %v2396_v27 = vmul.f32 %v3660_v49, %v5129_v7  ;;  %v1886_v2 = vsel %vm1885_vm9, %v3656_v60, %v1882_v52  ;;  %vm2401_vm2 = vweird.f32 %v3660_v49 }
 0x92c   : > { %v1891_v20 = vsel %vm1888_vm13, %v1890_v23, %v1886_v2  ;;  %v1927_v22 = vadd.f32 %v3658_v50, %v1926_v36  ;;  %vm2402_vm4 = vmor %vm2400_vm3, %vm2401_vm2 }
 0x92d   : > { %v3662_v56 = vpop.eup %3661  ;;  %v2397_v12 = vsub.f32 1.0, %v2396_v27  ;;  %v1892_v16 = vmul.f32 %v4969_v57, %v1891_v20  ;;  %v2668_v20 = vld [vmem:[%s5563_s3] sm:$0xff] }
 0x92e   : > { %v2411_v21 = vmul.f32 %v3662_v56, %v5139_v42  ;;  %v1931_v4 = vsel %vm1930_vm15, %v3658_v50, %v1927_v22  ;;  %vm2416_vm6 = vweird.f32 %v3662_v56  ;;  %v2421_v50 = vand.u32 2147483648, %v5139_v42 }
 0x92f   : > { %v2398_v43 = vmul.f32 %v3660_v49, %v2397_v12  ;;  %3330 = vmatmul.msk.f32.gmra.mxu1 %vm713_vm12, %v1892_v16  ;;  %1956 = vst.msk [vmem:[%s4306_s9 + $0x38] sm:$0xff] %vm713_vm12, %v1892_v16  ;;  %v1936_v60 = vsel %vm1933_vm1, %v1935_v25, %v1931_v4  ;;  %vm2417_vm8 = vmor %vm2415_vm7, %vm2416_vm6 }
 0x930   : > { %v2412_v34 = vsub.f32 1.0, %v2411_v21  ;;  %v1937_v57 = vmul.f32 %v4971_v11, %v1936_v60  ;;  %v2419_v11 = vand.u32 2147483647, %v5139_v42  ;;  %v2422_v13 = vor.u32 1.1754944e-38, %v2421_v50 }
 0x931   : > { %v2399_v48 = vadd.f32 %v3660_v49, %v2398_v43 }
 0x932   : > { %v2413_v33 = vmul.f32 %v3662_v56, %v2412_v34  ;;  %1959 = vst.msk [vmem:[%s4306_s9 + $0x68] sm:$0xff] %vm713_vm12, %v1937_v57  ;;  %vm2420_vm9 = vcmp.eq.f32.partialorder %v2419_v11, 8.507059e+37 }
 0x933   : > { %v2403_v15 = vsel %vm2402_vm4, %v3660_v49, %v2399_v48  ;;  %v2669_v49 = vld [vmem:[%s5563_s3 + $0x8] sm:$0xff] }
 0x934   : > { %v2408_v58 = vsel %vm2405_vm5, %v2407_v51, %v2403_v15  ;;  %v2414_v29 = vadd.f32 %v3662_v56, %v2413_v33 }
 0x935   : > { %v5171_v9 = vmul.f32 %v4977_v8, %v2408_v58 }
 0x936   : > { %v2418_v7 = vsel %vm2417_vm8, %v3662_v56, %v2414_v29 }
 0x937   : > { %3331 = vmatmul.msk.f32.gmra.mxu1 %vm713_vm12, %v5123_v53  ;;  %3357 = vmatmul.msk.f32.gmra.mxu0 %vm713_vm12, %v5171_v9  ;;  %v2423_v6 = vsel %vm2420_vm9, %v2422_v13, %v2418_v7 }
 0x938   : > { %v5179_v59 = vmul.f32 %v4979_v24, %v2423_v6 }
 0x93b   : > { %v2555_v56 = vpop.permute.xlu1 %2554 }
 0x93c   : > { %v2642_v12 = vsel %vm639_vm11, %v4435_v61, %v2555_v56 }
 0x93f   : > { %3332 = vmatmul.msk.f32.gmra.mxu1 %vm713_vm12, %v1922_v39  ;;  %3358 = vmatmul.msk.f32.gmra.mxu0 %vm713_vm12, %v5179_v59 }
 0x943   : > { %v2557_v4 = vpop.permute.xlu1 %2556 }
 0x944   : > { %v2643_v31 = vsel %vm639_vm11, %v4439_v26, %v2557_v4  ;;  %v3703_v4 = vld [vmem:[%s3796_s10] sm:$0xff] }
 0x947   : > { %3333 = vmatmul.msk.f32.gmra.mxu1 %vm713_vm12, %v1937_v57 }
 0x94b   : > { %v2559_v61 = vpop.permute.xlu1 %2558 }
 0x94c   : > { %v2644_v51 = vsel %vm639_vm11, %v4443_v28, %v2559_v61 }
 0x94f   : > { %3334 = vmatmul.msk.f32.gmra.mxu1 %vm713_vm12, %v5034_v45  ;;  %v2671_v45 = vld [vmem:[%s5563_s3 + $0x18] sm:$0xff]  ;;  %vm2650_vm12 = vcmask 130048  }
 0x950   : > { %2709 = vmatpush.msra.mxu2 %v2671_v45 }
 0x951   : > { %v2026_v8 = vpop.f32.mrf.mxu1 }
 0x952   : > { %2586 = vrot.lane.b32.xlu2 %v2026_v8, %s3733_s15  ;;  %2710 = vmatpush.msra.mxu2 %v2670_v0 }
 0x953   : > { %v2561_v26 = vpop.permute.xlu1 %2560 }
 0x954   : > { %2711 = vmatpush.msra.mxu2 %v2669_v49  ;;  %v2645_v29 = vsel %vm639_vm11, %v4449_v17, %v2561_v26 }
 0x956   : > { %2712 = vmatpush.msra.mxu2 %v2668_v20  ;;  %v5583_v20 = vld [vmem:[#allocation5_spill] sm:$0xff] }
 0x95b   : > { %v2563_v6 = vpop.permute.xlu1 %2562 }
 0x95c   : > { %v2646_v8 = vsel %vm639_vm11, %v4465_v37, %v2563_v6 }
 0x961   : > { %v2029_v53 = vpop.f32.mrf.mxu1 }
 0x962   : > { %2588 = vrot.lane.b32.xlu2 %v2029_v53, %s3733_s15 }
 0x963   : > { %v2565_v17 = vpop.permute.xlu1 %2564 }
 0x96b   : > { %v2567_v37 = vpop.permute.xlu1 %2566 }
 0x973   : > { %v2522_v42 = vpop.f32.mrf.mxu0 }
 0x974   : > { %2618 = vrot.lane.b32.xlu0 %v2522_v42, %s3734_s21 }
 0x97b   : > { %v2525_v24 = vpop.f32.mrf.mxu0 }
 0x97c   : > { %2620 = vrot.lane.b32.xlu0 %v2525_v24, %s3734_s21 }
 0x983   : > { %v2528_v19 = vpop.f32.mrf.mxu0 }
 0x984   : > { %2622 = vrot.lane.b32.xlu0 %v2528_v19, %s3734_s21 }
 0x98f   : > { %v2032_v1 = vpop.f32.mrf.mxu1 }
 0x990   : > { %2590 = vrot.lane.b32.xlu2 %v2032_v1, %s3733_s15  ;;  %v5581_v1 = vld [vmem:[#allocation3_spill] sm:$0xff] }
 0x991   : > { %v2647_v45 = vsel %vm639_vm11, %v5581_v1, %v2565_v17 }
 0x997   : > { %v2531_v47 = vpop.f32.mrf.mxu0 }
 0x998   : > { %2624 = vrot.lane.b32.xlu0 %v2531_v47, %s3734_s21 }
 0x99f   : > { %v2534_v23 = vpop.f32.mrf.mxu0 }
 0x9a0   : > { %2626 = vrot.lane.b32.xlu0 %v2534_v23, %s3734_s21 }
 0x9a7   : > { %v2537_v52 = vpop.f32.mrf.mxu0 }
 0x9a8   : > { %2628 = vrot.lane.b32.xlu0 %v2537_v52, %s3734_s21 }
 0x9ac   : > { %v2035_v41 = vpop.f32.mrf.mxu1  ;;  %v2587_v25 = vpop.permute.xlu2 %2586 }
 0x9ad   : > { %2592 = vrot.lane.b32.xlu2 %v2035_v41, %s3733_s15  ;;  %v2651_v16 = vsel %vm2650_vm12, %v2642_v12, %v2587_v25  ;;  %v5582_v41 = vld [vmem:[#allocation4_spill] sm:$0xff] }
 0x9ae   : > { %v2648_v49 = vsel %vm639_vm11, %v5582_v41, %v2567_v37 }
 0x9b4   : > { %v2038_v36 = vpop.f32.mrf.mxu1  ;;  %v2540_v39 = vpop.f32.mrf.mxu0 }
 0x9b5   : > { %2594 = vrot.lane.b32.xlu2 %v2038_v36, %s3733_s15  ;;  %2630 = vrot.lane.b32.xlu0 %v2540_v39, %s3734_s21 }
 0x9bc   : > { %v2041_v40 = vpop.f32.mrf.mxu1  ;;  %v2543_v27 = vpop.f32.mrf.mxu0 }
 0x9bd   : > { %2596 = vrot.lane.b32.xlu2 %v2041_v40, %s3733_s15  ;;  %2632 = vrot.lane.b32.xlu0 %v2543_v27, %s3734_s21  ;;  %v2589_v43 = vpop.permute.xlu2 %2588  ;;  %v2569_v27 = vpop.permute.xlu1 %2568 }
 0x9be   : > { %v2652_v60 = vsel %vm2650_vm12, %v2643_v31, %v2589_v43 }
 0x9c4   : > { %v2044_v2 = vpop.f32.mrf.mxu1 }
 0x9c5   : > { %2598 = vrot.lane.b32.xlu2 %v2044_v2, %s3733_s15 }
 0x9cc   : > { %v2047_v22 = vpop.f32.mrf.mxu1 }
 0x9cd   : > { %2600 = vrot.lane.b32.xlu2 %v2047_v22, %s3733_s15  ;;  %v2649_v22 = vsel %vm639_vm11, %v5583_v20, %v2569_v27 }
 0x9e6   : > { %v2619_v14 = vpop.permute.xlu0 %2618 }
 0x9e7   : > { %v2660_v21 = vsel %vm2659_vm10, %v2651_v16, %v2619_v14  ;;  %v3510_v16 = vld [vmem:[%s5566_s6 + $0x2] ss:$0 sm:$0xff] }
 0x9e8   : > { %3359 = vmatmul.msk.f32.vlgmr.msra.gmra.mxu2 %vm336_vm0, %v2660_v21 }
 0x9ea   : > { %v2591_v48 = vpop.permute.xlu2 %2590 }
 0x9eb   : > { %v2653_v33 = vsel %vm2650_vm12, %v2644_v51, %v2591_v48 }
 0x9ee   : > { %v2621_v34 = vpop.permute.xlu0 %2620 }
 0x9ef   : > { %v2661_v57 = vsel %vm2659_vm10, %v2652_v60, %v2621_v34 }
 0x9f0   : > { %3360 = vmatmul.msk.f32.gmra.mxu2 %vm336_vm0, %v2661_v57  ;;  %v3704_v57 = vld [vmem:[%s3796_s10 + $0x8] sm:$0xff] }
 0x9f6   : > { %v2623_v15 = vpop.permute.xlu0 %2622 }
 0x9f7   : > { %v2662_v50 = vsel %vm2659_vm10, %v2653_v33, %v2623_v15  ;;  %v3705_v15 = vld [vmem:[%s3796_s10 + $0x10] sm:$0xff] }
 0x9f8   : > { %3361 = vmatmul.msk.f32.gmra.mxu2 %vm336_vm0, %v2662_v50 }
 0xa07   : > { %v2593_v58 = vpop.permute.xlu2 %2592 }
 0xa08   : > { %v2654_v11 = vsel %vm2650_vm12, %v2645_v29, %v2593_v58 }
 0xa0a   : > { %v2625_v7 = vpop.permute.xlu0 %2624 }
 0xa0b   : > { %v2663_v13 = vsel %vm2659_vm10, %v2654_v11, %v2625_v7  ;;  %v3706_v11 = vld [vmem:[%s3796_s10 + $0x18] sm:$0xff] }
 0xa0c   : > { %3362 = vmatmul.msk.f32.gmra.mxu2 %vm336_vm0, %v2663_v13 }
 0xa0f   : > { %v2595_v28 = vpop.permute.xlu2 %2594 }
 0xa10   : > { %v2655_v53 = vsel %vm2650_vm12, %v2646_v8, %v2595_v28  ;;  %v3707_v8 = vld [vmem:[%s3796_s10 + $0x20] sm:$0xff] }
 0xa12   : > { %v2627_v42 = vpop.permute.xlu0 %2626 }
 0xa13   : > { %v2664_v24 = vsel %vm2659_vm10, %v2655_v53, %v2627_v42 }
 0xa14   : > { %3363 = vmatmul.msk.f32.gmra.mxu2 %vm336_vm0, %v2664_v24 }
 0xa17   : > { %v2597_v19 = vpop.permute.xlu2 %2596 }
 0xa18   : > { %v2656_v47 = vsel %vm2650_vm12, %v2647_v45, %v2597_v19  ;;  %v3708_v19 = vld [vmem:[%s3796_s10 + $0x28] sm:$0xff] }
 0xa1a   : > { %v2629_v23 = vpop.permute.xlu0 %2628 }
 0xa1b   : > { %v2665_v0 = vsel %vm2659_vm10, %v2656_v47, %v2629_v23 }
 0xa1c   : > { %3364 = vmatmul.msk.f32.gmra.mxu2 %vm336_vm0, %v2665_v0  ;;  %v3709_v0 = vld [vmem:[%s3796_s10 + $0x30] sm:$0xff] }
 0xa1f   : > { %v2599_v52 = vpop.permute.xlu2 %2598 }
 0xa20   : > { %v2657_v36 = vsel %vm2650_vm12, %v2648_v49, %v2599_v52  ;;  %v5584_v49 = vld [vmem:[#allocation2_spill] sm:$0xff] }
 0xa27   : > { %v2631_v39 = vpop.permute.xlu0 %2630  ;;  %v2601_v2 = vpop.permute.xlu2 %2600 }
 0xa28   : > { %v2666_v40 = vsel %vm2659_vm10, %v2657_v36, %v2631_v39  ;;  %v2658_v56 = vsel %vm2650_vm12, %v2649_v22, %v2601_v2 }
 0xa29   : > { %3365 = vmatmul.msk.f32.gmra.mxu2 %vm336_vm0, %v2666_v40 }
 0xa2f   : > { %v2633_v25 = vpop.permute.xlu0 %2632 }
 0xa30   : > { %v2667_v12 = vsel %vm2659_vm10, %v2658_v56, %v2633_v25  ;;  %v3710_v25 = vld [vmem:[%s3796_s10 + $0x38] sm:$0xff] }
 0xa31   : > { %3366 = vmatmul.msk.f32.gmra.mxu2 %vm336_vm0, %v2667_v12 }
 0xa6b   : > { %v2714_v14 = vpop.f32.mrf.mxu2 }
 0xa6c   : > { %v2715_v21 = vadd.f32 %v3510_v16, %v2714_v14 }
 0xa6e   : > { %v5251_v43 = vadd.f32 %v3703_v4, %v2715_v21 }
 0xa70   : > { %v2746_v31 = vsel %vm336_vm0, %v5251_v43, 0.0 }
 0xa71   : > { %2747 = vadd.xlane.f32.xlu1 %v2746_v31 }
 0xa73   : > { %v2717_v60 = vpop.f32.mrf.mxu2 }
 0xa74   : > { %v2718_v34 = vadd.f32 %v3510_v16, %v2717_v60 }
 0xa76   : > { %v5256_v61 = vadd.f32 %v3704_v57, %v2718_v34 }
 0xa78   : > { %v2749_v48 = vsel %vm336_vm0, %v5256_v61, 0.0 }
 0xa79   : > { %2750 = vadd.xlane.f32.xlu2 %v2749_v48 }
 0xa7b   : > { %v2720_v51 = vpop.f32.mrf.mxu2 }
 0xa7c   : > { %v2721_v33 = vadd.f32 %v3510_v16, %v2720_v51 }
 0xa7e   : > { %v5261_v50 = vadd.f32 %v3705_v15, %v2721_v33 }
 0xa80   : > { %v2752_v26 = vsel %vm336_vm0, %v5261_v50, 0.0 }
 0xa81   : > { %2753 = vadd.xlane.f32.xlu0 %v2752_v26 }
 0xa8f   : > { %v2723_v58 = vpop.f32.mrf.mxu2 }
 0xa90   : > { %v2724_v29 = vadd.f32 %v3510_v16, %v2723_v58 }
 0xa92   : > { %v5266_v7 = vadd.f32 %v3706_v11, %v2724_v29 }
 0xa94   : > { %v2755_v13 = vsel %vm336_vm0, %v5266_v7, 0.0 }
 0xa95   : > { %2756 = vadd.xlane.f32.xlu2 %v2755_v13 }
 0xa97   : > { %v2726_v6 = vpop.f32.mrf.mxu2 }
 0xa98   : > { %v2727_v28 = vadd.f32 %v3510_v16, %v2726_v6 }
 0xa9a   : > { %v5271_v53 = vadd.f32 %v3707_v8, %v2727_v28 }
 0xa9c   : > { %v2758_v42 = vsel %vm336_vm0, %v5271_v53, 0.0 }
 0xa9d   : > { %2759 = vadd.xlane.f32.xlu1 %v2758_v42 }
 0xa9f   : > { %v2729_v24 = vpop.f32.mrf.mxu2 }
 0xaa0   : > { %v2730_v17 = vadd.f32 %v3510_v16, %v2729_v24 }
 0xaa2   : > { %v5276_v1 = vadd.f32 %v3708_v19, %v2730_v17 }
 0xaa4   : > { %v2761_v45 = vsel %vm336_vm0, %v5276_v1, 0.0 }
 0xaa5   : > { %2762 = vadd.xlane.f32.xlu0 %v2761_v45 }
 0xaac   : > { %v2732_v47 = vpop.f32.mrf.mxu2 }
 0xaad   : > { %v2733_v23 = vadd.f32 %v3510_v16, %v2732_v47 }
 0xaaf   : > { %v5281_v37 = vadd.f32 %v3709_v0, %v2733_v23 }
 0xab1   : > { %v2764_v52 = vsel %vm336_vm0, %v5281_v37, 0.0 }
 0xab2   : > { %2765 = vadd.xlane.f32.xlu1 %v2764_v52 }
 0xab4   : > { %v2735_v40 = vpop.f32.mrf.mxu2 }
 0xab5   : > { %v2736_v2 = vadd.f32 %v3510_v16, %v2735_v40 }
 0xab7   : > { %v5294_v12 = vadd.f32 %v3710_v25, %v2736_v2 }
 0xab9   : > { %v2767_v16 = vsel %vm336_vm0, %v5294_v12, 0.0 }
 0xae4   : > { %v2748_v41 = vpop.xlane.xlu1 %2747 }
 0xae5   : > { %v2770_v36 = vmul.f32 %v2748_v41, %v5584_v49 }
 0xae7   : > { %v5287_v39 = vsub.f32 %v5251_v43, %v2770_v36 }
 0xae9   : > { %v2786_v27 = vmul.f32 %v5287_v39, %v5287_v39 }
 0xaeb   : > { %v2794_v20 = vsel %vm336_vm0, %v2786_v27, 0.0 }
 0xaec   : > { %v2751_v22 = vpop.xlane.xlu2 %2750  ;;  %2795 = vadd.xlane.f32.xlu2 %v2794_v20 }
 0xaed   : > { %v2771_v56 = vmul.f32 %v2751_v22, %v5584_v49 }
 0xaef   : > { %v5297_v14 = vsub.f32 %v5256_v61, %v2771_v56 }
 0xaf1   : > { %v2787_v21 = vmul.f32 %v5297_v14, %v5297_v14 }
 0xaf3   : > { %v2797_v4 = vsel %vm336_vm0, %v2787_v21, 0.0 }
 0xaf4   : > { %2798 = vadd.xlane.f32.xlu0 %v2797_v4  ;;  %2768 = vadd.xlane.f32.xlu2 %v2767_v16  ;;  %v2754_v31 = vpop.xlane.xlu0 %2753 }
 0xaf5   : > { %v2772_v60 = vmul.f32 %v2754_v31, %v5584_v49 }
 0xaf7   : > { %v5306_v34 = vsub.f32 %v5261_v50, %v2772_v60 }
 0xaf9   : > { %v2788_v57 = vmul.f32 %v5306_v34, %v5306_v34 }
 0xafb   : > { %v2800_v48 = vsel %vm336_vm0, %v2788_v57, 0.0 }
 0xafc   : > { %2801 = vadd.xlane.f32.xlu1 %v2800_v48  ;;  %v5386_v48 = vld [vmem:[%s5566_s6 + $0x3] ss:$0 sm:$0xff] }
 0xb08   : > { %v2757_v51 = vpop.xlane.xlu2 %2756 }
 0xb09   : > { %v2773_v33 = vmul.f32 %v2757_v51, %v5584_v49 }
 0xb0b   : > { %v5313_v15 = vsub.f32 %v5266_v7, %v2773_v33 }
 0xb0d   : > { %v2789_v26 = vmul.f32 %v5313_v15, %v5313_v15 }
 0xb0f   : > { %v2803_v58 = vsel %vm336_vm0, %v2789_v26, 0.0  ;;  %v5391_v26 = vld [vmem:[%s5566_s6 + $0x4] ss:$0 sm:$0xff] }
 0xb10   : > { %v2760_v29 = vpop.xlane.xlu1 %2759  ;;  %2804 = vadd.xlane.f32.xlu0 %v2803_v58 }
 0xb11   : > { %v2774_v11 = vmul.f32 %v2760_v29, %v5584_v49 }
 0xb13   : > { %v5320_v13 = vsub.f32 %v5271_v53, %v2774_v11 }
 0xb15   : > { %v2790_v6 = vmul.f32 %v5320_v13, %v5320_v13 }
 0xb17   : > { %v2806_v28 = vsel %vm336_vm0, %v2790_v6, 0.0 }
 0xb18   : > { %2807 = vadd.xlane.f32.xlu2 %v2806_v28  ;;  %v2763_v8 = vpop.xlane.xlu0 %2762 }
 0xb19   : > { %v2775_v42 = vmul.f32 %v2763_v8, %v5584_v49 }
 0xb1b   : > { %v5327_v24 = vsub.f32 %v5276_v1, %v2775_v42 }
 0xb1d   : > { %v2791_v17 = vmul.f32 %v5327_v24, %v5327_v24 }
 0xb1f   : > { %v2809_v19 = vsel %vm336_vm0, %v2791_v17, 0.0 }
 0xb20   : > { %2810 = vadd.xlane.f32.xlu1 %v2809_v19 }
 0xb25   : > { %v2766_v45 = vpop.xlane.xlu1 %2765 }
 0xb26   : > { %v2776_v47 = vmul.f32 %v2766_v45, %v5584_v49 }
 0xb28   : > { %v5334_v23 = vsub.f32 %v5281_v37, %v2776_v47 }
 0xb2a   : > { %v2792_v0 = vmul.f32 %v5334_v23, %v5334_v23 }
 0xb2c   : > { %v2812_v52 = vsel %vm336_vm0, %v2792_v0, 0.0 }
 0xb2d   : > { %2813 = vadd.xlane.f32.xlu0 %v2812_v52 }
 0xb39   : > { %1464 = vrot.lane.b32.xlu1 %v4742_v55, %s3722_s25  ;;  %v2943_v55 = vld [vmem:[%s5564_s4 + $0x18] sm:$0xff] }
 0xb3a   : > { %2981 = vmatpush.msrb.mxu0 %v2943_v55  ;;  %3380 = vmatpush.msra.mxu1 %v2943_v55 }
 0xb41   : > { %1466 = vrot.lane.b32.xlu0 %v4759_v18, %s3722_s25  ;;  %1472 = vrot.lane.b32.xlu1 %v4796_v30, %s3722_s25  ;;  %v2942_v18 = vld [vmem:[%s5564_s4 + $0x10] sm:$0xff] }
 0xb42   : > { %2982 = vmatpush.msrb.mxu0 %v2942_v18  ;;  %3381 = vmatpush.msra.mxu1 %v2942_v18 }
 0xb49   : > { %1470 = vrot.lane.b32.xlu0 %v4786_v44, %s3722_s25  ;;  %1478 = vrot.lane.b32.xlu1 %v4823_v32, %s3722_s25  ;;  %v2941_v44 = vld [vmem:[%s5564_s4 + $0x8] sm:$0xff]  ;;  %v2940_v32 = vld [vmem:[%s5564_s4] sm:$0xff] }
 0xb4a   : > { %2983 = vmatpush.msrb.mxu0 %v2941_v44  ;;  %3382 = vmatpush.msra.mxu1 %v2941_v44 }
 0xb4c   : > { %2984 = vmatpush.msrb.mxu0 %v2940_v32  ;;  %3383 = vmatpush.msra.mxu1 %v2940_v32 }
 0xb51   : > { %1474 = vrot.lane.b32.xlu0 %v4805_v54, %s3722_s25  ;;  %2437 = vrot.lane.b32.xlu1 %v5053_v63, %s3722_s25 }
 0xb59   : > { %2433 = vrot.lane.b32.xlu0 %v5026_v35, %s3722_s25  ;;  %2443 = vrot.lane.b32.xlu1 %v5142_v3, %s3722_s25 }
 0xb5f   : > { %v2796_v30 = vpop.xlane.xlu2 %2795 }
 0xb60   : > { %v2818_v54 = vmul.f32 %v2796_v30, %v5584_v49 }
 0xb61   : > { %2439 = vrot.lane.b32.xlu0 %v5084_v62, %s3722_s25 }
 0xb62   : > { %v2826_v35 = vadd.f32 1e-05, %v2818_v54 }
 0xb64   : > { %3663 = vrsqrt.f32 %v2826_v35  ;;  %vm2840_vm13 = vweird.f32 %v2826_v35 }
 0xb67   : > { %v2769_v63 = vpop.xlane.xlu2 %2768  ;;  %v2799_v3 = vpop.xlane.xlu0 %2798 }
 0xb68   : > { %v2777_v41 = vmul.f32 %v2769_v63, %v5584_v49  ;;  %v2819_v36 = vmul.f32 %v2799_v3, %v5584_v49 }
 0xb69   : > { %2445 = vrot.lane.b32.xlu0 %v5171_v9, %s3722_s25 }
 0xb6a   : > { %v3664_v40 = vpop.eup %3663  ;;  %v5377_v27 = vsub.f32 %v5294_v12, %v2777_v41  ;;  %v2827_v2 = vadd.f32 1e-05, %v2819_v36 }
 0xb6b   : > { %v2835_v20 = vmul.f32 %v3664_v40, %v2826_v35  ;;  %vm2841_vm11 = vweird.f32 %v3664_v40 }
 0xb6c   : > { %3665 = vrsqrt.f32 %v2827_v2  ;;  %v2793_v62 = vmul.f32 %v5377_v27, %v5377_v27  ;;  %vm2842_vm14 = vmor %vm2840_vm13, %vm2841_vm11  ;;  %vm2850_vm1 = vweird.f32 %v2827_v2 }
 0xb6d   : > { %v2836_v22 = vmul.f32 %v3664_v40, %v2835_v20 }
 0xb6e   : > { %v2815_v56 = vsel %vm336_vm0, %v2793_v62, 0.0 }
 0xb6f   : > { %v2837_v25 = vmul.f32 0.5, %v2836_v22  ;;  %2816 = vadd.xlane.f32.xlu2 %v2815_v56  ;;  %v2802_v21 = vpop.xlane.xlu1 %2801 }
 0xb70   : > { %v2820_v4 = vmul.f32 %v2802_v21, %v5584_v49 }
 0xb71   : > { %v2838_v16 = vsub.f32 1.5, %v2837_v25 }
 0xb72   : > { %v3666_v9 = vpop.eup %3665  ;;  %v2828_v31 = vadd.f32 1e-05, %v2820_v4 }
 0xb73   : > { %v2839_v60 = vmul.f32 %v3664_v40, %v2838_v16  ;;  %v2845_v57 = vmul.f32 %v3666_v9, %v2827_v2  ;;  %vm2851_vm15 = vweird.f32 %v3666_v9 }
 0xb74   : > { %3667 = vrsqrt.f32 %v2828_v31  ;;  %vm2852_vm2 = vmor %vm2850_vm1, %vm2851_vm15  ;;  %vm2860_vm4 = vweird.f32 %v2828_v31  ;;  %vm1488_vm15 = vcmask 1048064  }
 0xb75   : > { %v2843_v51 = vsel %vm2842_vm14, %v3664_v40, %v2839_v60  ;;  %v2846_v33 = vmul.f32 %v3666_v9, %v2845_v57 }
 0xb76   : > { %v2914_v58 = vmul.f32 %v2843_v51, %v5287_v39 }
 0xb77   : > { %v2847_v29 = vmul.f32 0.5, %v2846_v33 }
 0xb78   : > { %v2923_v11 = vmul.f32 %v5386_v48, %v2914_v58 }
 0xb79   : > { %v2848_v6 = vsub.f32 1.5, %v2847_v29 }
 0xb7a   : > { %v3668_v28 = vpop.eup %3667  ;;  %v2932_v8 = vadd.f32 %v5391_v26, %v2923_v11 }
 0xb7b   : > { %v2849_v42 = vmul.f32 %v3666_v9, %v2848_v6  ;;  %v2855_v17 = vmul.f32 %v3668_v28, %v2828_v31  ;;  %vm2861_vm3 = vweird.f32 %v3668_v28 }
 0xb7c   : > { %3367 = vmatmul.msk.f32.vlgmr.msrb.gmra.mxu0 %vm336_vm0, %v2932_v8  ;;  %vm2862_vm5 = vmor %vm2860_vm4, %vm2861_vm3 }
 0xb7d   : > { %v2853_v19 = vsel %vm2852_vm2, %v3666_v9, %v2849_v42  ;;  %v2856_v45 = vmul.f32 %v3668_v28, %v2855_v17 }
 0xb7e   : > { %v2915_v47 = vmul.f32 %v2853_v19, %v5297_v14 }
 0xb7f   : > { %v2857_v0 = vmul.f32 0.5, %v2856_v45 }
 0xb80   : > { %v2924_v39 = vmul.f32 %v5386_v48, %v2915_v47 }
 0xb81   : > { %v2858_v52 = vsub.f32 1.5, %v2857_v0 }
 0xb82   : > { %v2933_v55 = vadd.f32 %v5391_v26, %v2924_v39 }
 0xb83   : > { %v2859_v18 = vmul.f32 %v3668_v28, %v2858_v52  ;;  %v2805_v44 = vpop.xlane.xlu0 %2804 }
 0xb84   : > { %v2821_v30 = vmul.f32 %v2805_v44, %v5584_v49  ;;  %3368 = vmatmul.msk.f32.vlgmr.msra.gmra.mxu1 %vm336_vm0, %v2933_v55 }
 0xb85   : > { %v2863_v54 = vsel %vm2862_vm5, %v3668_v28, %v2859_v18 }
 0xb86   : > { %v2829_v32 = vadd.f32 1e-05, %v2821_v30  ;;  %v2916_v35 = vmul.f32 %v2863_v54, %v5306_v34 }
 0xb87   : > { %1468 = vrot.lane.b32.xlu2 %v4775_v10, %s3722_s25 }
 0xb88   : > { %3669 = vrsqrt.f32 %v2829_v32  ;;  %v2925_v14 = vmul.f32 %v5386_v48, %v2916_v35  ;;  %vm2870_vm7 = vweird.f32 %v2829_v32 }
 0xb8a   : > { %v2934_v63 = vadd.f32 %v5391_v26, %v2925_v14 }
 0xb8b   : > { %v2808_v3 = vpop.xlane.xlu2 %2807 }
 0xb8c   : > { %v2822_v41 = vmul.f32 %v2808_v3, %v5584_v49  ;;  %3369 = vmatmul.msk.f32.gmra.mxu1 %vm336_vm0, %v2934_v63 }
 0xb8e   : > { %v3670_v36 = vpop.eup %3669  ;;  %v2830_v40 = vadd.f32 1e-05, %v2822_v41 }
 0xb8f   : > { %v2865_v2 = vmul.f32 %v3670_v36, %v2829_v32  ;;  %1476 = vrot.lane.b32.xlu2 %v4813_v5, %s3722_s25  ;;  %vm2871_vm6 = vweird.f32 %v3670_v36 }
 0xb90   : > { %3671 = vrsqrt.f32 %v2830_v40  ;;  %vm2872_vm8 = vmor %vm2870_vm7, %vm2871_vm6  ;;  %vm2880_vm12 = vweird.f32 %v2830_v40 }
 0xb91   : > { %v2866_v34 = vmul.f32 %v3670_v36, %v2865_v2 }
 0xb93   : > { %v2867_v20 = vmul.f32 0.5, %v2866_v34  ;;  %v2811_v10 = vpop.xlane.xlu1 %2810 }
 0xb94   : > { %v2823_v62 = vmul.f32 %v2811_v10, %v5584_v49  ;;  %v3097_v10 = vld [vmem:[%s5565_s5 + $0x78] sm:$0xff] }
 0xb95   : > { %v2868_v22 = vsub.f32 1.5, %v2867_v20  ;;  %3099 = vmatpush.msra.mxu3 %v3097_v10 }
 0xb96   : > { %v3672_v56 = vpop.eup %3671  ;;  %v2831_v25 = vadd.f32 1e-05, %v2823_v62  ;;  %v3096_v62 = vld [vmem:[%s5565_s5 + $0x70] sm:$0xff] }
 0xb97   : > { %v2869_v21 = vmul.f32 %v3670_v36, %v2868_v22  ;;  %v2875_v4 = vmul.f32 %v3672_v56, %v2830_v40  ;;  %2435 = vrot.lane.b32.xlu2 %v5044_v38, %s3722_s25  ;;  %vm2881_vm9 = vweird.f32 %v3672_v56  ;;  %v3095_v22 = vld [vmem:[%s5565_s5 + $0x68] sm:$0xff]  ;;  %3100 = vmatpush.msra.mxu3 %v3096_v62 }
 0xb98   : > { %3673 = vrsqrt.f32 %v2831_v25  ;;  %vm2882_vm10 = vmor %vm2880_vm12, %vm2881_vm9  ;;  %vm2890_vm13 = vweird.f32 %v2831_v25 }
 0xb99   : > { %v2873_v16 = vsel %vm2872_vm8, %v3670_v36, %v2869_v21  ;;  %v2876_v5 = vmul.f32 %v3672_v56, %v2875_v4  ;;  %3101 = vmatpush.msra.mxu3 %v3095_v22  ;;  %v3093_v21 = vld [vmem:[%s5565_s5 + $0x58] sm:$0xff]  ;;  %v3092_v4 = vld [vmem:[%s5565_s5 + $0x50] sm:$0xff] }
 0xb9a   : > { %v2917_v9 = vmul.f32 %v2873_v16, %v5313_v15  ;;  %v3091_v16 = vld [vmem:[%s5565_s5 + $0x48] sm:$0xff] }
 0xb9b   : > { %v2877_v31 = vmul.f32 0.5, %v2876_v5 }
 0xb9c   : > { %v2926_v60 = vmul.f32 %v5386_v48, %v2917_v9 }
 0xb9d   : > { %v2878_v57 = vsub.f32 1.5, %v2877_v31  ;;  %v3090_v31 = vld [vmem:[%s5565_s5 + $0x40] sm:$0xff] }
 0xb9e   : > { %v3674_v51 = vpop.eup %3673  ;;  %v2935_v33 = vadd.f32 %v5391_v26, %v2926_v60 }
 0xb9f   : > { %v2879_v58 = vmul.f32 %v3672_v56, %v2878_v57  ;;  %v2885_v29 = vmul.f32 %v3674_v51, %v2831_v25  ;;  %2441 = vrot.lane.b32.xlu2 %v5117_v46, %s3722_s25  ;;  %vm2891_vm11 = vweird.f32 %v3674_v51  ;;  %v3094_v25 = vld [vmem:[%s5565_s5 + $0x60] sm:$0xff]  ;;  %v3089_v57 = vld [vmem:[%s5565_s5 + $0x38] sm:$0xff] }
 0xba0   : > { %3370 = vmatmul.msk.f32.gmra.mxu1 %vm336_vm0, %v2935_v33  ;;  %v2814_v38 = vpop.xlane.xlu0 %2813  ;;  %vm2892_vm14 = vmor %vm2890_vm13, %vm2891_vm11  ;;  %3102 = vmatpush.msra.mxu3 %v3094_v25 }
 0xba1   : > { %v2883_v11 = vsel %vm2882_vm10, %v3672_v56, %v2879_v58  ;;  %v2886_v15 = vmul.f32 %v3674_v51, %v2885_v29  ;;  %v2824_v6 = vmul.f32 %v2814_v38, %v5584_v49  ;;  %v3086_v58 = vld [vmem:[%s5565_s5 + $0x20] sm:$0xff]  ;;  %v3085_v38 = vld [vmem:[%s5565_s5 + $0x18] sm:$0xff] }
 0xba2   : > { %v2918_v28 = vmul.f32 %v2883_v11, %v5320_v13  ;;  %3103 = vmatpush.msra.mxu3 %v3093_v21 }
 0xba3   : > { %v2887_v8 = vmul.f32 0.5, %v2886_v15  ;;  %v2832_v42 = vadd.f32 1e-05, %v2824_v6  ;;  %v3084_v15 = vld [vmem:[%s5565_s5 + $0x10] sm:$0xff] }
 0xba4   : > { %v2927_v17 = vmul.f32 %v5386_v48, %v2918_v28  ;;  %3104 = vmatpush.msra.mxu3 %v3092_v4  ;;  %v3083_v28 = vld [vmem:[%s5565_s5 + $0x8] sm:$0xff] }
 0xba5   : > { %v2888_v19 = vsub.f32 1.5, %v2887_v8  ;;  %3675 = vrsqrt.f32 %v2832_v42  ;;  %vm2900_vm2 = vweird.f32 %v2832_v42 }
 0xba6   : > { %v2936_v46 = vadd.f32 %v5391_v26, %v2927_v17  ;;  %3105 = vmatpush.msra.mxu3 %v3091_v16  ;;  %v3082_v17 = vld [vmem:[%s5565_s5] sm:$0xff] }
 0xba7   : > { %v2889_v45 = vmul.f32 %v3674_v51, %v2888_v19  ;;  %2447 = vrot.lane.b32.xlu2 %v5179_v59, %s3722_s25 }
 0xba8   : > { %3371 = vmatmul.msk.f32.gmra.mxu1 %vm336_vm0, %v2936_v46  ;;  %3106 = vmatpush.msra.mxu3 %v3090_v31 }
 0xba9   : > { %v2893_v47 = vsel %vm2892_vm14, %v3674_v51, %v2889_v45  ;;  %v3088_v51 = vld [vmem:[%s5565_s5 + $0x30] sm:$0xff]  ;;  %v5513_v45 = vld [vmem:[%s5566_s6 + $0x6] ss:$0 sm:$0xff] }
 0xbaa   : > { %v2919_v13 = vmul.f32 %v2893_v47, %v5327_v24  ;;  %3107 = vmatpush.msra.mxu3 %v3089_v57 }
 0xbab   : > { %v3676_v0 = vpop.eup %3675  ;;  %v1465_v39 = vpop.permute.xlu1 %1464 }
 0xbac   : > { %v2895_v52 = vmul.f32 %v3676_v0, %v2832_v42  ;;  %1489 = vst.msk [vmem:[%s4306_s9] sm:$0xff] %vm1488_vm15, %v1465_v39  ;;  %v2928_v55 = vmul.f32 %v5386_v48, %v2919_v13  ;;  %vm2901_vm1 = vweird.f32 %v3676_v0  ;;  %3108 = vmatpush.msra.mxu3 %v3088_v51 }
 0xbad   : > { %vm2902_vm3 = vmor %vm2900_vm2, %vm2901_vm1 }
 0xbae   : > { %v2896_v18 = vmul.f32 %v3676_v0, %v2895_v52  ;;  %v2937_v44 = vadd.f32 %v5391_v26, %v2928_v55 }
 0xbb0   : > { %v2897_v59 = vmul.f32 0.5, %v2896_v18  ;;  %3372 = vmatmul.msk.f32.gmra.mxu1 %vm336_vm0, %v2937_v44 }
 0xbb2   : > { %v2898_v30 = vsub.f32 1.5, %v2897_v59 }
 0xbb3   : > { %v1473_v24 = vpop.permute.xlu1 %1472  ;;  %v1467_v54 = vpop.permute.xlu0 %1466 }
 0xbb4   : > { %v2899_v32 = vmul.f32 %v3676_v0, %v2898_v30  ;;  %1493 = vst.msk [vmem:[%s4306_s9 + $0x40] sm:$0xff] %vm1488_vm15, %v1473_v24 }
 0xbb5   : > { %1490 = vst.msk [vmem:[%s4306_s9 + $0x10] sm:$0xff] %vm1488_vm15, %v1467_v54 }
 0xbb6   : > { %v2903_v35 = vsel %vm2902_vm3, %v3676_v0, %v2899_v32 }
 0xbb7   : > { %v2920_v14 = vmul.f32 %v2903_v35, %v5334_v23 }
 0xbb9   : > { %v2929_v63 = vmul.f32 %v5386_v48, %v2920_v14 }
 0xbbb   : > { %v1479_v3 = vpop.permute.xlu1 %1478  ;;  %v1471_v41 = vpop.permute.xlu0 %1470  ;;  %v2938_v36 = vadd.f32 %v5391_v26, %v2929_v63 }
 0xbbc   : > { %1496 = vst.msk [vmem:[%s4306_s9 + $0x70] sm:$0xff] %vm1488_vm15, %v1479_v3 }
 0xbbd   : > { %1492 = vst.msk [vmem:[%s4306_s9 + $0x30] sm:$0xff] %vm1488_vm15, %v1471_v41  ;;  %3373 = vmatmul.msk.f32.gmra.mxu1 %vm336_vm0, %v2938_v36 }
 0xbc3   : > { %v2438_v40 = vpop.permute.xlu1 %2437  ;;  %v1475_v2 = vpop.permute.xlu0 %1474 }
 0xbc4   : > { %2459 = vst.msk [vmem:[%s4306_s9 + $0x28] sm:$0xff] %vm1488_vm15, %v2438_v40 }
 0xbc5   : > { %1494 = vst.msk [vmem:[%s4306_s9 + $0x50] sm:$0xff] %vm1488_vm15, %v1475_v2 }
 0xbcb   : > { %v2444_v23 = vpop.permute.xlu1 %2443  ;;  %v2434_v34 = vpop.permute.xlu0 %2433 }
 0xbcc   : > { %2462 = vst.msk [vmem:[%s4306_s9 + $0x58] sm:$0xff] %vm1488_vm15, %v2444_v23 }
 0xbcd   : > { %2457 = vst.msk [vmem:[%s4306_s9 + $0x8] sm:$0xff] %vm1488_vm15, %v2434_v34 }
 0xbd3   : > { %v2440_v20 = vpop.permute.xlu0 %2439 }
 0xbd4   : > { %2460 = vst.msk [vmem:[%s4306_s9 + $0x38] sm:$0xff] %vm1488_vm15, %v2440_v20 }
 0xbdb   : > { %v2446_v56 = vpop.permute.xlu0 %2445 }
 0xbdc   : > { %2463 = vst.msk [vmem:[%s4306_s9 + $0x68] sm:$0xff] %vm1488_vm15, %v2446_v56 }
 0xbe2   : > { %v2817_v5 = vpop.xlane.xlu2 %2816 }
 0xbe3   : > { %v2825_v9 = vmul.f32 %v2817_v5, %v5584_v49  ;;  %v3087_v49 = vld [vmem:[%s5565_s5 + $0x28] sm:$0xff] }
 0xbe4   : > { %3109 = vmatpush.msra.mxu3 %v3087_v49 }
 0xbe5   : > { %v2833_v60 = vadd.f32 1e-05, %v2825_v9 }
 0xbe6   : > { %3110 = vmatpush.msra.mxu3 %v3086_v58 }
 0xbe7   : > { %3677 = vrsqrt.f32 %v2833_v60  ;;  %vm2910_vm5 = vweird.f32 %v2833_v60 }
 0xbe8   : > { %3111 = vmatpush.msra.mxu3 %v3085_v38 }
 0xbea   : > { %v1469_v33 = vpop.permute.xlu2 %1468  ;;  %3112 = vmatpush.msra.mxu3 %v3084_v15 }
 0xbeb   : > { %1491 = vst.msk [vmem:[%s4306_s9 + $0x20] sm:$0xff] %vm1488_vm15, %v1469_v33 }
 0xbec   : > { %3113 = vmatpush.msra.mxu3 %v3083_v28 }
 0xbed   : > { %v3678_v29 = vpop.eup %3677 }
 0xbee   : > { %v2905_v11 = vmul.f32 %v3678_v29, %v2833_v60  ;;  %vm2911_vm4 = vweird.f32 %v3678_v29  ;;  %3114 = vmatpush.msra.mxu3 %v3082_v17 }
 0xbef   : > { %vm2912_vm6 = vmor %vm2910_vm5, %vm2911_vm4 }
 0xbf0   : > { %v2906_v6 = vmul.f32 %v3678_v29, %v2905_v11 }
 0xbf2   : > { %v2907_v8 = vmul.f32 0.5, %v2906_v6  ;;  %v1477_v42 = vpop.permute.xlu2 %1476 }
 0xbf3   : > { %1495 = vst.msk [vmem:[%s4306_s9 + $0x60] sm:$0xff] %vm1488_vm15, %v1477_v42 }
 0xbf4   : > { %v2908_v19 = vsub.f32 1.5, %v2907_v8 }
 0xbf6   : > { %v2909_v46 = vmul.f32 %v3678_v29, %v2908_v19 }
 0xbf8   : > { %v2913_v47 = vsel %vm2912_vm6, %v3678_v29, %v2909_v46 }
 0xbf9   : > { %v2986_v13 = vpop.f32.mrf.mxu0  ;;  %v2921_v0 = vmul.f32 %v2913_v47, %v5377_v27 }
 0xbfa   : > { %v2987_v39 = vadd.f32 %v5513_v45, %v2986_v13  ;;  %v2436_v52 = vpop.permute.xlu2 %2435 }
 0xbfb   : > { %2458 = vst.msk [vmem:[%s4306_s9 + $0x18] sm:$0xff] %vm1488_vm15, %v2436_v52  ;;  %v2930_v55 = vmul.f32 %v5386_v48, %v2921_v0 }
 0xbfc   : > { %v3018_v18 = vmul.f32 0.044715, %v2987_v39  ;;  %v3010_v34 = vmul.f32 0.5, %v2987_v39 }
 0xbfd   : > { %v2939_v44 = vadd.f32 %v5391_v26, %v2930_v55 }
 0xbfe   : > { %v3026_v59 = vmul.f32 %v3018_v18, %v2987_v39 }
 0xbff   : > { %3374 = vmatmul.msk.f32.gmra.mxu1 %vm336_vm0, %v2939_v44 }
 0xc00   : > { %v3034_v30 = vmul.f32 %v3026_v59, %v2987_v39 }
 0xc01   : > { %v2989_v24 = vpop.f32.mrf.mxu1 }
 0xc02   : > { %v2990_v54 = vadd.f32 %v5513_v45, %v2989_v24  ;;  %v2442_v32 = vpop.permute.xlu2 %2441  ;;  %v3042_v27 = vadd.f32 %v3034_v30, %v2987_v39 }
 0xc03   : > { %2461 = vst.msk [vmem:[%s4306_s9 + $0x48] sm:$0xff] %vm1488_vm15, %v2442_v32 }
 0xc04   : > { %v3050_v35 = vmul.f32 0.7978846, %v3042_v27  ;;  %v3019_v14 = vmul.f32 0.044715, %v2990_v54  ;;  %v3011_v4 = vmul.f32 0.5, %v2990_v54 }
 0xc06   : > { %3679 = vtanh.f32 %v3050_v35  ;;  %v3027_v63 = vmul.f32 %v3019_v14, %v2990_v54 }
 0xc08   : > { %v3035_v48 = vmul.f32 %v3027_v63, %v2990_v54 }
 0xc09   : > { %v2992_v3 = vpop.f32.mrf.mxu1 }
 0xc0a   : > { %v2993_v26 = vadd.f32 %v5513_v45, %v2992_v3  ;;  %v2448_v41 = vpop.permute.xlu2 %2447  ;;  %v3043_v36 = vadd.f32 %v3035_v48, %v2990_v54 }
 0xc0b   : > { %2464 = vst.msk [vmem:[%s4306_s9 + $0x78] sm:$0xff] %vm1488_vm15, %v2448_v41 }
 0xc0c   : > { %v3680_v40 = vpop.eup %3679  ;;  %v3051_v2 = vmul.f32 0.7978846, %v3043_v36  ;;  %v3020_v23 = vmul.f32 0.044715, %v2993_v26  ;;  %v3012_v60 = vmul.f32 0.5, %v2993_v26 }
 0xc0d   : > { %v3066_v20 = vadd.f32 1.0, %v3680_v40 }
 0xc0e   : > { %3681 = vtanh.f32 %v3051_v2  ;;  %v3028_v10 = vmul.f32 %v3020_v23, %v2993_v26 }
 0xc0f   : > { %v3074_v62 = vmul.f32 %v3066_v20, %v3010_v34 }
 0xc10   : > { %v3036_v22 = vmul.f32 %v3028_v10, %v2993_v26 }
 0xc11   : > { %3115 = vmatmul.f32.vlgmr.msra.gmra.mxu3 %v3074_v62 }
 0xc12   : > { %v3044_v56 = vadd.f32 %v3036_v22, %v2993_v26 }
 0xc14   : > { %v3682_v25 = vpop.eup %3681  ;;  %v3052_v21 = vmul.f32 0.7978846, %v3044_v56 }
 0xc15   : > { %v3067_v16 = vadd.f32 1.0, %v3682_v25 }
 0xc16   : > { %3683 = vtanh.f32 %v3052_v21 }
 0xc17   : > { %v3075_v5 = vmul.f32 %v3067_v16, %v3011_v4 }
 0xc19   : > { %3118 = vmatmul.f32.gmra.mxu3 %v3075_v5 }
 0xc1c   : > { %v3684_v9 = vpop.eup %3683 }
 0xc1d   : > { %v2995_v31 = vpop.f32.mrf.mxu1  ;;  %v3068_v57 = vadd.f32 1.0, %v3684_v9 }
 0xc1e   : > { %v2996_v51 = vadd.f32 %v5513_v45, %v2995_v31 }
 0xc1f   : > { %v3076_v49 = vmul.f32 %v3068_v57, %v3012_v60  ;;  %v3514_v57 = vld [vmem:[%s5566_s6 + $0x5] ss:$0 sm:$0xff] }
 0xc20   : > { %v3021_v33 = vmul.f32 0.044715, %v2996_v51  ;;  %v3013_v39 = vmul.f32 0.5, %v2996_v51 }
 0xc21   : > { %3121 = vmatmul.f32.gmra.mxu3 %v3076_v49 }
 0xc22   : > { %v3029_v58 = vmul.f32 %v3021_v33, %v2996_v51 }
 0xc24   : > { %v3037_v29 = vmul.f32 %v3029_v58, %v2996_v51 }
 0xc25   : > { %v2998_v38 = vpop.f32.mrf.mxu1 }
 0xc26   : > { %v2999_v11 = vadd.f32 %v5513_v45, %v2998_v38  ;;  %v3045_v15 = vadd.f32 %v3037_v29, %v2996_v51 }
 0xc28   : > { %v3053_v6 = vmul.f32 0.7978846, %v3045_v15  ;;  %v3022_v28 = vmul.f32 0.044715, %v2999_v11  ;;  %v3014_v54 = vmul.f32 0.5, %v2999_v11 }
 0xc2a   : > { %3685 = vtanh.f32 %v3053_v6  ;;  %v3030_v8 = vmul.f32 %v3022_v28, %v2999_v11 }
 0xc2c   : > { %v3038_v42 = vmul.f32 %v3030_v8, %v2999_v11 }
 0xc2d   : > { %v3001_v17 = vpop.f32.mrf.mxu1 }
 0xc2e   : > { %v3002_v19 = vadd.f32 %v5513_v45, %v3001_v17  ;;  %v3046_v46 = vadd.f32 %v3038_v42, %v2999_v11 }
 0xc30   : > { %v3686_v47 = vpop.eup %3685  ;;  %v3054_v13 = vmul.f32 0.7978846, %v3046_v46  ;;  %v3023_v0 = vmul.f32 0.044715, %v3002_v19  ;;  %v3015_v26 = vmul.f32 0.5, %v3002_v19 }
 0xc31   : > { %v3069_v52 = vadd.f32 1.0, %v3686_v47 }
 0xc32   : > { %3687 = vtanh.f32 %v3054_v13  ;;  %v3031_v55 = vmul.f32 %v3023_v0, %v3002_v19 }
 0xc33   : > { %v3077_v18 = vmul.f32 %v3069_v52, %v3013_v39 }
 0xc34   : > { %v3039_v44 = vmul.f32 %v3031_v55, %v3002_v19 }
 0xc35   : > { %3124 = vmatmul.f32.gmra.mxu3 %v3077_v18 }
 0xc36   : > { %v3047_v59 = vadd.f32 %v3039_v44, %v3002_v19 }
 0xc38   : > { %v3688_v30 = vpop.eup %3687  ;;  %v3055_v24 = vmul.f32 0.7978846, %v3047_v59 }
 0xc39   : > { %v3070_v32 = vadd.f32 1.0, %v3688_v30 }
 0xc3a   : > { %v3004_v27 = vpop.f32.mrf.mxu1  ;;  %3689 = vtanh.f32 %v3055_v24 }
 0xc3b   : > { %v3005_v35 = vadd.f32 %v5513_v45, %v3004_v27  ;;  %v3078_v14 = vmul.f32 %v3070_v32, %v3014_v54 }
 0xc3d   : > { %3127 = vmatmul.f32.gmra.mxu3 %v3078_v14  ;;  %v3024_v63 = vmul.f32 0.044715, %v3005_v35  ;;  %v3016_v20 = vmul.f32 0.5, %v3005_v35 }
 0xc3f   : > { %v3032_v48 = vmul.f32 %v3024_v63, %v3005_v35 }
 0xc40   : > { %v3690_v3 = vpop.eup %3689 }
 0xc41   : > { %v3071_v41 = vadd.f32 1.0, %v3690_v3  ;;  %v3040_v36 = vmul.f32 %v3032_v48, %v3005_v35 }
 0xc43   : > { %v3079_v40 = vmul.f32 %v3071_v41, %v3015_v26  ;;  %v3048_v2 = vadd.f32 %v3040_v36, %v3005_v35 }
 0xc45   : > { %3130 = vmatmul.f32.gmra.mxu3 %v3079_v40  ;;  %v3056_v23 = vmul.f32 0.7978846, %v3048_v2 }
 0xc47   : > { %3691 = vtanh.f32 %v3056_v23 }
 0xc4d   : > { %v3692_v34 = vpop.eup %3691 }
 0xc4e   : > { %v3072_v10 = vadd.f32 1.0, %v3692_v34 }
 0xc50   : > { %v3080_v62 = vmul.f32 %v3072_v10, %v3016_v20 }
 0xc52   : > { %3133 = vmatmul.f32.gmra.mxu3 %v3080_v62 }
 0xc7c   : > { %v3007_v22 = vpop.f32.mrf.mxu1 }
 0xc7d   : > { %v3008_v56 = vadd.f32 %v5513_v45, %v3007_v22 }
 0xc7f   : > { %v3025_v25 = vmul.f32 0.044715, %v3008_v56  ;;  %v3017_v31 = vmul.f32 0.5, %v3008_v56 }
 0xc81   : > { %v3033_v21 = vmul.f32 %v3025_v25, %v3008_v56 }
 0xc83   : > { %v3041_v4 = vmul.f32 %v3033_v21, %v3008_v56 }
 0xc85   : > { %v3049_v16 = vadd.f32 %v3041_v4, %v3008_v56 }
 0xc87   : > { %v3057_v5 = vmul.f32 0.7978846, %v3049_v16 }
 0xc89   : > { %3693 = vtanh.f32 %v3057_v5 }
 0xc8f   : > { %v3694_v9 = vpop.eup %3693 }
 0xc90   : > { %v3073_v60 = vadd.f32 1.0, %v3694_v9 }
 0xc92   : > { %v3081_v51 = vmul.f32 %v3073_v60, %v3017_v31 }
 0xc94   : > { %v3116_v49 = vpop.f32.mrf.mxu3  ;;  %3136 = vmatmul.f32.gmra.mxu3 %v3081_v51 }
 0xc95   : > { %v3117_v33 = vadd.f32 %v3514_v57, %v3116_v49 }
 0xc97   : > { %v3140_v45 = vadd.f32 %v3117_v33, %v5251_v43 }
 0xc99   : > { %3148 = vst.msk [vmem:[%s313_s12] sm:$0xff] %vm336_vm0, %v3140_v45 }
 0xc9c   : > { %v3119_v58 = vpop.f32.mrf.mxu3 }
 0xc9d   : > { %v3120_v29 = vadd.f32 %v3514_v57, %v3119_v58 }
 0xc9f   : > { %v3141_v38 = vadd.f32 %v3120_v29, %v5256_v61 }
 0xca1   : > { %3149 = vst.msk [vmem:[%s313_s12 + $0x8] sm:$0xff] %vm336_vm0, %v3141_v38 }
 0xca4   : > { %v3122_v11 = vpop.f32.mrf.mxu3 }
 0xca5   : > { %v3123_v15 = vadd.f32 %v3514_v57, %v3122_v11 }
 0xca7   : > { %v3142_v6 = vadd.f32 %v3123_v15, %v5261_v50 }
 0xca9   : > { %3150 = vst.msk [vmem:[%s313_s12 + $0x10] sm:$0xff] %vm336_vm0, %v3142_v6 }
 0xcb8   : > { %v3125_v28 = vpop.f32.mrf.mxu3 }
 0xcb9   : > { %v3126_v8 = vadd.f32 %v3514_v57, %v3125_v28 }
 0xcbb   : > { %v3143_v42 = vadd.f32 %v3126_v8, %v5266_v7 }
 0xcbd   : > { %3151 = vst.msk [vmem:[%s313_s12 + $0x18] sm:$0xff] %vm336_vm0, %v3143_v42 }
 0xcc0   : > { %v3128_v43 = vpop.f32.mrf.mxu3 }
 0xcc1   : > { %v3129_v17 = vadd.f32 %v3514_v57, %v3128_v43 }
 0xcc3   : > { %v3144_v19 = vadd.f32 %v3129_v17, %v5271_v53 }
 0xcc5   : > { %3152 = vst.msk [vmem:[%s313_s12 + $0x20] sm:$0xff] %vm336_vm0, %v3144_v19 }
 0xcc8   : > { %v3131_v61 = vpop.f32.mrf.mxu3 }
 0xcc9   : > { %v3132_v46 = vadd.f32 %v3514_v57, %v3131_v61 }
 0xccb   : > { %v3145_v47 = vadd.f32 %v3132_v46, %v5276_v1 }
 0xccd   : > { %3153 = vst.msk [vmem:[%s313_s12 + $0x28] sm:$0xff] %vm336_vm0, %v3145_v47 }
 0xcd5   : > { %v3134_v50 = vpop.f32.mrf.mxu3 }
 0xcd6   : > { %v3135_v13 = vadd.f32 %v3514_v57, %v3134_v50 }
 0xcd8   : > { %v3146_v0 = vadd.f32 %v3135_v13, %v5281_v37 }
 0xcda   : > { %3154 = vst.msk [vmem:[%s313_s12 + $0x30] sm:$0xff] %vm336_vm0, %v3146_v0 }
 0xd17   : > { %v3137_v7 = vpop.f32.mrf.mxu3 }
 0xd18   : > { %v3138_v39 = vadd.f32 %v3514_v57, %v3137_v7 }
 0xd1a   : > { %v3147_v52 = vadd.f32 %v3138_v39, %v5294_v12 }
 0xd1c   : > { %3155 = vst.msk [vmem:[%s313_s12 + $0x38] sm:$0xff] %vm336_vm0, %v3147_v52 }
 0xd1d PF: > { %s19_s27 = sadd.s32 1, %s3717_s27  }
 0xd1e   : > { %p16_p8 = scmp.ge.s32.totalorder %s19_s27, 4  }
 0xd20   :  { %18 = sbr.rel (!%p16_p8) target bundleno = 1 (0x1), region = 90 }

</bundles_post_ra>
